<compile_context>
chip_gen: v5e
topology: v5e:2x2
jax: 0.10.0
libtpu: 0.0.40
codegen_flags: <defaults>
</compile_context>

<pallas_src>
import jax
import jax.numpy as jnp
import numpy as np
from jax.experimental import pallas as pl
from jax.experimental.pallas import tpu as pltpu


def _vmem_specs(n):
    return [pl.BlockSpec(memory_space=pltpu.MemorySpace.VMEM) for _ in range(n)]


# ----------------- Fused kernel: compress -> GRU -> FC ------------------------
def gru_fused_kernel(x_ref, w1_ref, b1_ref, w2ih_ref, b2ih_ref,
                     whh_ref, bhhn_ref, wf1_ref, bf1_ref, wf2t_ref, bf2_ref,
                     out_ref):
    B = x_ref.shape[0]
    H = whh_ref.shape[0]            # hidden size (256)
    G = whh_ref.shape[1]            # 3 * H
    T = w2ih_ref.shape[1] // G      # seq_len // com

    # ---- compress_seq layer 1: Linear(S*F, T) + ReLU (f32 data path) ---------
    h1 = jnp.maximum(
        jnp.dot(x_ref[...], w1_ref[...], preferred_element_type=jnp.float32)
        + b1_ref[...], 0.0)                                          # (B, T)

    # ---- compress layer 2 fused with GRU input projection (hoisted) ----------
    # gi_all[:, t*G:(t+1)*G] == x_com[:, t, :] @ w_ih + b_ih + [b_hh_r, b_hh_z, 0]
    # (biases folded in at prep time).  bf16 MXU, f32 accumulation.
    gi_all = jnp.dot(h1.astype(jnp.bfloat16), w2ih_ref[...],
                     preferred_element_type=jnp.float32) + b2ih_ref[...]  # (B, T*G)

    # ---- GRU recurrence (PyTorch gate order [r, z, n]) ------------------------
    whh = whh_ref[...]                                    # (H, 3H) bf16
    bhhn = jnp.broadcast_to(bhhn_ref[...], (B, H))        # n-gate bias, hoisted
    h = jnp.zeros((B, H), jnp.float32)
    # T is small and static -> plain Python loop == full unroll, static slices.
    # TODO(synk): weight-stationary MXU (pltpu.matmul_push_rhs once, acc/pop per
    # step) would remove ~7/8 of the per-step weight-push latency here.
    for t in range(T):
        gi = gi_all[:, t * G:(t + 1) * G]                              # (B, 3H)
        gh = jnp.dot(h.astype(jnp.bfloat16), whh,
                     preferred_element_type=jnp.float32)               # (B, 3H)
        r = jax.nn.sigmoid(gi[:, :H] + gh[:, :H])
        z = jax.nn.sigmoid(gi[:, H:2 * H] + gh[:, H:2 * H])
        n = jnp.tanh(gi[:, 2 * H:] + r * (gh[:, 2 * H:] + bhhn))
        h = n + z * (h - n)          # == (1 - z) * n + z * h

    # ---- FC head: Linear(H, 256) -> ReLU -> Linear(256, 1) -> ReLU -----------
    f = jnp.maximum(
        jnp.dot(h.astype(jnp.bfloat16), wf1_ref[...],
                preferred_element_type=jnp.float32) + bf1_ref[...], 0.0)  # (B, 256)
    # Final Linear(256, 1) as VPU multiply + lane reduction (wf2 passed as row).
    o = jnp.sum(f * wf2t_ref[...], axis=-1, keepdims=True) + bf2_ref[...]
    out_ref[...] = jnp.maximum(o, 0.0)


# ----------------- Parameter init (deterministic, PyTorch-like fan-in scale) --
def init_params(key, input_size, seq_len, hidden_size=256, com=10):
    T = seq_len // com
    F = input_size
    H = hidden_size

    def u(k, shape, fan_in):
        s = 1.0 / np.sqrt(fan_in)
        return jax.random.uniform(k, shape, jnp.float32, -s, s)

    ks = jax.random.split(key, 12)
    return dict(
        # compress_seq: Linear(S*F, T) -> ReLU -> Linear(T, T*F)
        w1=u(ks[0], (seq_len * F, T), seq_len * F), b1=u(ks[1], (1, T), seq_len * F),
        w2=u(ks[2], (T, T * F), T),                 b2=u(ks[3], (1, T * F), T),
        # GRU(input_size=F, hidden_size=H), gate order [r, z, n]
        w_ih=u(ks[4], (F, 3 * H), H), b_ih=u(ks[5], (1, 3 * H), H),
        w_hh=u(ks[6], (H, 3 * H), H), b_hh=u(ks[7], (1, 3 * H), H),
        # FC: Linear(H, 256) -> ReLU -> [Dropout] -> Linear(256, 1) -> ReLU
        wf1=u(ks[8], (H, 256), H),    bf1=u(ks[9], (1, 256), H),
        wf2=u(ks[10], (256, 1), 256), bf2=u(ks[11], (1, 1), 256),
    )


# ----------------- One-time parameter preparation (hoisted out of the call) ---
def prepare_params(params, seq_len, feature_size, com=10):
    """Fold compress layer-2 through the GRU input projection, fold the exact
    bias terms (b_ih, and the r/z slices of b_hh) into a per-timestep bias,
    and cast the large weights to bf16.  Runs once at parameter-load time."""
    T = seq_len // com
    F = feature_size
    H = params["w_hh"].shape[0]
    G = 3 * H
    hp = jax.lax.Precision.HIGHEST

    # gi[b, t, g] = sum_f x_com[b, t, f] * w_ih[f, g]  with x_com = h1 @ w2 + b2
    w2ih = jnp.einsum("jtf,fg->jtg", params["w2"].reshape(T, T, F),
                      params["w_ih"], precision=hp).reshape(T, T * G)
    b2ih = (jnp.einsum("tf,fg->tg", params["b2"].reshape(T, F),
                       params["w_ih"], precision=hp)
            + params["b_ih"]).reshape(1, T * G)
    # Exact fold of the r/z slices of b_hh (purely additive in the gate
    # pre-activations).  The n slice must stay inside r * (.) in the loop.
    bhh_rz = jnp.concatenate(
        [params["b_hh"][:, :2 * H], jnp.zeros((1, H), jnp.float32)], axis=1)
    b2ih = b2ih + jnp.tile(bhh_rz, (1, T))

    return dict(
        w1=params["w1"], b1=params["b1"],                     # f32 data path
        w2ih=w2ih.astype(jnp.bfloat16), b2ih=b2ih,
        w_hh=params["w_hh"].astype(jnp.bfloat16),
        bhh_n=params["b_hh"][:, 2 * H:],
        wf1=params["wf1"].astype(jnp.bfloat16), bf1=params["bf1"],
        wf2t=params["wf2"].reshape(1, -1), bf2=params["bf2"],
    )


# ----------------- Full forward pass (single fused pallas_call) ---------------
def gru_model_forward(prep, x, seq_len, feature_size, com=10):
    B = x.shape[0]
    x_flat = x.astype(jnp.float32).reshape(B, seq_len * feature_size)

    # Everything fits comfortably in VMEM at these shapes, so a single gridless
    # call is optimal.  For large B, add a batch grid with
    # dimension_semantics=("parallel",) (constant weight block indices) to use
    # both v7x TensorCores and overlap x-tile DMA with the recurrence.
    out = pl.pallas_call(
        gru_fused_kernel,
        out_shape=jax.ShapeDtypeStruct((B, 1), jnp.float32),
        in_specs=_vmem_specs(11),
        out_specs=pl.BlockSpec(memory_space=pltpu.MemorySpace.VMEM),
    )(x_flat, prep["w1"], prep["b1"], prep["w2ih"], prep["b2ih"],
      prep["w_hh"], prep["bhh_n"],
      prep["wf1"], prep["bf1"], prep["wf2t"], prep["bf2"])
    return jnp.squeeze(out)                         # torch.squeeze(out)


# ----------------- Pure-JAX reference for verification ------------------------
def reference_forward(params, x, seq_len, feature_size, com=10):
    with jax.default_matmul_precision("highest"):
        B = x.shape[0]
        x = x.astype(jnp.float32).reshape(B, seq_len * feature_size)
        h1 = jnp.maximum(x @ params["w1"] + params["b1"], 0.0)
        xc = (h1 @ params["w2"] + params["b2"]).reshape(B, seq_len // com, feature_size)
        H = params["w_hh"].shape[0]
        h = jnp.zeros((B, H), jnp.float32)
        for t in range(seq_len // com):
            gi = xc[:, t] @ params["w_ih"] + params["b_ih"]
            gh = h @ params["w_hh"] + params["b_hh"]
            r = jax.nn.sigmoid(gi[:, :H] + gh[:, :H])
            z = jax.nn.sigmoid(gi[:, H:2 * H] + gh[:, H:2 * H])
            n = jnp.tanh(gi[:, 2 * H:] + r * gh[:, 2 * H:])
            h = (1.0 - z) * n + z * h
        f = jnp.maximum(h @ params["wf1"] + params["bf1"], 0.0)
        out = jnp.maximum(f @ params["wf2"] + params["bf2"], 0.0)
        return jnp.squeeze(out)


if __name__ == "__main__":
    # Small shapes consistent with the module: seq_len divisible by com=10,
    # hidden_size fixed at 256 by the module definition.
    B, SEQ_LEN, FEATURE_SIZE, COM = 2, 80, 4, 10

    key = jax.random.PRNGKey(0)
    pkey, xkey = jax.random.split(key)
    params = init_params(pkey, FEATURE_SIZE, SEQ_LEN, hidden_size=256, com=COM)
    prep = prepare_params(params, SEQ_LEN, FEATURE_SIZE, com=COM)   # one-time
    x = jax.random.normal(xkey, (B, SEQ_LEN, FEATURE_SIZE), jnp.float32)

    out = gru_model_forward(prep, x, SEQ_LEN, FEATURE_SIZE, COM)
    out = jax.block_until_ready(out)

    ref = jax.block_until_ready(reference_forward(params, x, SEQ_LEN, FEATURE_SIZE, COM))
    np.testing.assert_allclose(np.asarray(out), np.asarray(ref), rtol=2e-2, atol=2e-2)

    print("KERNEL_OK")
</pallas_src>

<mosaic_0001>
module attributes {stable_mosaic.version = 11 : i64} {
  func.func @gru_fused_kernel(%arg0: memref<2x320xf32, #tpu.memory_space<vmem>>, %arg1: memref<320x8xf32, #tpu.memory_space<vmem>>, %arg2: memref<1x8xf32, #tpu.memory_space<vmem>>, %arg3: memref<8x6144xbf16, #tpu.memory_space<vmem>>, %arg4: memref<1x6144xf32, #tpu.memory_space<vmem>>, %arg5: memref<256x768xbf16, #tpu.memory_space<vmem>>, %arg6: memref<1x256xf32, #tpu.memory_space<vmem>>, %arg7: memref<256x256xbf16, #tpu.memory_space<vmem>>, %arg8: memref<1x256xf32, #tpu.memory_space<vmem>>, %arg9: memref<1x256xf32, #tpu.memory_space<vmem>>, %arg10: memref<1x1xf32, #tpu.memory_space<vmem>>, %arg11: memref<2x1xf32, #tpu.memory_space<vmem>>) attributes {dimension_semantics = [], scalar_prefetch = 0 : i64, scratch_operands = 0 : i64, tpu.core_type = #tpu.core_type<tc>} {
    %c0 = arith.constant 0 : index
    %c0_0 = arith.constant 0 : index
    %0 = vector.load %arg0[%c0, %c0_0] : memref<2x320xf32, #tpu.memory_space<vmem>>, vector<2x320xf32>
    %c0_1 = arith.constant 0 : index
    %c0_2 = arith.constant 0 : index
    %1 = vector.load %arg1[%c0_1, %c0_2] : memref<320x8xf32, #tpu.memory_space<vmem>>, vector<320x8xf32>
    %cst = arith.constant dense<0.000000e+00> : vector<2x8xf32>
    %2 = tpu.matmul %0, %1, %cst {dimension_numbers = #tpu.dot_dimension_numbers<[1], [0], [0], [1], [0, 0, 1, 1], [], []>} : vector<2x320xf32>, vector<320x8xf32>, vector<2x8xf32> -> vector<2x8xf32>
    %c0_3 = arith.constant 0 : index
    %c0_4 = arith.constant 0 : index
    %3 = vector.load %arg2[%c0_3, %c0_4] : memref<1x8xf32, #tpu.memory_space<vmem>>, vector<1x8xf32>
    %4 = vector.broadcast %3 : vector<1x8xf32> to vector<2x8xf32>
    %5 = arith.addf %2, %4 : vector<2x8xf32>
    %cst_5 = arith.constant 0.000000e+00 : f32
    %6 = vector.broadcast %cst_5 : f32 to vector<2x8xf32>
    %7 = arith.maximumf %5, %6 : vector<2x8xf32>
    %8 = arith.truncf %7 : vector<2x8xf32> to vector<2x8xbf16>
    %c0_6 = arith.constant 0 : index
    %c0_7 = arith.constant 0 : index
    %9 = vector.load %arg3[%c0_6, %c0_7] : memref<8x6144xbf16, #tpu.memory_space<vmem>>, vector<8x6144xbf16>
    %cst_8 = arith.constant dense<0.000000e+00> : vector<2x6144xf32>
    %10 = tpu.matmul %8, %9, %cst_8 {dimension_numbers = #tpu.dot_dimension_numbers<[1], [0], [0], [1], [0, 0, 1, 1], [], []>} : vector<2x8xbf16>, vector<8x6144xbf16>, vector<2x6144xf32> -> vector<2x6144xf32>
    %c0_9 = arith.constant 0 : index
    %c0_10 = arith.constant 0 : index
    %11 = vector.load %arg4[%c0_9, %c0_10] : memref<1x6144xf32, #tpu.memory_space<vmem>>, vector<1x6144xf32>
    %12 = vector.broadcast %11 : vector<1x6144xf32> to vector<2x6144xf32>
    %13 = arith.addf %10, %12 : vector<2x6144xf32>
    %c0_11 = arith.constant 0 : index
    %c0_12 = arith.constant 0 : index
    %14 = vector.load %arg5[%c0_11, %c0_12] : memref<256x768xbf16, #tpu.memory_space<vmem>>, vector<256x768xbf16>
    %c0_13 = arith.constant 0 : index
    %c0_14 = arith.constant 0 : index
    %15 = vector.load %arg6[%c0_13, %c0_14] : memref<1x256xf32, #tpu.memory_space<vmem>>, vector<1x256xf32>
    %16 = vector.shape_cast %15 : vector<1x256xf32> to vector<1x256xf32>
    %17 = vector.broadcast %16 : vector<1x256xf32> to vector<2x256xf32>
    %cst_15 = arith.constant 0.000000e+00 : f32
    %18 = vector.broadcast %cst_15 : f32 to vector<2x256xf32>
    %19 = vector.extract_strided_slice %13 {offsets = [0, 0], sizes = [2, 768], strides = [1, 1]} : vector<2x6144xf32> to vector<2x768xf32>
    %20 = arith.truncf %18 : vector<2x256xf32> to vector<2x256xbf16>
    %cst_16 = arith.constant dense<0.000000e+00> : vector<2x768xf32>
    %21 = tpu.matmul %20, %14, %cst_16 {dimension_numbers = #tpu.dot_dimension_numbers<[1], [0], [0], [1], [0, 0, 1, 1], [], []>} : vector<2x256xbf16>, vector<256x768xbf16>, vector<2x768xf32> -> vector<2x768xf32>
    %22 = vector.extract_strided_slice %19 {offsets = [0, 0], sizes = [2, 256], strides = [1, 1]} : vector<2x768xf32> to vector<2x256xf32>
    %23 = vector.extract_strided_slice %21 {offsets = [0, 0], sizes = [2, 256], strides = [1, 1]} : vector<2x768xf32> to vector<2x256xf32>
    %24 = arith.addf %22, %23 : vector<2x256xf32>
    %25 = arith.negf %24 : vector<2x256xf32>
    %26 = math.exp %25 : vector<2x256xf32>
    %cst_17 = arith.constant 1.000000e+00 : f32
    %27 = vector.broadcast %cst_17 : f32 to vector<2x256xf32>
    %28 = arith.addf %27, %26 : vector<2x256xf32>
    %29 = arith.divf %27, %28 : vector<2x256xf32>
    %30 = vector.extract_strided_slice %19 {offsets = [0, 256], sizes = [2, 256], strides = [1, 1]} : vector<2x768xf32> to vector<2x256xf32>
    %31 = vector.extract_strided_slice %21 {offsets = [0, 256], sizes = [2, 256], strides = [1, 1]} : vector<2x768xf32> to vector<2x256xf32>
    %32 = arith.addf %30, %31 : vector<2x256xf32>
    %33 = arith.negf %32 : vector<2x256xf32>
    %34 = math.exp %33 : vector<2x256xf32>
    %cst_18 = arith.constant 1.000000e+00 : f32
    %35 = vector.broadcast %cst_18 : f32 to vector<2x256xf32>
    %36 = arith.addf %35, %34 : vector<2x256xf32>
    %37 = arith.divf %35, %36 : vector<2x256xf32>
    %38 = vector.extract_strided_slice %19 {offsets = [0, 512], sizes = [2, 256], strides = [1, 1]} : vector<2x768xf32> to vector<2x256xf32>
    %39 = vector.extract_strided_slice %21 {offsets = [0, 512], sizes = [2, 256], strides = [1, 1]} : vector<2x768xf32> to vector<2x256xf32>
    %40 = arith.addf %39, %17 : vector<2x256xf32>
    %41 = arith.mulf %29, %40 : vector<2x256xf32>
    %42 = arith.addf %38, %41 : vector<2x256xf32>
    %43 = math.tanh %42 : vector<2x256xf32>
    %44 = arith.subf %18, %43 : vector<2x256xf32>
    %45 = arith.mulf %37, %44 : vector<2x256xf32>
    %46 = arith.addf %43, %45 : vector<2x256xf32>
    %47 = vector.extract_strided_slice %13 {offsets = [0, 768], sizes = [2, 768], strides = [1, 1]} : vector<2x6144xf32> to vector<2x768xf32>
    %48 = arith.truncf %46 : vector<2x256xf32> to vector<2x256xbf16>
    %cst_19 = arith.constant dense<0.000000e+00> : vector<2x768xf32>
    %49 = tpu.matmul %48, %14, %cst_19 {dimension_numbers = #tpu.dot_dimension_numbers<[1], [0], [0], [1], [0, 0, 1, 1], [], []>} : vector<2x256xbf16>, vector<256x768xbf16>, vector<2x768xf32> -> vector<2x768xf32>
    %50 = vector.extract_strided_slice %47 {offsets = [0, 0], sizes = [2, 256], strides = [1, 1]} : vector<2x768xf32> to vector<2x256xf32>
    %51 = vector.extract_strided_slice %49 {offsets = [0, 0], sizes = [2, 256], strides = [1, 1]} : vector<2x768xf32> to vector<2x256xf32>
    %52 = arith.addf %50, %51 : vector<2x256xf32>
    %53 = arith.negf %52 : vector<2x256xf32>
    %54 = math.exp %53 : vector<2x256xf32>
    %cst_20 = arith.constant 1.000000e+00 : f32
    %55 = vector.broadcast %cst_20 : f32 to vector<2x256xf32>
    %56 = arith.addf %55, %54 : vector<2x256xf32>
    %57 = arith.divf %55, %56 : vector<2x256xf32>
    %58 = vector.extract_strided_slice %47 {offsets = [0, 256], sizes = [2, 256], strides = [1, 1]} : vector<2x768xf32> to vector<2x256xf32>
    %59 = vector.extract_strided_slice %49 {offsets = [0, 256], sizes = [2, 256], strides = [1, 1]} : vector<2x768xf32> to vector<2x256xf32>
    %60 = arith.addf %58, %59 : vector<2x256xf32>
    %61 = arith.negf %60 : vector<2x256xf32>
    %62 = math.exp %61 : vector<2x256xf32>
    %cst_21 = arith.constant 1.000000e+00 : f32
    %63 = vector.broadcast %cst_21 : f32 to vector<2x256xf32>
    %64 = arith.addf %63, %62 : vector<2x256xf32>
    %65 = arith.divf %63, %64 : vector<2x256xf32>
    %66 = vector.extract_strided_slice %47 {offsets = [0, 512], sizes = [2, 256], strides = [1, 1]} : vector<2x768xf32> to vector<2x256xf32>
    %67 = vector.extract_strided_slice %49 {offsets = [0, 512], sizes = [2, 256], strides = [1, 1]} : vector<2x768xf32> to vector<2x256xf32>
    %68 = arith.addf %67, %17 : vector<2x256xf32>
    %69 = arith.mulf %57, %68 : vector<2x256xf32>
    %70 = arith.addf %66, %69 : vector<2x256xf32>
    %71 = math.tanh %70 : vector<2x256xf32>
    %72 = arith.subf %46, %71 : vector<2x256xf32>
    %73 = arith.mulf %65, %72 : vector<2x256xf32>
    %74 = arith.addf %71, %73 : vector<2x256xf32>
    %75 = vector.extract_strided_slice %13 {offsets = [0, 1536], sizes = [2, 768], strides = [1, 1]} : vector<2x6144xf32> to vector<2x768xf32>
    %76 = arith.truncf %74 : vector<2x256xf32> to vector<2x256xbf16>
    %cst_22 = arith.constant dense<0.000000e+00> : vector<2x768xf32>
    %77 = tpu.matmul %76, %14, %cst_22 {dimension_numbers = #tpu.dot_dimension_numbers<[1], [0], [0], [1], [0, 0, 1, 1], [], []>} : vector<2x256xbf16>, vector<256x768xbf16>, vector<2x768xf32> -> vector<2x768xf32>
    %78 = vector.extract_strided_slice %75 {offsets = [0, 0], sizes = [2, 256], strides = [1, 1]} : vector<2x768xf32> to vector<2x256xf32>
    %79 = vector.extract_strided_slice %77 {offsets = [0, 0], sizes = [2, 256], strides = [1, 1]} : vector<2x768xf32> to vector<2x256xf32>
    %80 = arith.addf %78, %79 : vector<2x256xf32>
    %81 = arith.negf %80 : vector<2x256xf32>
    %82 = math.exp %81 : vector<2x256xf32>
    %cst_23 = arith.constant 1.000000e+00 : f32
    %83 = vector.broadcast %cst_23 : f32 to vector<2x256xf32>
    %84 = arith.addf %83, %82 : vector<2x256xf32>
    %85 = arith.divf %83, %84 : vector<2x256xf32>
    %86 = vector.extract_strided_slice %75 {offsets = [0, 256], sizes = [2, 256], strides = [1, 1]} : vector<2x768xf32> to vector<2x256xf32>
    %87 = vector.extract_strided_slice %77 {offsets = [0, 256], sizes = [2, 256], strides = [1, 1]} : vector<2x768xf32> to vector<2x256xf32>
    %88 = arith.addf %86, %87 : vector<2x256xf32>
    %89 = arith.negf %88 : vector<2x256xf32>
    %90 = math.exp %89 : vector<2x256xf32>
    %cst_24 = arith.constant 1.000000e+00 : f32
    %91 = vector.broadcast %cst_24 : f32 to vector<2x256xf32>
    %92 = arith.addf %91, %90 : vector<2x256xf32>
    %93 = arith.divf %91, %92 : vector<2x256xf32>
    %94 = vector.extract_strided_slice %75 {offsets = [0, 512], sizes = [2, 256], strides = [1, 1]} : vector<2x768xf32> to vector<2x256xf32>
    %95 = vector.extract_strided_slice %77 {offsets = [0, 512], sizes = [2, 256], strides = [1, 1]} : vector<2x768xf32> to vector<2x256xf32>
    %96 = arith.addf %95, %17 : vector<2x256xf32>
    %97 = arith.mulf %85, %96 : vector<2x256xf32>
    %98 = arith.addf %94, %97 : vector<2x256xf32>
    %99 = math.tanh %98 : vector<2x256xf32>
    %100 = arith.subf %74, %99 : vector<2x256xf32>
    %101 = arith.mulf %93, %100 : vector<2x256xf32>
    %102 = arith.addf %99, %101 : vector<2x256xf32>
    %103 = vector.extract_strided_slice %13 {offsets = [0, 2304], sizes = [2, 768], strides = [1, 1]} : vector<2x6144xf32> to vector<2x768xf32>
    %104 = arith.truncf %102 : vector<2x256xf32> to vector<2x256xbf16>
    %cst_25 = arith.constant dense<0.000000e+00> : vector<2x768xf32>
    %105 = tpu.matmul %104, %14, %cst_25 {dimension_numbers = #tpu.dot_dimension_numbers<[1], [0], [0], [1], [0, 0, 1, 1], [], []>} : vector<2x256xbf16>, vector<256x768xbf16>, vector<2x768xf32> -> vector<2x768xf32>
    %106 = vector.extract_strided_slice %103 {offsets = [0, 0], sizes = [2, 256], strides = [1, 1]} : vector<2x768xf32> to vector<2x256xf32>
    %107 = vector.extract_strided_slice %105 {offsets = [0, 0], sizes = [2, 256], strides = [1, 1]} : vector<2x768xf32> to vector<2x256xf32>
    %108 = arith.addf %106, %107 : vector<2x256xf32>
    %109 = arith.negf %108 : vector<2x256xf32>
    %110 = math.exp %109 : vector<2x256xf32>
    %cst_26 = arith.constant 1.000000e+00 : f32
    %111 = vector.broadcast %cst_26 : f32 to vector<2x256xf32>
    %112 = arith.addf %111, %110 : vector<2x256xf32>
    %113 = arith.divf %111, %112 : vector<2x256xf32>
    %114 = vector.extract_strided_slice %103 {offsets = [0, 256], sizes = [2, 256], strides = [1, 1]} : vector<2x768xf32> to vector<2x256xf32>
    %115 = vector.extract_strided_slice %105 {offsets = [0, 256], sizes = [2, 256], strides = [1, 1]} : vector<2x768xf32> to vector<2x256xf32>
    %116 = arith.addf %114, %115 : vector<2x256xf32>
    %117 = arith.negf %116 : vector<2x256xf32>
    %118 = math.exp %117 : vector<2x256xf32>
    %cst_27 = arith.constant 1.000000e+00 : f32
    %119 = vector.broadcast %cst_27 : f32 to vector<2x256xf32>
    %120 = arith.addf %119, %118 : vector<2x256xf32>
    %121 = arith.divf %119, %120 : vector<2x256xf32>
    %122 = vector.extract_strided_slice %103 {offsets = [0, 512], sizes = [2, 256], strides = [1, 1]} : vector<2x768xf32> to vector<2x256xf32>
    %123 = vector.extract_strided_slice %105 {offsets = [0, 512], sizes = [2, 256], strides = [1, 1]} : vector<2x768xf32> to vector<2x256xf32>
    %124 = arith.addf %123, %17 : vector<2x256xf32>
    %125 = arith.mulf %113, %124 : vector<2x256xf32>
    %126 = arith.addf %122, %125 : vector<2x256xf32>
    %127 = math.tanh %126 : vector<2x256xf32>
    %128 = arith.subf %102, %127 : vector<2x256xf32>
    %129 = arith.mulf %121, %128 : vector<2x256xf32>
    %130 = arith.addf %127, %129 : vector<2x256xf32>
    %131 = vector.extract_strided_slice %13 {offsets = [0, 3072], sizes = [2, 768], strides = [1, 1]} : vector<2x6144xf32> to vector<2x768xf32>
    %132 = arith.truncf %130 : vector<2x256xf32> to vector<2x256xbf16>
    %cst_28 = arith.constant dense<0.000000e+00> : vector<2x768xf32>
    %133 = tpu.matmul %132, %14, %cst_28 {dimension_numbers = #tpu.dot_dimension_numbers<[1], [0], [0], [1], [0, 0, 1, 1], [], []>} : vector<2x256xbf16>, vector<256x768xbf16>, vector<2x768xf32> -> vector<2x768xf32>
    %134 = vector.extract_strided_slice %131 {offsets = [0, 0], sizes = [2, 256], strides = [1, 1]} : vector<2x768xf32> to vector<2x256xf32>
    %135 = vector.extract_strided_slice %133 {offsets = [0, 0], sizes = [2, 256], strides = [1, 1]} : vector<2x768xf32> to vector<2x256xf32>
    %136 = arith.addf %134, %135 : vector<2x256xf32>
    %137 = arith.negf %136 : vector<2x256xf32>
    %138 = math.exp %137 : vector<2x256xf32>
    %cst_29 = arith.constant 1.000000e+00 : f32
    %139 = vector.broadcast %cst_29 : f32 to vector<2x256xf32>
    %140 = arith.addf %139, %138 : vector<2x256xf32>
    %141 = arith.divf %139, %140 : vector<2x256xf32>
    %142 = vector.extract_strided_slice %131 {offsets = [0, 256], sizes = [2, 256], strides = [1, 1]} : vector<2x768xf32> to vector<2x256xf32>
    %143 = vector.extract_strided_slice %133 {offsets = [0, 256], sizes = [2, 256], strides = [1, 1]} : vector<2x768xf32> to vector<2x256xf32>
    %144 = arith.addf %142, %143 : vector<2x256xf32>
    %145 = arith.negf %144 : vector<2x256xf32>
    %146 = math.exp %145 : vector<2x256xf32>
    %cst_30 = arith.constant 1.000000e+00 : f32
    %147 = vector.broadcast %cst_30 : f32 to vector<2x256xf32>
    %148 = arith.addf %147, %146 : vector<2x256xf32>
    %149 = arith.divf %147, %148 : vector<2x256xf32>
    %150 = vector.extract_strided_slice %131 {offsets = [0, 512], sizes = [2, 256], strides = [1, 1]} : vector<2x768xf32> to vector<2x256xf32>
    %151 = vector.extract_strided_slice %133 {offsets = [0, 512], sizes = [2, 256], strides = [1, 1]} : vector<2x768xf32> to vector<2x256xf32>
    %152 = arith.addf %151, %17 : vector<2x256xf32>
    %153 = arith.mulf %141, %152 : vector<2x256xf32>
    %154 = arith.addf %150, %153 : vector<2x256xf32>
    %155 = math.tanh %154 : vector<2x256xf32>
    %156 = arith.subf %130, %155 : vector<2x256xf32>
    %157 = arith.mulf %149, %156 : vector<2x256xf32>
    %158 = arith.addf %155, %157 : vector<2x256xf32>
    %159 = vector.extract_strided_slice %13 {offsets = [0, 3840], sizes = [2, 768], strides = [1, 1]} : vector<2x6144xf32> to vector<2x768xf32>
    %160 = arith.truncf %158 : vector<2x256xf32> to vector<2x256xbf16>
    %cst_31 = arith.constant dense<0.000000e+00> : vector<2x768xf32>
    %161 = tpu.matmul %160, %14, %cst_31 {dimension_numbers = #tpu.dot_dimension_numbers<[1], [0], [0], [1], [0, 0, 1, 1], [], []>} : vector<2x256xbf16>, vector<256x768xbf16>, vector<2x768xf32> -> vector<2x768xf32>
    %162 = vector.extract_strided_slice %159 {offsets = [0, 0], sizes = [2, 256], strides = [1, 1]} : vector<2x768xf32> to vector<2x256xf32>
    %163 = vector.extract_strided_slice %161 {offsets = [0, 0], sizes = [2, 256], strides = [1, 1]} : vector<2x768xf32> to vector<2x256xf32>
    %164 = arith.addf %162, %163 : vector<2x256xf32>
    %165 = arith.negf %164 : vector<2x256xf32>
    %166 = math.exp %165 : vector<2x256xf32>
    %cst_32 = arith.constant 1.000000e+00 : f32
    %167 = vector.broadcast %cst_32 : f32 to vector<2x256xf32>
    %168 = arith.addf %167, %166 : vector<2x256xf32>
    %169 = arith.divf %167, %168 : vector<2x256xf32>
    %170 = vector.extract_strided_slice %159 {offsets = [0, 256], sizes = [2, 256], strides = [1, 1]} : vector<2x768xf32> to vector<2x256xf32>
    %171 = vector.extract_strided_slice %161 {offsets = [0, 256], sizes = [2, 256], strides = [1, 1]} : vector<2x768xf32> to vector<2x256xf32>
    %172 = arith.addf %170, %171 : vector<2x256xf32>
    %173 = arith.negf %172 : vector<2x256xf32>
    %174 = math.exp %173 : vector<2x256xf32>
    %cst_33 = arith.constant 1.000000e+00 : f32
    %175 = vector.broadcast %cst_33 : f32 to vector<2x256xf32>
    %176 = arith.addf %175, %174 : vector<2x256xf32>
    %177 = arith.divf %175, %176 : vector<2x256xf32>
    %178 = vector.extract_strided_slice %159 {offsets = [0, 512], sizes = [2, 256], strides = [1, 1]} : vector<2x768xf32> to vector<2x256xf32>
    %179 = vector.extract_strided_slice %161 {offsets = [0, 512], sizes = [2, 256], strides = [1, 1]} : vector<2x768xf32> to vector<2x256xf32>
    %180 = arith.addf %179, %17 : vector<2x256xf32>
    %181 = arith.mulf %169, %180 : vector<2x256xf32>
    %182 = arith.addf %178, %181 : vector<2x256xf32>
    %183 = math.tanh %182 : vector<2x256xf32>
    %184 = arith.subf %158, %183 : vector<2x256xf32>
    %185 = arith.mulf %177, %184 : vector<2x256xf32>
    %186 = arith.addf %183, %185 : vector<2x256xf32>
    %187 = vector.extract_strided_slice %13 {offsets = [0, 4608], sizes = [2, 768], strides = [1, 1]} : vector<2x6144xf32> to vector<2x768xf32>
    %188 = arith.truncf %186 : vector<2x256xf32> to vector<2x256xbf16>
    %cst_34 = arith.constant dense<0.000000e+00> : vector<2x768xf32>
    %189 = tpu.matmul %188, %14, %cst_34 {dimension_numbers = #tpu.dot_dimension_numbers<[1], [0], [0], [1], [0, 0, 1, 1], [], []>} : vector<2x256xbf16>, vector<256x768xbf16>, vector<2x768xf32> -> vector<2x768xf32>
    %190 = vector.extract_strided_slice %187 {offsets = [0, 0], sizes = [2, 256], strides = [1, 1]} : vector<2x768xf32> to vector<2x256xf32>
    %191 = vector.extract_strided_slice %189 {offsets = [0, 0], sizes = [2, 256], strides = [1, 1]} : vector<2x768xf32> to vector<2x256xf32>
    %192 = arith.addf %190, %191 : vector<2x256xf32>
    %193 = arith.negf %192 : vector<2x256xf32>
    %194 = math.exp %193 : vector<2x256xf32>
    %cst_35 = arith.constant 1.000000e+00 : f32
    %195 = vector.broadcast %cst_35 : f32 to vector<2x256xf32>
    %196 = arith.addf %195, %194 : vector<2x256xf32>
    %197 = arith.divf %195, %196 : vector<2x256xf32>
    %198 = vector.extract_strided_slice %187 {offsets = [0, 256], sizes = [2, 256], strides = [1, 1]} : vector<2x768xf32> to vector<2x256xf32>
    %199 = vector.extract_strided_slice %189 {offsets = [0, 256], sizes = [2, 256], strides = [1, 1]} : vector<2x768xf32> to vector<2x256xf32>
    %200 = arith.addf %198, %199 : vector<2x256xf32>
    %201 = arith.negf %200 : vector<2x256xf32>
    %202 = math.exp %201 : vector<2x256xf32>
    %cst_36 = arith.constant 1.000000e+00 : f32
    %203 = vector.broadcast %cst_36 : f32 to vector<2x256xf32>
    %204 = arith.addf %203, %202 : vector<2x256xf32>
    %205 = arith.divf %203, %204 : vector<2x256xf32>
    %206 = vector.extract_strided_slice %187 {offsets = [0, 512], sizes = [2, 256], strides = [1, 1]} : vector<2x768xf32> to vector<2x256xf32>
    %207 = vector.extract_strided_slice %189 {offsets = [0, 512], sizes = [2, 256], strides = [1, 1]} : vector<2x768xf32> to vector<2x256xf32>
    %208 = arith.addf %207, %17 : vector<2x256xf32>
    %209 = arith.mulf %197, %208 : vector<2x256xf32>
    %210 = arith.addf %206, %209 : vector<2x256xf32>
    %211 = math.tanh %210 : vector<2x256xf32>
    %212 = arith.subf %186, %211 : vector<2x256xf32>
    %213 = arith.mulf %205, %212 : vector<2x256xf32>
    %214 = arith.addf %211, %213 : vector<2x256xf32>
    %215 = vector.extract_strided_slice %13 {offsets = [0, 5376], sizes = [2, 768], strides = [1, 1]} : vector<2x6144xf32> to vector<2x768xf32>
    %216 = arith.truncf %214 : vector<2x256xf32> to vector<2x256xbf16>
    %cst_37 = arith.constant dense<0.000000e+00> : vector<2x768xf32>
    %217 = tpu.matmul %216, %14, %cst_37 {dimension_numbers = #tpu.dot_dimension_numbers<[1], [0], [0], [1], [0, 0, 1, 1], [], []>} : vector<2x256xbf16>, vector<256x768xbf16>, vector<2x768xf32> -> vector<2x768xf32>
    %218 = vector.extract_strided_slice %215 {offsets = [0, 0], sizes = [2, 256], strides = [1, 1]} : vector<2x768xf32> to vector<2x256xf32>
    %219 = vector.extract_strided_slice %217 {offsets = [0, 0], sizes = [2, 256], strides = [1, 1]} : vector<2x768xf32> to vector<2x256xf32>
    %220 = arith.addf %218, %219 : vector<2x256xf32>
    %221 = arith.negf %220 : vector<2x256xf32>
    %222 = math.exp %221 : vector<2x256xf32>
    %cst_38 = arith.constant 1.000000e+00 : f32
    %223 = vector.broadcast %cst_38 : f32 to vector<2x256xf32>
    %224 = arith.addf %223, %222 : vector<2x256xf32>
    %225 = arith.divf %223, %224 : vector<2x256xf32>
    %226 = vector.extract_strided_slice %215 {offsets = [0, 256], sizes = [2, 256], strides = [1, 1]} : vector<2x768xf32> to vector<2x256xf32>
    %227 = vector.extract_strided_slice %217 {offsets = [0, 256], sizes = [2, 256], strides = [1, 1]} : vector<2x768xf32> to vector<2x256xf32>
    %228 = arith.addf %226, %227 : vector<2x256xf32>
    %229 = arith.negf %228 : vector<2x256xf32>
    %230 = math.exp %229 : vector<2x256xf32>
    %cst_39 = arith.constant 1.000000e+00 : f32
    %231 = vector.broadcast %cst_39 : f32 to vector<2x256xf32>
    %232 = arith.addf %231, %230 : vector<2x256xf32>
    %233 = arith.divf %231, %232 : vector<2x256xf32>
    %234 = vector.extract_strided_slice %215 {offsets = [0, 512], sizes = [2, 256], strides = [1, 1]} : vector<2x768xf32> to vector<2x256xf32>
    %235 = vector.extract_strided_slice %217 {offsets = [0, 512], sizes = [2, 256], strides = [1, 1]} : vector<2x768xf32> to vector<2x256xf32>
    %236 = arith.addf %235, %17 : vector<2x256xf32>
    %237 = arith.mulf %225, %236 : vector<2x256xf32>
    %238 = arith.addf %234, %237 : vector<2x256xf32>
    %239 = math.tanh %238 : vector<2x256xf32>
    %240 = arith.subf %214, %239 : vector<2x256xf32>
    %241 = arith.mulf %233, %240 : vector<2x256xf32>
    %242 = arith.addf %239, %241 : vector<2x256xf32>
    %243 = arith.truncf %242 : vector<2x256xf32> to vector<2x256xbf16>
    %c0_40 = arith.constant 0 : index
    %c0_41 = arith.constant 0 : index
    %244 = vector.load %arg7[%c0_40, %c0_41] : memref<256x256xbf16, #tpu.memory_space<vmem>>, vector<256x256xbf16>
    %cst_42 = arith.constant dense<0.000000e+00> : vector<2x256xf32>
    %245 = tpu.matmul %243, %244, %cst_42 {dimension_numbers = #tpu.dot_dimension_numbers<[1], [0], [0], [1], [0, 0, 1, 1], [], []>} : vector<2x256xbf16>, vector<256x256xbf16>, vector<2x256xf32> -> vector<2x256xf32>
    %c0_43 = arith.constant 0 : index
    %c0_44 = arith.constant 0 : index
    %246 = vector.load %arg8[%c0_43, %c0_44] : memref<1x256xf32, #tpu.memory_space<vmem>>, vector<1x256xf32>
    %247 = vector.broadcast %246 : vector<1x256xf32> to vector<2x256xf32>
    %248 = arith.addf %245, %247 : vector<2x256xf32>
    %cst_45 = arith.constant 0.000000e+00 : f32
    %249 = vector.broadcast %cst_45 : f32 to vector<2x256xf32>
    %250 = arith.maximumf %248, %249 : vector<2x256xf32>
    %c0_46 = arith.constant 0 : index
    %c0_47 = arith.constant 0 : index
    %251 = vector.load %arg9[%c0_46, %c0_47] : memref<1x256xf32, #tpu.memory_space<vmem>>, vector<1x256xf32>
    %252 = vector.broadcast %251 : vector<1x256xf32> to vector<2x256xf32>
    %253 = arith.mulf %250, %252 : vector<2x256xf32>
    %cst_48 = arith.constant dense<0.000000e+00> : vector<2xf32>
    %254 = vector.multi_reduction <add>, %253, %cst_48 [1] : vector<2x256xf32> to vector<2xf32>
    %255 = vector.shape_cast %254 : vector<2xf32> to vector<2x1xf32>
    %c0_49 = arith.constant 0 : index
    %c0_50 = arith.constant 0 : index
    %256 = vector.load %arg10[%c0_49, %c0_50] : memref<1x1xf32, #tpu.memory_space<vmem>>, vector<1x1xf32>
    %257 = vector.broadcast %256 : vector<1x1xf32> to vector<2x1xf32>
    %258 = arith.addf %255, %257 : vector<2x1xf32>
    %cst_51 = arith.constant 0.000000e+00 : f32
    %259 = vector.broadcast %cst_51 : f32 to vector<2x1xf32>
    %260 = arith.maximumf %258, %259 : vector<2x1xf32>
    %c0_52 = arith.constant 0 : index
    %c0_53 = arith.constant 0 : index
    %261 = vector.load %arg11[%c0_52, %c0_53] : memref<2x1xf32, #tpu.memory_space<vmem>>, vector<2x1xf32>
    tpu.vector_store %arg11[%c0_52, %c0_53], %260 {strides = array<i32>} : memref<2x1xf32, #tpu.memory_space<vmem>>, vector<2x1xf32>,
    return
  }
}

</mosaic_0001>

<bundles_post_ra>
// kernel: tpu_custom_call.1
= control target key start
LH: loop header
LB: loop body
LE: loop exit
PB: predicated region body
PF: predicated region fallthrough
CT: control target
= control target key end

     0   :  { %s6943_s0 = inlined_call_operand.vmem [shape: f32[2,320], index: 0, kind: input, shape index: {}]   ;;  %s6944_s1 = inlined_call_operand.vmem [shape: f32[320,8], index: 1, kind: input, shape index: {}]   ;;  %s6945_s2 = inlined_call_operand.vmem [shape: f32[1,8], index: 2, kind: input, shape index: {}]   ;;  %s6946_s3 = inlined_call_operand.hbm [shape: bf16[8,6144], index: 3, kind: input, shape index: {}]   ;;  %s6947_s4 = inlined_call_operand.vmem [shape: f32[1,6144], index: 4, kind: input, shape index: {}]   ;;  %s6948_s5 = inlined_call_operand.hbm [shape: bf16[256,768], index: 5, kind: input, shape index: {}]   ;;  %s6949_s6 = inlined_call_operand.vmem [shape: f32[1,256], index: 6, kind: input, shape index: {}]   ;;  %s6950_s7 = inlined_call_operand.vmem [shape: bf16[256,256], index: 7, kind: input, shape index: {}]   ;;  %s6951_s8 = inlined_call_operand.vmem [shape: f32[1,256], index: 8, kind: input, shape index: {}]   ;;  %s6952_s9 = inlined_call_operand.vmem [shape: f32[1,256], index: 9, kind: input, shape index: {}]   ;;  %s6953_s10 = inlined_call_operand.<no memory space> [shape: f32[1,1], index: 10, kind: input, shape index: {}]   ;;  %s6954_s11 = inlined_call_operand.vmem [shape: f32[2,1], index: 11, kind: output, shape index: {}]  }
   0x1   :  { %v16_v0 = vstv %s6953_s10 }
   0x2   :  { %17 = vst [vmem:[#allocation2] sm:$0x1] %v16_v0 }
   0x3   :  { %18 = vsyncpa [#allocation4], 0  ;;  %s31_s21 = sshll.u32 %s6946_s3, 4  ;;  %s32_s21 = int_to_ptr.hbm [resolvable:$true] %s31_s21 }
   0x4   :  { %19 = vsyncpa [#allocation6], 0  ;;  %s5031_s22 = smov [#allocation3]   ;;  %s43_s26 = sshll.u32 %s6948_s5, 4  ;;  %s44_s26 = int_to_ptr.hbm [resolvable:$true] %s43_s26 }
   0x5   :  { %s33_s23 = sshll.u32 %s5031_s22, 4  ;;  %s5032_s27 = smov [#allocation5]   ;;  %s34_s23 = int_to_ptr.vmem [resolvable:$true] %s33_s23 }
   0x6   :  { %36 = dma.hbm_to_vmem [thread:$0]  %s32_s21, 3072, %s34_s23, [#allocation4]  }
   0x7   :  { %s45_s28 = sshll.u32 %s5032_s27, 4  ;;  %s5033_s10 = smov 384   ;;  %s46_s28 = int_to_ptr.vmem [resolvable:$true] %s45_s28 }
   0x8   :  { %s5034_s29 = smov 24  }
   0x9   :  { %51 = dma.hbm_to_vmem [thread:$0]  %s44_s26, 12288, %s46_s28, [#allocation6], %s5033_s10, %s5033_s10, %s5034_s29  }
   0xa   :  { %5027 = dma.done.wait [#allocation4], 3072  }
   0xb   :  { %5028 = vsyncadd [#allocation4], 4294964224 }
   0xc   :  { %5029 = dma.done.wait [#allocation6], 12288  }
   0xd   :  { %5030 = vsyncadd [#allocation6], 4294955008  ;;  %v87_v1 = vld [vmem:[%s6944_s1 + $0x78] sm:$0xff]  ;;  %v86_v2 = vld [vmem:[%s6944_s1 + $0x70] sm:$0xff]  ;;  %vm123_vm0 = vcmask 523264   ;;  %vm444_vm1 = vcmask 1043456  }
   0xe   :  { %v103_v3 = vld [vmem:[%s6944_s1 + $0xf8] sm:$0xff]  ;;  %126 = vmatpush.msra.mxu0 %v87_v1  ;;  %v102_v4 = vld [vmem:[%s6944_s1 + $0xf0] sm:$0xff]  ;;  %v85_v5 = vld [vmem:[%s6944_s1 + $0x68] sm:$0xff]  ;;  %vm440_vm2 = vcmask 64512  }
   0xf   :  { %146 = vmatpush.msra.mxu1 %v103_v3  ;;  %v101_v6 = vld [vmem:[%s6944_s1 + $0xe8] sm:$0xff]  ;;  %v84_v7 = vld [vmem:[%s6944_s1 + $0x60] sm:$0xff]  ;;  %v111_v9 = vld [vmem:[%s6944_s1 + $0x138] sm:$0xff] }
  0x10   :  { %127 = vmatpush.msra.mxu0 %v86_v2  ;;  %v100_v8 = vld [vmem:[%s6944_s1 + $0xe0] sm:$0xff]  ;;  %v83_v10 = vld [vmem:[%s6944_s1 + $0x58] sm:$0xff]  ;;  %174 = vmatpush.msra.mxu2 %v111_v9  ;;  %v110_v12 = vld [vmem:[%s6944_s1 + $0x130] sm:$0xff] }
  0x11   :  { %147 = vmatpush.msra.mxu1 %v102_v4  ;;  %v99_v11 = vld [vmem:[%s6944_s1 + $0xd8] sm:$0xff]  ;;  %v109_v13 = vld [vmem:[%s6944_s1 + $0x128] sm:$0xff]  ;;  %v82_v14 = vld [vmem:[%s6944_s1 + $0x50] sm:$0xff] }
  0x12   :  { %128 = vmatpush.msra.mxu0 %v85_v5  ;;  %v98_v15 = vld [vmem:[%s6944_s1 + $0xd0] sm:$0xff]  ;;  %175 = vmatpush.msra.mxu2 %v110_v12  ;;  %v108_v16 = vld [vmem:[%s6944_s1 + $0x120] sm:$0xff]  ;;  %v81_v17 = vld [vmem:[%s6944_s1 + $0x48] sm:$0xff] }
  0x13   :  { %148 = vmatpush.msra.mxu1 %v101_v6  ;;  %v97_v18 = vld [vmem:[%s6944_s1 + $0xc8] sm:$0xff]  ;;  %v107_v19 = vld [vmem:[%s6944_s1 + $0x118] sm:$0xff]  ;;  %v80_v20 = vld [vmem:[%s6944_s1 + $0x40] sm:$0xff] }
  0x14   :  { %129 = vmatpush.msra.mxu0 %v84_v7  ;;  %176 = vmatpush.msra.mxu2 %v109_v13  ;;  %v96_v21 = vld [vmem:[%s6944_s1 + $0xc0] sm:$0xff]  ;;  %v106_v23 = vld [vmem:[%s6944_s1 + $0x110] sm:$0xff]  ;;  %v79_v24 = vld [vmem:[%s6944_s1 + $0x38] sm:$0xff] }
  0x15   :  { %149 = vmatpush.msra.mxu1 %v100_v8  ;;  %v71_v22 = vld [vmem:[%s6943_s0] sm:$0x3f]  ;;  %v95_v25 = vld [vmem:[%s6944_s1 + $0xb8] sm:$0xff]  ;;  %v105_v26 = vld [vmem:[%s6944_s1 + $0x108] sm:$0xff] }
  0x16   :  { %130 = vmatpush.msra.mxu0 %v83_v10  ;;  %177 = vmatpush.msra.mxu2 %v108_v16  ;;  %117 = vst [vmem:[#allocation1] ss:$4 sm:$0xff] %v71_v22  ;;  %v78_v27 = vld [vmem:[%s6944_s1 + $0x30] sm:$0xff]  ;;  %v104_v29 = vld [vmem:[%s6944_s1 + $0x100] sm:$0xff]  ;;  %v77_v30 = vld [vmem:[%s6944_s1 + $0x28] sm:$0xff] }
  0x17   :  { %150 = vmatpush.msra.mxu1 %v99_v11  ;;  %v94_v28 = vld [vmem:[%s6944_s1 + $0xb0] sm:$0xff]  ;;  %v93_v31 = vld [vmem:[%s6944_s1 + $0xa8] sm:$0xff]  ;;  %v76_v32 = vld [vmem:[%s6944_s1 + $0x20] sm:$0xff] }
  0x18   :  { %131 = vmatpush.msra.mxu0 %v82_v14  ;;  %178 = vmatpush.msra.mxu2 %v107_v19  ;;  %v92_v33 = vld [vmem:[%s6944_s1 + $0xa0] sm:$0xff]  ;;  %v75_v35 = vld [vmem:[%s6944_s1 + $0x18] sm:$0xff]  ;;  %v74_v37 = vld [vmem:[%s6944_s1 + $0x10] sm:$0xff] }
  0x19   :  { %151 = vmatpush.msra.mxu1 %v98_v15  ;;  %v91_v36 = vld [vmem:[%s6944_s1 + $0x98] sm:$0xff]  ;;  %v90_v38 = vld [vmem:[%s6944_s1 + $0x90] sm:$0xff]  ;;  %v73_v39 = vld [vmem:[%s6944_s1 + $0x8] sm:$0xff] }
  0x1a   :  { %132 = vmatpush.msra.mxu0 %v81_v17  ;;  %179 = vmatpush.msra.mxu2 %v106_v23  ;;  %v89_v40 = vld [vmem:[%s6944_s1 + $0x88] sm:$0xff]  ;;  %v72_v41 = vld [vmem:[%s6944_s1] sm:$0xff]  ;;  %v189_v46 = vld [vmem:[#allocation3 + $0x8] sm:$0xff] }
  0x1b   :  { %152 = vmatpush.msra.mxu1 %v97_v18  ;;  %v88_v42 = vld [vmem:[%s6944_s1 + $0x80] sm:$0xff]  ;;  %v188_v45 = vld [vmem:[#allocation3] sm:$0xff]  ;;  %v346_v49 = vunpack.c.l.b16 %v189_v46  ;;  %v193_v11 = vld [vmem:[#allocation3 + $0x28] sm:$0xff]  ;;  %v347_v17 = vunpack.c.h.b16 %v189_v46 }
  0x1c   :  { %133 = vmatpush.msra.mxu0 %v80_v20  ;;  %180 = vmatpush.msra.mxu2 %v105_v26  ;;  %v190_v47 = vld [vmem:[#allocation3 + $0x10] sm:$0xff]  ;;  %v344_v48 = vunpack.c.l.b16 %v188_v45  ;;  %v345_v60 = vunpack.c.h.b16 %v188_v45  ;;  %v191_v61 = vld [vmem:[#allocation3 + $0x18] sm:$0xff]  ;;  %v192_v62 = vld [vmem:[#allocation3 + $0x20] sm:$0xff]  ;;  %v354_v18 = vunpack.c.l.b16 %v193_v11 }
  0x1d   :  { %153 = vmatpush.msra.mxu1 %v96_v21  ;;  %v120_v34 = vld.sshfl [vmem:[#allocation1 + $0x10] sm:$0xff pattern:$0x73625140]  ;;  %v118_v43 = vld.sshfl [vmem:[#allocation1] sm:$0xff pattern:$0x73625140]  ;;  %v348_v50 = vunpack.c.l.b16 %v190_v47  ;;  %v349_v51 = vunpack.c.h.b16 %v190_v47  ;;  %v394_v53 = vpack.c.b16 %v346_v49, %v346_v49  ;;  %v350_v63 = vunpack.c.l.b16 %v191_v61 }
  0x1e   :  { %134 = vmatpush.msra.mxu0 %v79_v24  ;;  %181 = vmatpush.msra.mxu2 %v104_v29  ;;  %v119_v44 = vld.sshfl [vmem:[#allocation1 + $0x8] sm:$0xff pattern:$0x73625140]  ;;  %v392_v52 = vpack.c.b16 %v344_v48, %v344_v48  ;;  %v352_v0 = vunpack.c.l.b16 %v192_v62  ;;  %v353_v1 = vunpack.c.h.b16 %v192_v62  ;;  %v393_v2 = vpack.c.b16 %v345_v60, %v345_v60  ;;  %v4817_v10 = vld [vmem:[%s6945_s2] ss:$0 sm:$0xff]  ;;  %v197_v47 = vld [vmem:[#allocation3 + $0x48] sm:$0xff] }
  0x1f   :  { %154 = vmatpush.msra.mxu1 %v95_v25  ;;  %4091 = vmatmul.msk.f32.vlgmr.msra.gmra.mxu2 %vm123_vm0, %v120_v34  ;;  %v396_v54 = vpack.c.b16 %v348_v50, %v348_v50  ;;  %v397_v55 = vpack.c.b16 %v349_v51, %v349_v51  ;;  %v452_v57 = vsel %vm444_vm1, %v394_v53, 0  ;;  %v398_v3 = vpack.c.b16 %v350_v63, %v350_v63  ;;  %v194_v14 = vld [vmem:[#allocation3 + $0x30] sm:$0xff]  ;;  %v196_v34 = vld [vmem:[#allocation3 + $0x40] sm:$0xff] }
  0x20   :  { %135 = vmatpush.msra.mxu0 %v78_v27  ;;  %v446_v56 = vsel %vm444_vm1, %v392_v52, 0  ;;  %622 = vmatpush.bf16.msrb.mxu2 %v452_v57  ;;  %v400_v4 = vpack.c.b16 %v352_v0, %v352_v0  ;;  %v401_v5 = vpack.c.b16 %v353_v1, %v353_v1  ;;  %v449_v6 = vsel %vm444_vm1, %v393_v2, 0  ;;  %v198_v48 = vld [vmem:[#allocation3 + $0x50] sm:$0xff]  ;;  %v200_v62 = vld [vmem:[#allocation3 + $0x60] sm:$0xff] }
  0x21   :  { %155 = vmatpush.msra.mxu1 %v94_v28  ;;  %v458_v58 = vsel %vm444_vm1, %v396_v54, 0  ;;  %v461_v59 = vsel %vm444_vm1, %v397_v55, 0  ;;  %596 = vmatpush.bf16.msra.mxu3 %v446_v56  ;;  %v464_v7 = vsel %vm444_vm1, %v398_v3, 0  ;;  %v356_v20 = vunpack.c.l.b16 %v194_v14 }
  0x22   :  { %136 = vmatpush.msra.mxu0 %v77_v30  ;;  %v470_v8 = vsel %vm444_vm1, %v400_v4, 0  ;;  %v473_v9 = vsel %vm444_vm1, %v401_v5, 0  ;;  %v357_v21 = vunpack.c.h.b16 %v194_v14  ;;  %v395_v23 = vpack.c.b16 %v347_v17, %v347_v17 }
  0x23   :  { %156 = vmatpush.msra.mxu1 %v93_v31  ;;  %v402_v24 = vpack.c.b16 %v354_v18, %v354_v18  ;;  %v404_v26 = vpack.c.b16 %v356_v20, %v356_v20  ;;  %v355_v49 = vunpack.c.h.b16 %v193_v11  ;;  %v362_v50 = vunpack.c.l.b16 %v197_v47  ;;  %v201_v11 = vld [vmem:[#allocation3 + $0x68] sm:$0xff] }
  0x24   :  { %137 = vmatpush.msra.mxu0 %v76_v32  ;;  %674 = vmatpush.bf16.msra.mxu2 %v464_v7  ;;  %v405_v27 = vpack.c.b16 %v357_v21, %v357_v21  ;;  %v455_v29 = vsel %vm444_vm1, %v395_v23, 0  ;;  %v364_v51 = vunpack.c.l.b16 %v198_v48  ;;  %v365_v52 = vunpack.c.h.b16 %v198_v48 }
  0x25   :  { %157 = vmatpush.msra.mxu1 %v92_v33  ;;  %609 = vmatpush.bf16.msrb.mxu3 %v449_v6  ;;  %v476_v30 = vsel %vm444_vm1, %v402_v24, 0  ;;  %v482_v31 = vsel %vm444_vm1, %v404_v26, 0  ;;  %v195_v33 = vld [vmem:[#allocation3 + $0x38] sm:$0xff]  ;;  %v403_v53 = vpack.c.b16 %v355_v49, %v355_v49  ;;  %v410_v54 = vpack.c.b16 %v362_v50, %v362_v50  ;;  %v204_v26 = vld [vmem:[#allocation3 + $0x80] sm:$0xff] }
  0x26   :  { %138 = vmatpush.msra.mxu0 %v75_v35  ;;  %v485_v32 = vsel %vm444_vm1, %v405_v27, 0  ;;  %v351_v35 = vunpack.c.h.b16 %v191_v61  ;;  %v412_v55 = vpack.c.b16 %v364_v51, %v364_v51  ;;  %v413_v56 = vpack.c.b16 %v365_v52, %v365_v52  ;;  %v199_v61 = vld [vmem:[#allocation3 + $0x58] sm:$0xff] }
  0x27   :  { %158 = vmatpush.msra.mxu1 %v91_v36  ;;  %v358_v36 = vunpack.c.l.b16 %v195_v33  ;;  %v479_v57 = vsel %vm444_vm1, %v403_v53, 0  ;;  %v359_v63 = vunpack.c.h.b16 %v195_v33  ;;  %v366_v0 = vunpack.c.l.b16 %v199_v61 }
  0x28   :  { %139 = vmatpush.msra.mxu0 %v74_v37  ;;  %v360_v37 = vunpack.c.l.b16 %v196_v34  ;;  %v509_v60 = vsel %vm444_vm1, %v413_v56, 0  ;;  %v368_v1 = vunpack.c.l.b16 %v200_v62  ;;  %v369_v2 = vunpack.c.h.b16 %v200_v62 }
  0x29   :  { %159 = vmatpush.msra.mxu1 %v90_v38  ;;  %v361_v38 = vunpack.c.h.b16 %v196_v34  ;;  %v407_v3 = vpack.c.b16 %v359_v63, %v359_v63  ;;  %v414_v4 = vpack.c.b16 %v366_v0, %v366_v0  ;;  %v370_v14 = vunpack.c.l.b16 %v201_v11 }
  0x2a   :  { %140 = vmatpush.msra.mxu0 %v73_v39  ;;  %v399_v39 = vpack.c.b16 %v351_v35, %v351_v35  ;;  %v416_v5 = vpack.c.b16 %v368_v1, %v368_v1  ;;  %v417_v6 = vpack.c.b16 %v369_v2, %v369_v2  ;;  %v367_v27 = vunpack.c.h.b16 %v199_v61 }
  0x2b   :  { %160 = vmatpush.msra.mxu1 %v89_v40  ;;  %v406_v40 = vpack.c.b16 %v358_v36, %v358_v36  ;;  %v491_v7 = vsel %vm444_vm1, %v407_v3, 0  ;;  %v418_v18 = vpack.c.b16 %v370_v14, %v370_v14 }
  0x2c   :  { %141 = vmatpush.msra.mxu0 %v72_v41  ;;  %v408_v41 = vpack.c.b16 %v360_v37, %v360_v37 }
  0x2d   :  { %161 = vmatpush.msra.mxu1 %v88_v42  ;;  %142 = vmatmul.f32.vlgmr.msra.gmra.mxu0 %v118_v43  ;;  %v409_v42 = vpack.c.b16 %v361_v38, %v361_v38  ;;  %v467_v43 = vsel %vm444_vm1, %v399_v39, 0 }
  0x2e   :  { %162 = vmatmul.f32.vlgmr.msra.gmra.mxu1 %v119_v44  ;;  %648 = vmatpush.bf16.msrb.mxu0 %v458_v58  ;;  %v488_v44 = vsel %vm444_vm1, %v406_v40, 0  ;;  %v494_v45 = vsel %vm444_vm1, %v408_v41, 0  ;;  %v500_v58 = vsel %vm444_vm1, %v410_v54, 0  ;;  %v205_v40 = vld [vmem:[#allocation3 + $0x88] sm:$0xff]  ;;  %v206_v41 = vld [vmem:[#allocation3 + $0x90] sm:$0xff]  ;;  %v208_v54 = vld [vmem:[#allocation3 + $0xa0] sm:$0xff] }
  0x2f   :  { %661 = vmatpush.bf16.msrb.mxu1 %v461_v59  ;;  %v497_v46 = vsel %vm444_vm1, %v409_v42, 0  ;;  %v506_v59 = vsel %vm444_vm1, %v412_v55, 0  ;;  %v371_v42 = vunpack.c.h.b16 %v201_v11  ;;  %v384_v55 = vunpack.c.l.b16 %v208_v54 }
  0x30   :  { %v385_v56 = vunpack.c.h.b16 %v208_v54 }
  0x32   :  { %700 = vmatpush.bf16.msra.mxu0 %v470_v8  ;;  %v512_v8 = vsel %vm444_vm1, %v414_v4, 0  ;;  %v433_v61 = vpack.c.b16 %v385_v56, %v385_v56  ;;  %v210_v4 = vld [vmem:[#allocation3 + $0xb0] sm:$0xff] }
  0x33   :  { %713 = vmatpush.bf16.msra.mxu1 %v473_v9  ;;  %v518_v9 = vsel %vm444_vm1, %v416_v5, 0  ;;  %v388_v5 = vunpack.c.l.b16 %v210_v4 }
  0x34   :  { %v569_v1 = vsel %vm444_vm1, %v433_v61, 0  ;;  %v4759_v61 = vld [vmem:[#allocation5 + $0x254] sm:$0xf0] }
  0xa2   :  { %v183_v16 = vpop.f32.mrf.mxu2 }
  0xaa   :  { %v143_v12 = vpop.f32.mrf.mxu0 }
  0xab   :  { %v163_v13 = vpop.f32.mrf.mxu1  ;;  %v144_v15 = vadd.f32 %v4817_v10, %v143_v12  ;;  %v521_v10 = vsel %vm444_vm1, %v417_v6, 0  ;;  %v202_v12 = vld [vmem:[#allocation3 + $0x70] sm:$0xff]  ;;  %v389_v6 = vunpack.c.h.b16 %v210_v4  ;;  %v4705_v4 = vld [vmem:[#allocation5 + $0xa4] sm:$0xf0] }
  0xad   :  { %v164_v19 = vadd.f32 %v163_v13, %v144_v15  ;;  %v363_v13 = vunpack.c.h.b16 %v197_v47  ;;  %v372_v15 = vunpack.c.l.b16 %v202_v12  ;;  %v437_v11 = vpack.c.b16 %v389_v6, %v389_v6  ;;  %v4753_v6 = vld [vmem:[#allocation5 + $0x224] sm:$0xf0] }
  0xaf   :  { %v184_v22 = vadd.f32 %v183_v16, %v164_v19  ;;  %v373_v16 = vunpack.c.h.b16 %v202_v12  ;;  %v411_v17 = vpack.c.b16 %v363_v13, %v363_v13  ;;  %v420_v19 = vpack.c.b16 %v372_v15, %v372_v15 }
  0xb1   :  { %v186_v25 = vmax.f32 %v184_v22, 0.0  ;;  %v421_v20 = vpack.c.b16 %v373_v16, %v373_v16  ;;  %v503_v21 = vsel %vm444_vm1, %v411_v17, 0  ;;  %v524_v22 = vsel %vm444_vm1, %v418_v18, 0 }
  0xb2   :  { %v530_v23 = vsel %vm444_vm1, %v420_v19, 0  ;;  %v581_v17 = vsel %vm444_vm1, %v437_v11, 0 }
  0xb3   :  { %v5239_v28 = vpack.c.bf16 %v186_v25, %v186_v25  ;;  %v533_v24 = vsel %vm444_vm1, %v421_v20, 0  ;;  %v203_v25 = vld [vmem:[#allocation3 + $0x78] sm:$0xff] }
  0xb5   :  { %4092 = vmatmul.msk.bf16.vlgmr.msra.gmra.mxu3 %vm440_vm2, %v5239_v28  ;;  %4094 = vmatmul.msk.bf16.vlgmr.msrb.gmra.mxu2 %vm440_vm2, %v5239_v28 }
  0xb6   :  { %4096 = vmatmul.msk.bf16.vlgmr.msrb.gmra.mxu0 %vm440_vm2, %v5239_v28  ;;  %4097 = vmatmul.msk.bf16.vlgmr.msrb.gmra.mxu1 %vm440_vm2, %v5239_v28 }
  0xb7   :  { %635 = vmatpush.bf16.msra.mxu3 %v455_v29  ;;  %726 = vmatpush.bf16.msrb.mxu2 %v476_v30  ;;  %v374_v29 = vunpack.c.l.b16 %v203_v25  ;;  %v376_v30 = vunpack.c.l.b16 %v204_v26 }
  0xb8   :  { %752 = vmatpush.bf16.msrb.mxu0 %v482_v31  ;;  %765 = vmatpush.bf16.msrb.mxu1 %v485_v32  ;;  %v377_v31 = vunpack.c.h.b16 %v204_v26  ;;  %v415_v32 = vpack.c.b16 %v367_v27, %v367_v27 }
  0xb9   :  { %v422_v33 = vpack.c.b16 %v374_v29, %v374_v29  ;;  %v424_v34 = vpack.c.b16 %v376_v30, %v376_v30 }
  0xba   :  { %v425_v35 = vpack.c.b16 %v377_v31, %v377_v31  ;;  %v515_v36 = vsel %vm444_vm1, %v415_v32, 0  ;;  %v4729_v31 = vld [vmem:[#allocation5 + $0x164] sm:$0xf0]  ;;  %v4502_v32 = vld [vmem:[#allocation5 + $0x2d0] sm:$0xf] }
  0xbb   :  { %v536_v37 = vsel %vm444_vm1, %v422_v33, 0  ;;  %v542_v38 = vsel %vm444_vm1, %v424_v34, 0  ;;  %v4777_v33 = vld [vmem:[#allocation5 + $0x2e4] sm:$0xf0] }
  0xbc   :  { %v545_v39 = vsel %vm444_vm1, %v425_v35, 0 }
  0xc5   :  { %4093 = vmatmul.msk.bf16.vlgmr.msrb.gmra.mxu3 %vm440_vm2, %v5239_v28  ;;  %4098 = vmatmul.msk.bf16.vlgmr.msra.gmra.mxu2 %vm440_vm2, %v5239_v28 }
  0xc6   :  { %4100 = vmatmul.msk.bf16.vlgmr.msra.gmra.mxu0 %vm440_vm2, %v5239_v28  ;;  %4101 = vmatmul.msk.bf16.vlgmr.msra.gmra.mxu1 %vm440_vm2, %v5239_v28 }
  0xc7   :  { %687 = vmatpush.bf16.msrb.mxu3 %v467_v43  ;;  %778 = vmatpush.bf16.msra.mxu2 %v488_v44  ;;  %v378_v43 = vunpack.c.l.b16 %v205_v40  ;;  %v380_v44 = vunpack.c.l.b16 %v206_v41 }
  0xc8   :  { %804 = vmatpush.bf16.msra.mxu0 %v494_v45  ;;  %817 = vmatpush.bf16.msra.mxu1 %v497_v46  ;;  %v381_v45 = vunpack.c.h.b16 %v206_v41  ;;  %v419_v46 = vpack.c.b16 %v371_v42, %v371_v42  ;;  %v4723_v41 = vld [vmem:[#allocation5 + $0x134] sm:$0xf0]  ;;  %v4478_v42 = vld [vmem:[#allocation5 + $0x2a0] sm:$0xf] }
  0xc9   :  { %v426_v47 = vpack.c.b16 %v378_v43, %v378_v43  ;;  %v428_v48 = vpack.c.b16 %v380_v44, %v380_v44  ;;  %v4771_v43 = vld [vmem:[#allocation5 + $0x2b4] sm:$0xf0] }
  0xca   :  { %v429_v49 = vpack.c.b16 %v381_v45, %v381_v45  ;;  %v527_v50 = vsel %vm444_vm1, %v419_v46, 0 }
  0xcb   :  { %v548_v51 = vsel %vm444_vm1, %v426_v47, 0  ;;  %v554_v52 = vsel %vm444_vm1, %v428_v48, 0  ;;  %v5385_v47 = vor.u32 %v4771_v43, %v4478_v42  ;;  %v4262_v48 = vld [vmem:[#allocation5 + $0xf0] sm:$0xf]  ;;  %v4264_v42 = vld [vmem:[#allocation5 + $0x108] sm:$0xf0] }
  0xcc   :  { %v557_v53 = vsel %vm444_vm1, %v429_v49, 0 }
  0xcd   :  { %7146 = vst [vmem:[#allocation18_spill] sm:$0xff] %v5385_v47 }
  0xd5   :  { %4095 = vmatmul.msk.bf16.vlgmr.msra.gmra.mxu3 %vm440_vm2, %v5239_v28  ;;  %4102 = vmatmul.msk.bf16.vlgmr.msrb.gmra.mxu2 %vm440_vm2, %v5239_v28 }
  0xd6   :  { %4104 = vmatmul.msk.bf16.vlgmr.msrb.gmra.mxu0 %vm440_vm2, %v5239_v28  ;;  %4105 = vmatmul.msk.bf16.vlgmr.msrb.gmra.mxu1 %vm440_vm2, %v5239_v28 }
  0xd7   :  { %739 = vmatpush.bf16.msra.mxu3 %v479_v57  ;;  %830 = vmatpush.bf16.msrb.mxu2 %v500_v58  ;;  %v207_v57 = vld [vmem:[#allocation3 + $0x98] sm:$0xff]  ;;  %v375_v58 = vunpack.c.h.b16 %v203_v25  ;;  %v4310_v25 = vld [vmem:[#allocation5 + $0x150] sm:$0xf] }
  0xd8   :  { %856 = vmatpush.bf16.msrb.mxu0 %v506_v59  ;;  %869 = vmatpush.bf16.msrb.mxu1 %v509_v60  ;;  %v382_v59 = vunpack.c.l.b16 %v207_v57  ;;  %v432_v60 = vpack.c.b16 %v384_v55, %v384_v55  ;;  %v383_v26 = vunpack.c.h.b16 %v207_v57 }
  0xd9   :  { %v423_v62 = vpack.c.b16 %v375_v58, %v375_v58  ;;  %v4238_v58 = vld [vmem:[#allocation5 + $0xc0] sm:$0xf] }
  0xda   :  { %v430_v63 = vpack.c.b16 %v382_v59, %v382_v59  ;;  %v566_v0 = vsel %vm444_vm1, %v432_v60, 0  ;;  %v431_v34 = vpack.c.b16 %v383_v26, %v383_v26  ;;  %v4711_v59 = vld [vmem:[#allocation5 + $0xd4] sm:$0xf0]  ;;  %v4430_v60 = vld [vmem:[#allocation5 + $0x240] sm:$0xf] }
  0xdb   :  { %v539_v2 = vsel %vm444_vm1, %v423_v62, 0  ;;  %v4288_v26 = vld [vmem:[#allocation5 + $0x138] sm:$0xf0] }
  0xdc   :  { %v560_v3 = vsel %vm444_vm1, %v430_v63, 0  ;;  %v563_v44 = vsel %vm444_vm1, %v431_v34, 0  ;;  %v5400_v63 = vor.u32 %v4711_v59, %v4238_v58  ;;  %v4358_v34 = vld [vmem:[#allocation5 + $0x1b0] sm:$0xf] }
  0xde   :  { %7151 = vst [vmem:[#allocation23_spill] sm:$0xff] %v5400_v63 }
  0xe5   :  { %4099 = vmatmul.msk.bf16.vlgmr.msrb.gmra.mxu3 %vm440_vm2, %v5239_v28  ;;  %4106 = vmatmul.msk.bf16.vlgmr.msra.gmra.mxu2 %vm440_vm2, %v5239_v28 }
  0xe6   :  { %4108 = vmatmul.msk.bf16.vlgmr.msra.gmra.mxu0 %vm440_vm2, %v5239_v28  ;;  %4109 = vmatmul.msk.bf16.vlgmr.msra.gmra.mxu1 %vm440_vm2, %v5239_v28 }
  0xe7   :  { %791 = vmatpush.bf16.msrb.mxu3 %v491_v7  ;;  %882 = vmatpush.bf16.msra.mxu2 %v512_v8  ;;  %v5337_v7 = vld [vmem:[#allocation3 + $0xa8] sm:$0xff]  ;;  %v379_v8 = vunpack.c.h.b16 %v205_v40  ;;  %v4286_v40 = vld [vmem:[#allocation5 + $0x120] sm:$0xf] }
  0xe8   :  { %908 = vmatpush.bf16.msra.mxu0 %v518_v9  ;;  %921 = vmatpush.bf16.msra.mxu1 %v521_v10  ;;  %v386_v9 = vunpack.c.l.b16 %v5337_v7  ;;  %v436_v10 = vpack.c.b16 %v388_v5, %v388_v5  ;;  %v5383_v46 = vor.u32 %v4723_v41, %v4286_v40  ;;  %v387_v62 = vunpack.c.h.b16 %v5337_v7  ;;  %v4406_v5 = vld [vmem:[#allocation5 + $0x210] sm:$0xf]  ;;  %v4714_v41 = vld [vmem:[#allocation5 + $0xf4] sm:$0xf] }
  0xe9   :  { %v427_v12 = vpack.c.b16 %v379_v8, %v379_v8  ;;  %v4726_v8 = vld [vmem:[#allocation5 + $0x154] sm:$0xf]  ;;  %v5446_v59 = vor.u32 %v4714_v41, %v4264_v42  ;;  %v4216_v41 = vld [vmem:[#allocation5 + $0xa8] sm:$0xf0]  ;;  %v4718_v42 = vld [vmem:[#allocation5 + $0x10c] sm:$0xf0] }
  0xea   :  { %v434_v13 = vpack.c.b16 %v386_v9, %v386_v9  ;;  %v578_v16 = vsel %vm444_vm1, %v436_v10, 0  ;;  %7145 = vst [vmem:[#allocation17_spill] sm:$0xff] %v5383_v46  ;;  %v4312_v9 = vld [vmem:[#allocation5 + $0x168] sm:$0xf0]  ;;  %v435_v10 = vpack.c.b16 %v387_v62, %v387_v62  ;;  %v4778_v62 = vld [vmem:[#allocation5 + $0x2ec] sm:$0xf0] }
  0xeb   :  { %v551_v18 = vsel %vm444_vm1, %v427_v12, 0  ;;  %7164 = vst [vmem:[#allocation36_spill] sm:$0xff] %v5446_v59 }
  0xec   :  { %v572_v19 = vsel %vm444_vm1, %v434_v13, 0  ;;  %v5412_v13 = vor.u32 %v4753_v6, %v4406_v5 }
  0xee   :  { %7156 = vst [vmem:[#allocation28_spill] sm:$0xff] %v5412_v13 }
  0xf5   :  { %4103 = vmatmul.msk.bf16.vlgmr.msra.gmra.mxu3 %vm440_vm2, %v5239_v28  ;;  %4110 = vmatmul.msk.bf16.vlgmr.msrb.gmra.mxu2 %vm440_vm2, %v5239_v28 }
  0xf6   :  { %4112 = vmatmul.msk.bf16.vlgmr.msrb.gmra.mxu0 %vm440_vm2, %v5239_v28  ;;  %4113 = vmatmul.msk.bf16.vlgmr.msrb.gmra.mxu1 %vm440_vm2, %v5239_v28 }
  0xf7   :  { %843 = vmatpush.bf16.msra.mxu3 %v503_v21  ;;  %934 = vmatpush.bf16.msrb.mxu2 %v524_v22 }
  0xf8   :  { %960 = vmatpush.bf16.msrb.mxu0 %v530_v23  ;;  %973 = vmatpush.bf16.msrb.mxu1 %v533_v24  ;;  %v5360_v24 = vld [vmem:[#allocation3 + $0xb8] sm:$0xff] }
  0xf9   :  { %v390_v27 = vunpack.c.l.b16 %v5360_v24  ;;  %v391_v58 = vunpack.c.h.b16 %v5360_v24  ;;  %v4294_v24 = vld [vmem:[#allocation5 + $0x128] sm:$0xf] }
  0xfb   :  { %v438_v35 = vpack.c.b16 %v390_v27, %v390_v27 }
  0xfd   :  { %v584_v45 = vsel %vm444_vm1, %v438_v35, 0  ;;  %v4741_v35 = vld [vmem:[#allocation5 + $0x1c4] sm:$0xf0] }
 0x105   :  { %4107 = vmatmul.msk.bf16.vlgmr.msrb.gmra.mxu3 %vm440_vm2, %v5239_v28  ;;  %4114 = vmatmul.msk.bf16.vlgmr.msra.gmra.mxu2 %vm440_vm2, %v5239_v28 }
 0x106   :  { %4116 = vmatmul.msk.bf16.vlgmr.msra.gmra.mxu0 %vm440_vm2, %v5239_v28  ;;  %4117 = vmatmul.msk.bf16.vlgmr.msra.gmra.mxu1 %vm440_vm2, %v5239_v28 }
 0x107   :  { %895 = vmatpush.bf16.msrb.mxu3 %v515_v36  ;;  %986 = vmatpush.bf16.msra.mxu2 %v536_v37 }
 0x108   :  { %1012 = vmatpush.bf16.msra.mxu0 %v542_v38  ;;  %1025 = vmatpush.bf16.msra.mxu1 %v545_v39  ;;  %v5367_v38 = vor.u32 %v4729_v31, %v4310_v25  ;;  %v5369_v39 = vor.u32 %v4777_v33, %v4502_v32  ;;  %v4720_v25 = vld [vmem:[#allocation5 + $0x124] sm:$0xf]  ;;  %v4693_v33 = vld [vmem:[#allocation5 + $0x44] sm:$0xf0] }
 0x109   :  { %v5436_v40 = vor.u32 %v4720_v25, %v4288_v26  ;;  %v4270_v25 = vld [vmem:[#allocation5 + $0xf8] sm:$0xf] }
 0x10a   :  { %7143 = vst [vmem:[#allocation15_spill] sm:$0xff] %v5367_v38 }
 0x10b   :  { %7144 = vst [vmem:[#allocation16_spill] sm:$0xff] %v5369_v39 }
 0x10c   :  { %7161 = vst [vmem:[#allocation33_spill] sm:$0xff] %v5436_v40 }
 0x115   :  { %4111 = vmatmul.msk.bf16.vlgmr.msra.gmra.mxu3 %vm440_vm2, %v5239_v28  ;;  %4118 = vmatmul.msk.bf16.vlgmr.msrb.gmra.mxu2 %vm440_vm2, %v5239_v28 }
 0x116   :  { %4120 = vmatmul.msk.bf16.vlgmr.msrb.gmra.mxu0 %vm440_vm2, %v5239_v28  ;;  %4121 = vmatmul.msk.bf16.vlgmr.msrb.gmra.mxu1 %vm440_vm2, %v5239_v28 }
 0x117   :  { %947 = vmatpush.bf16.msra.mxu3 %v527_v50  ;;  %1038 = vmatpush.bf16.msrb.mxu2 %v548_v51  ;;  %v4717_v51 = vld [vmem:[#allocation5 + $0x104] sm:$0xf0] }
 0x118   :  { %1064 = vmatpush.bf16.msrb.mxu0 %v554_v52  ;;  %1077 = vmatpush.bf16.msrb.mxu1 %v557_v53  ;;  %v4454_v52 = vld [vmem:[#allocation5 + $0x270] sm:$0xf]  ;;  %v4765_v53 = vld [vmem:[#allocation5 + $0x284] sm:$0xf0]  ;;  %v5393_v56 = vor.u32 %v4717_v51, %v4262_v48  ;;  %v5442_v48 = vor.u32 %v4741_v35, %v4358_v34  ;;  %v4142_v51 = vld [vmem:[#allocation5] sm:$0xf] }
 0x119   :  { %v5395_v57 = vor.u32 %v4765_v53, %v4454_v52  ;;  %v4687_v52 = vld [vmem:[#allocation5 + $0x14] sm:$0xf0]  ;;  %v4334_v53 = vld [vmem:[#allocation5 + $0x180] sm:$0xf]  ;;  %v4702_v35 = vld [vmem:[#allocation5 + $0x94] sm:$0xf] }
 0x11a   :  { %7149 = vst [vmem:[#allocation21_spill] sm:$0xff] %v5393_v56 }
 0x11b   :  { %7150 = vst [vmem:[#allocation22_spill] sm:$0xff] %v5395_v57 }
 0x11c   :  { %7163 = vst [vmem:[#allocation35_spill] sm:$0xff] %v5442_v48 }
 0x125   :  { %4115 = vmatmul.msk.bf16.vlgmr.msrb.gmra.mxu3 %vm440_vm2, %v5239_v28  ;;  %4122 = vmatmul.msk.bf16.vlgmr.msra.gmra.mxu2 %vm440_vm2, %v5239_v28 }
 0x126   :  { %4124 = vmatmul.msk.bf16.vlgmr.msra.gmra.mxu0 %vm440_vm2, %v5239_v28  ;;  %4125 = vmatmul.msk.bf16.vlgmr.msra.gmra.mxu1 %vm440_vm2, %v5239_v28 }
 0x127   :  { %1116 = vmatpush.bf16.msra.mxu0 %v566_v0  ;;  %1129 = vmatpush.bf16.msra.mxu1 %v569_v1  ;;  %v5402_v0 = vor.u32 %v4759_v61, %v4430_v60  ;;  %v4214_v1 = vld [vmem:[#allocation5 + $0x90] sm:$0xf]  ;;  %v4510_v61 = vld [vmem:[#allocation5 + $0x2d8] sm:$0xf] }
 0x128   :  { %999 = vmatpush.bf16.msrb.mxu3 %v539_v2  ;;  %1090 = vmatpush.bf16.msra.mxu2 %v560_v3  ;;  %v5410_v12 = vor.u32 %v4705_v4, %v4214_v1  ;;  %v4730_v60 = vld [vmem:[#allocation5 + $0x16c] sm:$0xf0]  ;;  %v5450_v1 = vor.u32 %v4687_v52, %v4142_v51  ;;  %v5456_v6 = vor.u32 %v4778_v62, %v4510_v61  ;;  %v6955_v51 = vmov 0   ;;  %v4696_v61 = vld [vmem:[#allocation5 + $0x64] sm:$0xf] }
 0x129   :  { %7152 = vst [vmem:[#allocation24_spill] sm:$0xff] %v5402_v0  ;;  %v5481_v52 = vor.u32 %v4702_v35, %v4216_v41  ;;  %v4192_v62 = vld [vmem:[#allocation5 + $0x78] sm:$0xf0]  ;;  %v4706_v35 = vld [vmem:[#allocation5 + $0xac] sm:$0xf0] }
 0x12a   :  { %7155 = vst [vmem:[#allocation27_spill] sm:$0xff] %v5410_v12  ;;  %v4414_v41 = vld [vmem:[#allocation5 + $0x218] sm:$0xf] }
 0x12b   :  { %7165 = vst [vmem:[#allocation37_spill] sm:$0xff] %v5450_v1 }
 0x12c   :  { %7168 = vst [vmem:[#allocation40_spill] sm:$0xff] %v5456_v6 }
 0x12d   :  { %7174 = vst [vmem:[#allocation46_spill] sm:$0xff] %v5481_v52 }
 0x133   :  { %v5340_v14 = vpop.f32.mrf.mxu0  ;;  %v5342_v15 = vpop.f32.mrf.mxu1 }
 0x134   :  { %7137 = vst [vmem:[#allocation9_spill] sm:$0xff] %v5340_v14  ;;  %v4715_v14 = vld [vmem:[#allocation5 + $0xfc] sm:$0xf] }
 0x135   :  { %7138 = vst [vmem:[#allocation10_spill] sm:$0xff] %v5342_v15  ;;  %4119 = vmatmul.msk.bf16.vlgmr.msra.gmra.mxu3 %vm440_vm2, %v5239_v28  ;;  %4126 = vmatmul.msk.bf16.vlgmr.msrb.gmra.mxu2 %vm440_vm2, %v5239_v28 }
 0x136   :  { %4128 = vmatmul.msk.bf16.vlgmr.msrb.gmra.mxu0 %vm440_vm2, %v5239_v28  ;;  %4129 = vmatmul.msk.bf16.vlgmr.msrb.gmra.mxu1 %vm440_vm2, %v5239_v28 }
 0x137   :  { %1168 = vmatpush.bf16.msrb.mxu0 %v578_v16  ;;  %1181 = vmatpush.bf16.msrb.mxu1 %v581_v17  ;;  %v4190_v16 = vld [vmem:[#allocation5 + $0x60] sm:$0xf]  ;;  %v4699_v17 = vld [vmem:[#allocation5 + $0x74] sm:$0xf0] }
 0x138   :  { %v5356_v20 = vpop.f32.mrf.mxu3  ;;  %v5358_v21 = vpop.f32.mrf.mxu2  ;;  %1051 = vmatpush.bf16.msra.mxu3 %v551_v18  ;;  %1142 = vmatpush.bf16.msrb.mxu2 %v572_v19  ;;  %v4382_v18 = vld [vmem:[#allocation5 + $0x1e0] sm:$0xf]  ;;  %v4747_v19 = vld [vmem:[#allocation5 + $0x1f4] sm:$0xf0]  ;;  %v5427_v27 = vor.u32 %v4699_v17, %v4190_v16  ;;  %v4486_v17 = vld [vmem:[#allocation5 + $0x2a8] sm:$0xf] }
 0x139   :  { %7139 = vst [vmem:[#allocation11_spill] sm:$0xff] %v5356_v20  ;;  %v4724_v16 = vld [vmem:[#allocation5 + $0x13c] sm:$0xf0]  ;;  %v4302_v20 = vld [vmem:[#allocation5 + $0x130] sm:$0xf] }
 0x13a   :  { %7140 = vst [vmem:[#allocation12_spill] sm:$0xff] %v5358_v21  ;;  %v4272_v21 = vld [vmem:[#allocation5 + $0x110] sm:$0xf0] }
 0x13b   :  { %v652_v22 = vpop.f32.mrf.mxu0  ;;  %v665_v23 = vpop.f32.mrf.mxu1  ;;  %7157 = vst [vmem:[#allocation29_spill] sm:$0xff] %v5427_v27 }
 0x13c   :  { %v5414_v22 = vor.u32 %v4726_v8, %v4312_v9  ;;  %v575_v23 = vsel %vm444_vm1, %v435_v10, 0  ;;  %v439_v8 = vpack.c.b16 %v391_v58, %v391_v58  ;;  %v4708_v9 = vld [vmem:[#allocation5 + $0xc4] sm:$0xf]  ;;  %v4240_v10 = vld [vmem:[#allocation5 + $0xd8] sm:$0xf0] }
 0x13d   :  { %v5465_v26 = vor.u32 %v4708_v9, %v4240_v10  ;;  %v5494_v10 = vor.u32 %v4696_v61, %v4192_v62 }
 0x13e   :  { %v587_v34 = vsel %vm444_vm1, %v439_v8, 0 }
 0x13f   :  { %7171 = vst [vmem:[#allocation43_spill] sm:$0xff] %v5465_v26 }
 0x140   :  { %v600_v29 = vpop.f32.mrf.mxu3  ;;  %v626_v30 = vpop.f32.mrf.mxu2  ;;  %7179 = vst [vmem:[#allocation51_spill] sm:$0xff] %v5494_v10 }
 0x141   :  { %v5429_v29 = vor.u32 %v4747_v19, %v4382_v18  ;;  %v4166_v30 = vld [vmem:[#allocation5 + $0x30] sm:$0xf]  ;;  %v4772_v18 = vld [vmem:[#allocation5 + $0x2bc] sm:$0xf0] }
 0x143   :  { %v5363_v36 = vpop.f32.mrf.mxu0  ;;  %v5365_v37 = vpop.f32.mrf.mxu1  ;;  %7158 = vst [vmem:[#allocation30_spill] sm:$0xff] %v5429_v29 }
 0x144   :  { %7141 = vst [vmem:[#allocation13_spill] sm:$0xff] %v5363_v36  ;;  %v4736_v36 = vld [vmem:[#allocation5 + $0x19c] sm:$0xf0] }
 0x145   :  { %7142 = vst [vmem:[#allocation14_spill] sm:$0xff] %v5365_v37  ;;  %4123 = vmatmul.msk.bf16.vlgmr.msrb.gmra.mxu3 %vm440_vm2, %v5239_v28  ;;  %4130 = vmatmul.msk.bf16.vlgmr.msra.gmra.mxu2 %vm440_vm2, %v5239_v28  ;;  %v4762_v37 = vld [vmem:[#allocation5 + $0x274] sm:$0xf] }
 0x146   :  { %4132 = vmatmul.msk.bf16.vlgmr.msra.gmra.mxu0 %vm440_vm2, %v5239_v28  ;;  %4133 = vmatmul.msk.bf16.vlgmr.msra.gmra.mxu1 %vm440_vm2, %v5239_v28 }
 0x147   :  { %1795 = vmatpush.bf16.msra.mxu0 %v5367_v38  ;;  %1808 = vmatpush.bf16.msra.mxu1 %v5369_v39 }
 0x148   :  { %v5387_v49 = vpop.f32.mrf.mxu3  ;;  %v5389_v50 = vpop.f32.mrf.mxu2  ;;  %1103 = vmatpush.bf16.msrb.mxu3 %v563_v44  ;;  %1194 = vmatpush.bf16.msra.mxu2 %v584_v45  ;;  %v5440_v45 = vor.u32 %v4693_v33, %v4166_v30  ;;  %v5469_v30 = vor.u32 %v4724_v16, %v4294_v24  ;;  %v5471_v33 = vor.u32 %v4772_v18, %v4486_v17  ;;  %v4760_v24 = vld [vmem:[#allocation5 + $0x25c] sm:$0xf0]  ;;  %v4222_v18 = vld [vmem:[#allocation5 + $0x98] sm:$0xf] }
 0x149   :  { %7147 = vst [vmem:[#allocation19_spill] sm:$0xff] %v5387_v49  ;;  %v4432_v49 = vld [vmem:[#allocation5 + $0x258] sm:$0xf0] }
 0x14a   :  { %7148 = vst [vmem:[#allocation20_spill] sm:$0xff] %v5389_v50  ;;  %v4731_v50 = vld [vmem:[#allocation5 + $0x174] sm:$0xf0] }
 0x14b   :  { %1796 = vmatpush.bf16.msra.mxu0 %v5383_v46  ;;  %1809 = vmatpush.bf16.msra.mxu1 %v5385_v47  ;;  %v704_v54 = vpop.f32.mrf.mxu0  ;;  %v717_v55 = vpop.f32.mrf.mxu1  ;;  %7162 = vst [vmem:[#allocation34_spill] sm:$0xff] %v5440_v45 }
 0x14c   :  { %v4735_v54 = vld [vmem:[#allocation5 + $0x194] sm:$0xf0]  ;;  %7172 = vst [vmem:[#allocation44_spill] sm:$0xff] %v5469_v30 }
 0x14d   :  { %v4318_v55 = vld [vmem:[#allocation5 + $0x158] sm:$0xf]  ;;  %7173 = vst [vmem:[#allocation45_spill] sm:$0xff] %v5471_v33 }
 0x14e   :  { %v5454_v5 = vor.u32 %v4730_v60, %v4318_v55  ;;  %v5489_v55 = vor.u32 %v4718_v42, %v4270_v25  ;;  %v4246_v60 = vld [vmem:[#allocation5 + $0xc8] sm:$0xf]  ;;  %v4690_v25 = vld [vmem:[#allocation5 + $0x34] sm:$0xf]  ;;  %v4754_v42 = vld [vmem:[#allocation5 + $0x22c] sm:$0xf0] }
 0x14f   :  { %1797 = vmatpush.bf16.msra.mxu0 %v5393_v56  ;;  %1810 = vmatpush.bf16.msra.mxu1 %v5395_v57 }
 0x150   :  { %v613_v2 = vpop.f32.mrf.mxu3  ;;  %v678_v3 = vpop.f32.mrf.mxu2  ;;  %7167 = vst [vmem:[#allocation39_spill] sm:$0xff] %v5454_v5 }
 0x151   :  { %v5452_v2 = vor.u32 %v4735_v54, %v4334_v53  ;;  %7177 = vst [vmem:[#allocation49_spill] sm:$0xff] %v5489_v55 }
 0x153   :  { %1798 = vmatpush.bf16.msra.mxu0 %v5400_v63  ;;  %1811 = vmatpush.bf16.msra.mxu1 %v5402_v0  ;;  %v5406_v7 = vpop.f32.mrf.mxu0  ;;  %v5408_v11 = vpop.f32.mrf.mxu1  ;;  %7166 = vst [vmem:[#allocation38_spill] sm:$0xff] %v5452_v2 }
 0x154   :  { %7153 = vst [vmem:[#allocation25_spill] sm:$0xff] %v5406_v7 }
 0x155   :  { %7154 = vst [vmem:[#allocation26_spill] sm:$0xff] %v5408_v11  ;;  %4127 = vmatmul.msk.bf16.vlgmr.msra.gmra.mxu3 %vm440_vm2, %v5239_v28  ;;  %4134 = vmatmul.msk.bf16.vlgmr.msrb.gmra.mxu2 %vm440_vm2, %v5239_v28 }
 0x156   :  { %4136 = vmatmul.msk.bf16.vlgmr.msrb.gmra.mxu0 %vm440_vm2, %v5239_v28  ;;  %4137 = vmatmul.msk.bf16.vlgmr.msrb.gmra.mxu1 %vm440_vm2, %v5239_v28 }
 0x157   :  { %1799 = vmatpush.bf16.msra.mxu0 %v5410_v12  ;;  %1812 = vmatpush.bf16.msra.mxu1 %v5412_v13 }
 0x158   :  { %v5431_v31 = vpop.f32.mrf.mxu3  ;;  %v5433_v32 = vpop.f32.mrf.mxu2  ;;  %1821 = vmatpush.bf16.msrb.mxu2 %v5414_v22  ;;  %1155 = vmatpush.bf16.msra.mxu3 %v575_v23 }
 0x159   :  { %7159 = vst [vmem:[#allocation31_spill] sm:$0xff] %v5431_v31 }
 0x15a   :  { %7160 = vst [vmem:[#allocation32_spill] sm:$0xff] %v5433_v32  ;;  %v4296_v32 = vld [vmem:[#allocation5 + $0x140] sm:$0xf0] }
 0x15b   :  { %1800 = vmatpush.bf16.msra.mxu0 %v5427_v27  ;;  %1813 = vmatpush.bf16.msra.mxu1 %v5429_v29  ;;  %v756_v43 = vpop.f32.mrf.mxu0  ;;  %v769_v44 = vpop.f32.mrf.mxu1 }
 0x15c   :  { %1822 = vmatpush.bf16.msrb.mxu2 %v5436_v40  ;;  %v4462_v43 = vld [vmem:[#allocation5 + $0x278] sm:$0xf]  ;;  %v4766_v44 = vld [vmem:[#allocation5 + $0x28c] sm:$0xf0] }
 0x15d   :  { %v5491_v58 = vor.u32 %v4766_v44, %v4462_v43  ;;  %v4774_v43 = vld [vmem:[#allocation5 + $0x2d4] sm:$0xf]  ;;  %v4504_v44 = vld [vmem:[#allocation5 + $0x2e8] sm:$0xf0] }
 0x15f   :  { %1801 = vmatpush.bf16.msra.mxu0 %v5440_v45  ;;  %1814 = vmatpush.bf16.msra.mxu1 %v5442_v48  ;;  %7178 = vst [vmem:[#allocation50_spill] sm:$0xff] %v5491_v58 }
 0x160   :  { %v639_v3 = vpop.f32.mrf.mxu3  ;;  %v730_v4 = vpop.f32.mrf.mxu2  ;;  %1823 = vmatpush.bf16.msrb.mxu2 %v5446_v59 }
 0x161   :  { %v4712_v3 = vld [vmem:[#allocation5 + $0xdc] sm:$0xf0]  ;;  %v4438_v4 = vld [vmem:[#allocation5 + $0x248] sm:$0xf] }
 0x162   :  { %v5498_v16 = vor.u32 %v4712_v3, %v4246_v60  ;;  %v5500_v17 = vor.u32 %v4760_v24, %v4438_v4  ;;  %v5507_v3 = vor.u32 %v4706_v35, %v4222_v18  ;;  %v5509_v4 = vor.u32 %v4754_v42, %v4414_v41  ;;  %v4198_v24 = vld [vmem:[#allocation5 + $0x68] sm:$0xf]  ;;  %v4174_v42 = vld [vmem:[#allocation5 + $0x38] sm:$0xf] }
 0x163   :  { %1802 = vmatpush.bf16.msra.mxu0 %v5450_v1  ;;  %1815 = vmatpush.bf16.msra.mxu1 %v5452_v2  ;;  %v5461_v19 = vpop.f32.mrf.mxu0  ;;  %v5463_v23 = vpop.f32.mrf.mxu1 }
 0x164   :  { %7169 = vst [vmem:[#allocation41_spill] sm:$0xff] %v5461_v19  ;;  %1824 = vmatpush.bf16.msrb.mxu2 %v5465_v26  ;;  %v4748_v19 = vld [vmem:[#allocation5 + $0x1fc] sm:$0xf0] }
 0x165   :  { %7170 = vst [vmem:[#allocation42_spill] sm:$0xff] %v5463_v23  ;;  %4131 = vmatmul.msk.bf16.vlgmr.msrb.gmra.mxu3 %vm440_vm2, %v5239_v28  ;;  %4138 = vmatmul.msk.bf16.vlgmr.msra.gmra.mxu2 %vm440_vm2, %v5239_v28  ;;  %v4390_v23 = vld [vmem:[#allocation5 + $0x1e8] sm:$0xf] }
 0x166   :  { %1803 = vmatmul.bf16.vlgmr.msra.gmra.mxu0 %v6955_v51  ;;  %1816 = vmatmul.bf16.vlgmr.msra.gmra.mxu1 %v6955_v51  ;;  %7180 = vst [vmem:[#allocation52_spill] sm:$0xff] %v5498_v16  ;;  %v4700_v51 = vld [vmem:[#allocation5 + $0x7c] sm:$0xf0]  ;;  %v5524_v41 = vor.u32 %v4748_v19, %v4390_v23 }
 0x167   :  { %1847 = vmatpush.bf16.msrb.mxu0 %v5454_v5  ;;  %1860 = vmatpush.bf16.msrb.mxu1 %v5456_v6  ;;  %7181 = vst [vmem:[#allocation53_spill] sm:$0xff] %v5500_v17  ;;  %v5522_v35 = vor.u32 %v4700_v51, %v4198_v24  ;;  %v4456_v51 = vld [vmem:[#allocation5 + $0x288] sm:$0xf0] }
 0x168   :  { %1207 = vmatpush.bf16.msrb.mxu3 %v587_v34  ;;  %v5485_v53 = vpop.f32.mrf.mxu3  ;;  %v5487_v54 = vpop.f32.mrf.mxu2  ;;  %1825 = vmatpush.bf16.msrb.mxu2 %v5481_v52  ;;  %v4168_v34 = vld [vmem:[#allocation5 + $0x48] sm:$0xf0]  ;;  %7183 = vst [vmem:[#allocation55_spill] sm:$0xff] %v5507_v3  ;;  %v5548_v31 = vor.u32 %v4762_v37, %v4456_v51 }
 0x169   :  { %7175 = vst [vmem:[#allocation47_spill] sm:$0xff] %v5485_v53  ;;  %v5503_v61 = vor.u32 %v4690_v25, %v4168_v34  ;;  %v4727_v25 = vld [vmem:[#allocation5 + $0x15c] sm:$0xf]  ;;  %v4320_v34 = vld [vmem:[#allocation5 + $0x170] sm:$0xf0] }
 0x16a   :  { %7176 = vst [vmem:[#allocation48_spill] sm:$0xff] %v5487_v54  ;;  %v5511_v54 = vor.u32 %v4774_v43, %v4504_v44  ;;  %v4694_v43 = vld [vmem:[#allocation5 + $0x4c] sm:$0xf0]  ;;  %v4366_v44 = vld [vmem:[#allocation5 + $0x1b8] sm:$0xf] }
 0x16b   :  { %1848 = vmatpush.bf16.msrb.mxu0 %v5469_v30  ;;  %1861 = vmatpush.bf16.msrb.mxu1 %v5471_v33  ;;  %v808_v8 = vpop.f32.mrf.mxu0  ;;  %v821_v9 = vpop.f32.mrf.mxu1  ;;  %7182 = vst [vmem:[#allocation54_spill] sm:$0xff] %v5503_v61  ;;  %v5540_v24 = vor.u32 %v4694_v43, %v4174_v42  ;;  %v4326_v53 = vld [vmem:[#allocation5 + $0x160] sm:$0xf]  ;;  %v4756_v42 = vld [vmem:[#allocation5 + $0x244] sm:$0xf]  ;;  %v7199_v43 = vmov 0  }
 0x16c   :  { %1826 = vmatpush.bf16.msrb.mxu2 %v5494_v10  ;;  %7184 = vst [vmem:[#allocation56_spill] sm:$0xff] %v5509_v4  ;;  %v4684_v8 = vld [vmem:[#allocation5 + $0x4] sm:$0xf]  ;;  %v4144_v9 = vld [vmem:[#allocation5 + $0x18] sm:$0xf0]  ;;  %v5557_v37 = vor.u32 %v4731_v50, %v4326_v53 }
 0x16d   :  { %7185 = vst [vmem:[#allocation57_spill] sm:$0xff] %v5511_v54  ;;  %v5518_v18 = vor.u32 %v4684_v8, %v4144_v9  ;;  %v4721_v9 = vld [vmem:[#allocation5 + $0x12c] sm:$0xf]  ;;  %v4750_v53 = vld [vmem:[#allocation5 + $0x214] sm:$0xf] }
 0x16e   :  { %7189 = vst [vmem:[#allocation61_spill] sm:$0xff] %v5522_v35  ;;  %v5545_v15 = vor.u32 %v4721_v9, %v4296_v32 }
 0x16f   :  { %1849 = vmatpush.bf16.msrb.mxu0 %v5489_v55  ;;  %1862 = vmatpush.bf16.msrb.mxu1 %v5491_v58  ;;  %7188 = vst [vmem:[#allocation60_spill] sm:$0xff] %v5518_v18 }
 0x170   :  { %v691_v60 = vpop.f32.mrf.mxu3  ;;  %v782_v62 = vpop.f32.mrf.mxu2  ;;  %1827 = vmatpush.bf16.msrb.mxu2 %v5503_v61  ;;  %7190 = vst [vmem:[#allocation62_spill] sm:$0xff] %v5524_v41 }
 0x171   :  { %v4768_v60 = vld [vmem:[#allocation5 + $0x2a4] sm:$0xf]  ;;  %v4480_v62 = vld [vmem:[#allocation5 + $0x2b8] sm:$0xf0]  ;;  %7195 = vst [vmem:[#allocation67_spill] sm:$0xff] %v5540_v24 }
 0x172   :  { %v5531_v8 = vor.u32 %v4768_v60, %v4480_v62  ;;  %v4688_v60 = vld [vmem:[#allocation5 + $0x1c] sm:$0xf0]  ;;  %v4342_v62 = vld [vmem:[#allocation5 + $0x188] sm:$0xf]  ;;  %7197 = vst [vmem:[#allocation69_spill] sm:$0xff] %v5545_v15 }
 0x173   :  { %1850 = vmatpush.bf16.msrb.mxu0 %v5498_v16  ;;  %1863 = vmatpush.bf16.msrb.mxu1 %v5500_v17  ;;  %v5513_v11 = vpop.f32.mrf.mxu0  ;;  %v5515_v7 = vpop.f32.mrf.mxu1  ;;  %7198 = vst [vmem:[#allocation70_spill] sm:$0xff] %v5548_v31  ;;  %v5555_v9 = vor.u32 %v4736_v36, %v4342_v62  ;;  %v4470_v62 = vld [vmem:[#allocation5 + $0x280] sm:$0xf] }
 0x174   :  { %7186 = vst [vmem:[#allocation58_spill] sm:$0xff] %v5513_v11  ;;  %v5528_v11 = vor.u32 %v4727_v25, %v4320_v34  ;;  %1828 = vmatpush.bf16.msrb.mxu2 %v5518_v18  ;;  %v4150_v34 = vld [vmem:[#allocation5 + $0x8] sm:$0xf] }
 0x175   :  { %7187 = vst [vmem:[#allocation59_spill] sm:$0xff] %v5515_v7  ;;  %4135 = vmatmul.msk.bf16.vlgmr.msra.gmra.mxu3 %vm440_vm2, %v5239_v28  ;;  %v4742_v7 = vld [vmem:[#allocation5 + $0x1cc] sm:$0xf0]  ;;  %v5553_v32 = vor.u32 %v4688_v60, %v4150_v34  ;;  %v4709_v34 = vld [vmem:[#allocation5 + $0xcc] sm:$0xf] }
 0x176   :  { %7191 = vst [vmem:[#allocation63_spill] sm:$0xff] %v5528_v11  ;;  %1834 = vmatpush.bf16.msra.mxu3 %v5511_v54  ;;  %v5542_v25 = vor.u32 %v4742_v7, %v4366_v44  ;;  %v4248_v60 = vld [vmem:[#allocation5 + $0xe0] sm:$0xf0] }
 0x177   :  { %1851 = vmatpush.bf16.msrb.mxu0 %v5507_v3  ;;  %1864 = vmatpush.bf16.msrb.mxu1 %v5509_v4  ;;  %7192 = vst [vmem:[#allocation64_spill] sm:$0xff] %v5531_v8 }
 0x178   :  { %v5536_v19 = vpop.f32.mrf.mxu3  ;;  %v5538_v23 = vpop.f32.mrf.mxu2  ;;  %7196 = vst [vmem:[#allocation68_spill] sm:$0xff] %v5542_v25  ;;  %1873 = vmatpush.bf16.msra.mxu2 %v5528_v11 }
 0x179   :  { %7193 = vst [vmem:[#allocation65_spill] sm:$0xff] %v5536_v19  ;;  %v4518_v19 = vld [vmem:[#allocation5 + $0x2e0] sm:$0xf]  ;;  %1829 = vmatmul.bf16.vlgmr.msrb.gmra.mxu2 %v7199_v43 }
 0x17a   :  { %7194 = vst [vmem:[#allocation66_spill] sm:$0xff] %v5538_v23  ;;  %1835 = vmatpush.bf16.msra.mxu3 %v5531_v8  ;;  %v4779_v23 = vld [vmem:[#allocation5 + $0x2f4] sm:$0xf0]  ;;  %v4494_v8 = vld [vmem:[#allocation5 + $0x2b0] sm:$0xf] }
 0x17b   :  { %1852 = vmatpush.bf16.msrb.mxu0 %v5522_v35  ;;  %1865 = vmatpush.bf16.msrb.mxu1 %v5524_v41  ;;  %v860_v7 = vpop.f32.mrf.mxu0  ;;  %v873_v44 = vpop.f32.mrf.mxu1  ;;  %7200 = vst [vmem:[#allocation71_spill] sm:$0xff] %v5553_v32  ;;  %v5559_v51 = vor.u32 %v4779_v23, %v4518_v19  ;;  %v5565_v41 = vor.u32 %v4715_v14, %v4272_v21  ;;  %v4408_v19 = vld [vmem:[#allocation5 + $0x228] sm:$0xf0]  ;;  %v4278_v14 = vld [vmem:[#allocation5 + $0x100] sm:$0xf] }
 0x17c   :  { %7201 = vst [vmem:[#allocation72_spill] sm:$0xff] %v5555_v9  ;;  %1874 = vmatpush.bf16.msra.mxu2 %v5545_v15  ;;  %v5563_v7 = vor.u32 %v4756_v42, %v4432_v49  ;;  %v4725_v44 = vld [vmem:[#allocation5 + $0x144] sm:$0xf0]  ;;  %v4719_v21 = vld [vmem:[#allocation5 + $0x114] sm:$0xf0] }
 0x17d   :  { %7202 = vst [vmem:[#allocation73_spill] sm:$0xff] %v5557_v37  ;;  %v5571_v49 = vor.u32 %v4725_v44, %v4302_v20  ;;  %v4767_v42 = vld [vmem:[#allocation5 + $0x294] sm:$0xf0]  ;;  %v4224_v44 = vld [vmem:[#allocation5 + $0xb0] sm:$0xf0] }
 0x17e   :  { %7203 = vst [vmem:[#allocation74_spill] sm:$0xff] %v5559_v51  ;;  %1836 = vmatpush.bf16.msra.mxu3 %v5548_v31 }
 0x17f   :  { %1853 = vmatpush.bf16.msrb.mxu0 %v5540_v24  ;;  %1866 = vmatpush.bf16.msrb.mxu1 %v5542_v25  ;;  %7204 = vst [vmem:[#allocation75_spill] sm:$0xff] %v5563_v7  ;;  %v4773_v24 = vld [vmem:[#allocation5 + $0x2c4] sm:$0xf0]  ;;  %v4743_v25 = vld [vmem:[#allocation5 + $0x1d4] sm:$0xf0] }
 0x180   :  { %7205 = vst [vmem:[#allocation76_spill] sm:$0xff] %v5565_v41  ;;  %v743_v36 = vpop.f32.mrf.mxu3  ;;  %v834_v50 = vpop.f32.mrf.mxu2  ;;  %v5573_v23 = vor.u32 %v4773_v24, %v4494_v8  ;;  %1875 = vmatpush.bf16.msra.mxu2 %v5565_v41  ;;  %v5585_v8 = vor.u32 %v4750_v53, %v4408_v19  ;;  %v4703_v24 = vld [vmem:[#allocation5 + $0x9c] sm:$0xf]  ;;  %v4761_v53 = vld [vmem:[#allocation5 + $0x264] sm:$0xf0] }
 0x181   :  { %7206 = vst [vmem:[#allocation77_spill] sm:$0xff] %v5571_v49  ;;  %v5577_v36 = vor.u32 %v4709_v34, %v4248_v60  ;;  %v5589_v34 = vor.u32 %v4719_v21, %v4278_v14  ;;  %v5591_v60 = vor.u32 %v4767_v42, %v4470_v62  ;;  %v5596_v19 = vor.u32 %v4703_v24, %v4224_v44  ;;  %v4200_v14 = vld [vmem:[#allocation5 + $0x80] sm:$0xf0]  ;;  %v4738_v42 = vld [vmem:[#allocation5 + $0x1b4] sm:$0xf] }
 0x182   :  { %7207 = vst [vmem:[#allocation78_spill] sm:$0xff] %v5573_v23  ;;  %1837 = vmatpush.bf16.msra.mxu3 %v5563_v7  ;;  %v4254_v7 = vld [vmem:[#allocation5 + $0xd0] sm:$0xf]  ;;  %v4230_v44 = vld [vmem:[#allocation5 + $0xa0] sm:$0xf] }
 0x183   :  { %1854 = vmatpush.bf16.msrb.mxu0 %v5553_v32  ;;  %1867 = vmatpush.bf16.msrb.mxu1 %v5555_v9  ;;  %7208 = vst [vmem:[#allocation79_spill] sm:$0xff] %v5577_v36  ;;  %v5581_v50 = vpop.f32.mrf.mxu0  ;;  %v5583_v20 = vpop.f32.mrf.mxu1  ;;  %v4360_v9 = vld [vmem:[#allocation5 + $0x1c8] sm:$0xf0]  ;;  %v4328_v32 = vld [vmem:[#allocation5 + $0x178] sm:$0xf0] }
 0x184   :  { %7209 = vst [vmem:[#allocation80_spill] sm:$0xff] %v5581_v50  ;;  %v4713_v50 = vld [vmem:[#allocation5 + $0xe4] sm:$0xf0]  ;;  %1876 = vmatpush.bf16.msra.mxu2 %v5577_v36  ;;  %v5615_v41 = vor.u32 %v4738_v42, %v4360_v9 }
 0x185   :  { %7210 = vst [vmem:[#allocation81_spill] sm:$0xff] %v5583_v20  ;;  %4139 = vmatmul.msk.bf16.vlgmr.msrb.gmra.mxu3 %vm440_vm2, %v5239_v28  ;;  %v4446_v20 = vld [vmem:[#allocation5 + $0x250] sm:$0xf]  ;;  %v5607_v28 = vor.u32 %v4713_v50, %v4254_v7  ;;  %v4732_v7 = vld [vmem:[#allocation5 + $0x184] sm:$0xf] }
 0x186   :  { %1855 = vmatmul.bf16.vlgmr.msrb.gmra.mxu0 %v7199_v43  ;;  %1868 = vmatmul.bf16.vlgmr.msrb.gmra.mxu1 %v7199_v43  ;;  %7211 = vst [vmem:[#allocation82_spill] sm:$0xff] %v5585_v8  ;;  %v5609_v24 = vor.u32 %v4761_v53, %v4446_v20  ;;  %v4336_v50 = vld [vmem:[#allocation5 + $0x198] sm:$0xf0] }
 0x187   :  { %1899 = vmatpush.bf16.msra.mxu0 %v5557_v37  ;;  %1912 = vmatpush.bf16.msra.mxu1 %v5559_v51  ;;  %v4744_v51 = vld [vmem:[#allocation5 + $0x1e4] sm:$0xf]  ;;  %v4384_v37 = vld [vmem:[#allocation5 + $0x1f8] sm:$0xf0]  ;;  %7212 = vst [vmem:[#allocation83_spill] sm:$0xff] %v5589_v34  ;;  %v5627_v42 = vor.u32 %v4732_v7, %v4336_v50 }
 0x188   :  { %7213 = vst [vmem:[#allocation84_spill] sm:$0xff] %v5591_v60  ;;  %1838 = vmatpush.bf16.msra.mxu3 %v5585_v8  ;;  %v5601_v21 = vpop.f32.mrf.mxu3  ;;  %v5603_v62 = vpop.f32.mrf.mxu2  ;;  %v4707_v8 = vld [vmem:[#allocation5 + $0xb4] sm:$0xf0]  ;;  %1877 = vmatpush.bf16.msra.mxu2 %v5596_v19  ;;  %v4182_v7 = vld [vmem:[#allocation5 + $0x40] sm:$0xf] }
 0x189   :  { %7214 = vst [vmem:[#allocation85_spill] sm:$0xff] %v5596_v19  ;;  %v5619_v20 = vor.u32 %v4707_v8, %v4230_v44  ;;  %v4206_v19 = vld [vmem:[#allocation5 + $0x70] sm:$0xf]  ;;  %v4695_v50 = vld [vmem:[#allocation5 + $0x54] sm:$0xf0] }
 0x18a   :  { %7216 = vst [vmem:[#allocation87_spill] sm:$0xff] %v5601_v21 }
 0x18b   :  { %1900 = vmatpush.bf16.msra.mxu0 %v5571_v49  ;;  %1913 = vmatpush.bf16.msra.mxu1 %v5573_v23  ;;  %v5599_v49 = vor.u32 %v4744_v51, %v4384_v37  ;;  %v4697_v23 = vld [vmem:[#allocation5 + $0x6c] sm:$0xf]  ;;  %7217 = vst [vmem:[#allocation88_spill] sm:$0xff] %v5603_v62  ;;  %v4422_v37 = vld [vmem:[#allocation5 + $0x220] sm:$0xf]  ;;  %v912_v62 = vpop.f32.mrf.mxu0  ;;  %v925_v21 = vpop.f32.mrf.mxu1 }
 0x18c   :  { %7218 = vst [vmem:[#allocation89_spill] sm:$0xff] %v5607_v28  ;;  %v4755_v51 = vld [vmem:[#allocation5 + $0x234] sm:$0xf0]  ;;  %v5612_v36 = vor.u32 %v4697_v23, %v4200_v14  ;;  %v4775_v23 = vld [vmem:[#allocation5 + $0x2dc] sm:$0xf] }
 0x18d   :  { %7215 = vst [vmem:[#allocation86_spill] sm:$0xff] %v5599_v49  ;;  %1839 = vmatpush.bf16.msra.mxu3 %v5599_v49  ;;  %v5621_v53 = vor.u32 %v4755_v51, %v4422_v37  ;;  %v4512_v14 = vld [vmem:[#allocation5 + $0x2f0] sm:$0xf0]  ;;  %v4701_v49 = vld [vmem:[#allocation5 + $0x84] sm:$0xf0] }
 0x18e   :  { %7219 = vst [vmem:[#allocation90_spill] sm:$0xff] %v5609_v24  ;;  %v4398_v62 = vld [vmem:[#allocation5 + $0x1f0] sm:$0xf]  ;;  %v4749_v21 = vld [vmem:[#allocation5 + $0x204] sm:$0xf0]  ;;  %1878 = vmatpush.bf16.msra.mxu2 %v5612_v36  ;;  %v5629_v37 = vor.u32 %v4775_v23, %v4512_v14  ;;  %v5633_v31 = vor.u32 %v4701_v49, %v4206_v19 }
 0x18f   :  { %1901 = vmatpush.bf16.msra.mxu0 %v5589_v34  ;;  %1914 = vmatpush.bf16.msra.mxu1 %v5591_v60  ;;  %7220 = vst [vmem:[#allocation91_spill] sm:$0xff] %v5612_v36  ;;  %v4691_v34 = vld [vmem:[#allocation5 + $0x3c] sm:$0xf]  ;;  %v4176_v60 = vld [vmem:[#allocation5 + $0x50] sm:$0xf0] }
 0x190   :  { %7221 = vst [vmem:[#allocation92_spill] sm:$0xff] %v5615_v41  ;;  %v5624_v9 = vor.u32 %v4691_v34, %v4176_v60  ;;  %v795_v8 = vpop.f32.mrf.mxu3  ;;  %v886_v44 = vpop.f32.mrf.mxu2  ;;  %v4728_v51 = vld [vmem:[#allocation5 + $0x164] sm:$0xf]  ;;  %v5635_v34 = vor.u32 %v4749_v21, %v4398_v62  ;;  %v4769_v60 = vld [vmem:[#allocation5 + $0x2ac] sm:$0xf] }
 0x191   :  { %7222 = vst [vmem:[#allocation93_spill] sm:$0xff] %v5619_v20  ;;  %1840 = vmatpush.bf16.msra.mxu3 %v5615_v41  ;;  %v4488_v41 = vld [vmem:[#allocation5 + $0x2c0] sm:$0xf0]  ;;  %v4374_v36 = vld [vmem:[#allocation5 + $0x1c0] sm:$0xf]  ;;  %v5645_v49 = vor.u32 %v4728_v51, %v4328_v32 }
 0x192   :  { %7223 = vst [vmem:[#allocation94_spill] sm:$0xff] %v5621_v53  ;;  %1879 = vmatpush.bf16.msra.mxu2 %v5624_v9  ;;  %v5648_v19 = vor.u32 %v4769_v60, %v4488_v41  ;;  %v4722_v62 = vld [vmem:[#allocation5 + $0x134] sm:$0xf]  ;;  %v4304_v21 = vld [vmem:[#allocation5 + $0x148] sm:$0xf0] }
 0x193   :  { %1902 = vmatpush.bf16.msra.mxu0 %v5607_v28  ;;  %1915 = vmatpush.bf16.msra.mxu1 %v5609_v24  ;;  %7224 = vst [vmem:[#allocation95_spill] sm:$0xff] %v5624_v9  ;;  %v4685_v28 = vld [vmem:[#allocation5 + $0xc] sm:$0xf]  ;;  %v4152_v24 = vld [vmem:[#allocation5 + $0x20] sm:$0xf0]  ;;  %v5641_v14 = vpop.f32.mrf.mxu0  ;;  %v5643_v8 = vpop.f32.mrf.mxu1  ;;  %v5659_v41 = vor.u32 %v4722_v62, %v4304_v21 }
 0x194   :  { %7225 = vst [vmem:[#allocation96_spill] sm:$0xff] %v5627_v42  ;;  %v5638_v23 = vor.u32 %v4685_v28, %v4152_v24  ;;  %v5652_v28 = vor.u32 %v4695_v50, %v4182_v7  ;;  %v5654_v24 = vor.u32 %v4743_v25, %v4374_v36  ;;  %v4763_v44 = vld [vmem:[#allocation5 + $0x27c] sm:$0xf]  ;;  %v4689_v32 = vld [vmem:[#allocation5 + $0x24] sm:$0xf0] }
 0x195   :  { %7226 = vst [vmem:[#allocation97_spill] sm:$0xff] %v5629_v37  ;;  %1841 = vmatpush.bf16.msra.mxu3 %v5627_v42  ;;  %v4350_v51 = vld [vmem:[#allocation5 + $0x190] sm:$0xf]  ;;  %v4716_v7 = vld [vmem:[#allocation5 + $0x104] sm:$0xf] }
 0x196   :  { %7227 = vst [vmem:[#allocation98_spill] sm:$0xff] %v5633_v31  ;;  %1880 = vmatpush.bf16.msra.mxu2 %v5638_v23  ;;  %v4280_v50 = vld [vmem:[#allocation5 + $0x118] sm:$0xf0]  ;;  %v4757_v62 = vld [vmem:[#allocation5 + $0x24c] sm:$0xf] }
 0x197   :  { %1903 = vmatpush.bf16.msra.mxu0 %v5619_v20  ;;  %1916 = vmatpush.bf16.msra.mxu1 %v5621_v53  ;;  %7228 = vst [vmem:[#allocation99_spill] sm:$0xff] %v5635_v34  ;;  %v4158_v53 = vld [vmem:[#allocation5 + $0x10] sm:$0xf]  ;;  %v4440_v21 = vld [vmem:[#allocation5 + $0x260] sm:$0xf0] }
 0x198   :  { %7229 = vst [vmem:[#allocation100_spill] sm:$0xff] %v5638_v23  ;;  %1842 = vmatmul.bf16.vlgmr.msra.gmra.mxu3 %v7199_v43  ;;  %v5662_v60 = vpop.f32.mrf.mxu3  ;;  %v5664_v25 = vpop.f32.mrf.mxu2 }
 0x199   :  { %7230 = vst [vmem:[#allocation101_spill] sm:$0xff] %v5641_v14  ;;  %1886 = vmatpush.bf16.msrb.mxu3 %v5629_v37  ;;  %v4464_v14 = vld [vmem:[#allocation5 + $0x290] sm:$0xf0]  ;;  %1881 = vmatmul.bf16.vlgmr.msra.gmra.mxu2 %v7199_v43 }
 0x19a   :  { %7231 = vst [vmem:[#allocation102_spill] sm:$0xff] %v5643_v8  ;;  %v4737_v8 = vld [vmem:[#allocation5 + $0x1a4] sm:$0xf0]  ;;  %1925 = vmatpush.bf16.msrb.mxu2 %v5645_v49  ;;  %v5666_v36 = vor.u32 %v4763_v44, %v4464_v14  ;;  %v5676_v14 = vor.u32 %v4716_v7, %v4280_v50  ;;  %v5679_v44 = vor.u32 %v4757_v62, %v4440_v21  ;;  %v4704_v7 = vld [vmem:[#allocation5 + $0xa4] sm:$0xf] }
 0x19b   :  { %7232 = vst [vmem:[#allocation103_spill] sm:$0xff] %v5648_v19  ;;  %1904 = vmatpush.bf16.msra.mxu0 %v5633_v31  ;;  %1917 = vmatpush.bf16.msra.mxu1 %v5635_v34  ;;  %v5670_v34 = vor.u32 %v4689_v32, %v4158_v53  ;;  %v5672_v31 = vor.u32 %v4737_v8, %v4350_v51  ;;  %v964_v20 = vpop.f32.mrf.mxu0  ;;  %v4751_v53 = vld [vmem:[#allocation5 + $0x21c] sm:$0xf]  ;;  %v4416_v8 = vld [vmem:[#allocation5 + $0x230] sm:$0xf0] }
 0x19c   :  { %7233 = vst [vmem:[#allocation104_spill] sm:$0xff] %v5652_v28  ;;  %v4232_v50 = vld [vmem:[#allocation5 + $0xb8] sm:$0xf0]  ;;  %v4745_v62 = vld [vmem:[#allocation5 + $0x1ec] sm:$0xf] }
 0x19d   :  { %7234 = vst [vmem:[#allocation105_spill] sm:$0xff] %v5654_v24  ;;  %1887 = vmatpush.bf16.msrb.mxu3 %v5648_v19  ;;  %v4392_v21 = vld [vmem:[#allocation5 + $0x200] sm:$0xf0] }
 0x19e   :  { %7235 = vst [vmem:[#allocation106_spill] sm:$0xff] %v5662_v60  ;;  %v977_v60 = vpop.f32.mrf.mxu1  ;;  %1926 = vmatpush.bf16.msrb.mxu2 %v5659_v41 }
 0x19f   :  { %7236 = vst [vmem:[#allocation107_spill] sm:$0xff] %v5664_v25  ;;  %1905 = vmatpush.bf16.msra.mxu0 %v5652_v28  ;;  %1918 = vmatpush.bf16.msra.mxu1 %v5654_v24  ;;  %v4710_v25 = vld [vmem:[#allocation5 + $0xd4] sm:$0xf]  ;;  %v4256_v24 = vld [vmem:[#allocation5 + $0xe8] sm:$0xf0]  ;;  %v5690_v60 = vor.u32 %v4751_v53, %v4416_v8  ;;  %v5703_v53 = vor.u32 %v4745_v62, %v4392_v21 }
 0x1a0   :  { %7237 = vst [vmem:[#allocation108_spill] sm:$0xff] %v5666_v36  ;;  %v5686_v20 = vor.u32 %v4710_v25, %v4256_v24  ;;  %v847_v32 = vpop.f32.mrf.mxu3  ;;  %v938_v51 = vpop.f32.mrf.mxu2  ;;  %v4698_v8 = vld [vmem:[#allocation5 + $0x74] sm:$0xf]  ;;  %v4692_v21 = vld [vmem:[#allocation5 + $0x44] sm:$0xf] }
 0x1a1   :  { %7238 = vst [vmem:[#allocation109_spill] sm:$0xff] %v5670_v34  ;;  %1888 = vmatpush.bf16.msrb.mxu3 %v5666_v36  ;;  %v5700_v32 = vor.u32 %v4704_v7, %v4232_v50  ;;  %v4208_v51 = vld [vmem:[#allocation5 + $0x88] sm:$0xf0] }
 0x1a2   :  { %7239 = vst [vmem:[#allocation110_spill] sm:$0xff] %v5672_v31  ;;  %1927 = vmatpush.bf16.msrb.mxu2 %v5676_v14  ;;  %v4496_v28 = vld [vmem:[#allocation5 + $0x2c8] sm:$0xf0] }
 0x1a3   :  { %7240 = vst [vmem:[#allocation111_spill] sm:$0xff] %v5679_v44  ;;  %1906 = vmatpush.bf16.msra.mxu0 %v5670_v34  ;;  %1919 = vmatpush.bf16.msra.mxu1 %v5672_v31  ;;  %v5695_v24 = vpop.f32.mrf.mxu0  ;;  %v4368_v31 = vld [vmem:[#allocation5 + $0x1d0] sm:$0xf0] }
 0x1a4   :  { %7241 = vst [vmem:[#allocation112_spill] sm:$0xff] %v5690_v60  ;;  %v4770_v34 = vld [vmem:[#allocation5 + $0x2b4] sm:$0xf] }
 0x1a5   :  { %1889 = vmatpush.bf16.msrb.mxu3 %v5679_v44  ;;  %7242 = vst [vmem:[#allocation113_spill] sm:$0xff] %v5695_v24  ;;  %v5708_v24 = vor.u32 %v4698_v8, %v4208_v51 }
 0x1a6   :  { %1907 = vmatmul.bf16.vlgmr.msra.gmra.mxu0 %v7199_v43  ;;  %1920 = vmatmul.bf16.vlgmr.msra.gmra.mxu1 %v7199_v43  ;;  %v5697_v25 = vpop.f32.mrf.mxu1  ;;  %7244 = vst [vmem:[#allocation115_spill] sm:$0xff] %v5703_v53 }
 0x1a7   :  { %2047 = vmatpush.bf16.msrb.mxu0 %v5367_v38  ;;  %2060 = vmatpush.bf16.msrb.mxu1 %v5369_v39  ;;  %7243 = vst [vmem:[#allocation114_spill] sm:$0xff] %v5697_v25  ;;  %v4739_v39 = vld [vmem:[#allocation5 + $0x1bc] sm:$0xf]  ;;  %v4776_v38 = vld [vmem:[#allocation5 + $0x2e4] sm:$0xf] }
 0x1a8   :  { %1928 = vmatpush.bf16.msrb.mxu2 %v5686_v20  ;;  %v5711_v7 = vpop.f32.mrf.mxu3  ;;  %v5713_v50 = vpop.f32.mrf.mxu2  ;;  %v5715_v62 = vor.u32 %v4739_v39, %v4368_v31  ;;  %v4184_v25 = vld [vmem:[#allocation5 + $0x58] sm:$0xf0]  ;;  %v4686_v31 = vld [vmem:[#allocation5 + $0x14] sm:$0xf] }
 0x1a9   :  { %1890 = vmatpush.bf16.msrb.mxu3 %v5690_v60  ;;  %7245 = vst [vmem:[#allocation116_spill] sm:$0xff] %v5711_v7 }
 0x1aa   :  { %7246 = vst [vmem:[#allocation117_spill] sm:$0xff] %v5713_v50  ;;  %v4160_v50 = vld [vmem:[#allocation5 + $0x28] sm:$0xf0] }
 0x1ab   :  { %2048 = vmatpush.bf16.msrb.mxu0 %v5383_v46  ;;  %2061 = vmatpush.bf16.msrb.mxu1 %v5385_v47  ;;  %7247 = vst [vmem:[#allocation118_spill] sm:$0xff] %v5715_v62  ;;  %v4733_v47 = vld [vmem:[#allocation5 + $0x18c] sm:$0xf]  ;;  %v4344_v46 = vld [vmem:[#allocation5 + $0x1a0] sm:$0xf0]  ;;  %v1016_v8 = vpop.f32.mrf.mxu0 }
 0x1ac   :  { %1929 = vmatpush.bf16.msrb.mxu2 %v5700_v32  ;;  %v5723_v39 = vor.u32 %v4733_v47, %v4344_v46  ;;  %v5730_v8 = vor.u32 %v4686_v31, %v4160_v50  ;;  %v5734_v46 = vor.u32 %v4770_v34, %v4496_v28  ;;  %v4472_v47 = vld [vmem:[#allocation5 + $0x298] sm:$0xf0]  ;;  %v4758_v28 = vld [vmem:[#allocation5 + $0x254] sm:$0xf] }
 0x1ad   :  { %1891 = vmatpush.bf16.msrb.mxu3 %v5703_v53 }
 0x1ae   :  { %v1029_v51 = vpop.f32.mrf.mxu1  ;;  %7248 = vst [vmem:[#allocation119_spill] sm:$0xff] %v5723_v39 }
 0x1af   :  { %2049 = vmatpush.bf16.msrb.mxu0 %v5393_v56  ;;  %2062 = vmatpush.bf16.msrb.mxu1 %v5395_v57  ;;  %v4520_v56 = vld [vmem:[#allocation5 + $0x2f8] sm:$0xf0]  ;;  %v5720_v57 = vor.u32 %v4692_v21, %v4184_v25  ;;  %7249 = vst [vmem:[#allocation120_spill] sm:$0xff] %v5730_v8  ;;  %v4448_v51 = vld [vmem:[#allocation5 + $0x268] sm:$0xf0] }
 0x1b0   :  { %1930 = vmatpush.bf16.msrb.mxu2 %v5708_v24  ;;  %v5725_v7 = vor.u32 %v4776_v38, %v4520_v56  ;;  %v899_v25 = vpop.f32.mrf.mxu3  ;;  %v990_v21 = vpop.f32.mrf.mxu2  ;;  %v4764_v38 = vld [vmem:[#allocation5 + $0x284] sm:$0xf] }
 0x1b1   :  { %1892 = vmatpush.bf16.msrb.mxu3 %v5715_v62  ;;  %v5746_v34 = vor.u32 %v4764_v38, %v4472_v47  ;;  %v5757_v21 = vor.u32 %v4758_v28, %v4448_v51  ;;  %v4752_v38 = vld [vmem:[#allocation5 + $0x224] sm:$0xf]  ;;  %v4424_v47 = vld [vmem:[#allocation5 + $0x238] sm:$0xf0]  ;;  %v4746_v28 = vld [vmem:[#allocation5 + $0x1f4] sm:$0xf] }
 0x1b2   :  { %v4400_v51 = vld [vmem:[#allocation5 + $0x208] sm:$0xf0] }
 0x1b3   :  { %2050 = vmatpush.bf16.msrb.mxu0 %v5400_v63  ;;  %2063 = vmatpush.bf16.msrb.mxu1 %v5402_v0  ;;  %v5739_v56 = vpop.f32.mrf.mxu0 }
 0x1b4   :  { %1931 = vmatpush.bf16.msrb.mxu2 %v5720_v57  ;;  %7250 = vst [vmem:[#allocation121_spill] sm:$0xff] %v5739_v56 }
 0x1b5   :  { %1893 = vmatpush.bf16.msrb.mxu3 %v5723_v39 }
 0x1b6   :  { %v5741_v50 = vpop.f32.mrf.mxu1 }
 0x1b7   :  { %2051 = vmatpush.bf16.msrb.mxu0 %v5410_v12  ;;  %2064 = vmatpush.bf16.msrb.mxu1 %v5412_v13  ;;  %7251 = vst [vmem:[#allocation122_spill] sm:$0xff] %v5741_v50  ;;  %v7276_v13 = vld [vmem:[#allocation82_spill] sm:$0xff] }
 0x1b8   :  { %1894 = vmatmul.bf16.vlgmr.msrb.gmra.mxu3 %v7199_v43  ;;  %1932 = vmatpush.bf16.msrb.mxu2 %v5730_v8  ;;  %v5751_v31 = vpop.f32.mrf.mxu3  ;;  %v5753_v25 = vpop.f32.mrf.mxu2 }
 0x1b9   :  { %1938 = vmatpush.bf16.msra.mxu3 %v5725_v7  ;;  %7252 = vst [vmem:[#allocation123_spill] sm:$0xff] %v5751_v31 }
 0x1ba   :  { %7253 = vst [vmem:[#allocation124_spill] sm:$0xff] %v5753_v25  ;;  %v5765_v25 = vor.u32 %v4752_v38, %v4424_v47  ;;  %v4352_v47 = vld [vmem:[#allocation5 + $0x1a8] sm:$0xf0] }
 0x1bb   :  { %2052 = vmatpush.bf16.msrb.mxu0 %v5427_v27  ;;  %2065 = vmatpush.bf16.msrb.mxu1 %v5429_v29  ;;  %v1068_v50 = vpop.f32.mrf.mxu0  ;;  %v7275_v29 = vld [vmem:[#allocation79_spill] sm:$0xff] }
 0x1bc   :  { %2073 = vmatpush.bf16.msra.mxu2 %v5414_v22  ;;  %7254 = vst [vmem:[#allocation125_spill] sm:$0xff] %v5765_v25  ;;  %v4740_v50 = vld [vmem:[#allocation5 + $0x1c4] sm:$0xf] }
 0x1bd   :  { %1939 = vmatpush.bf16.msra.mxu3 %v5734_v46  ;;  %1933 = vmatmul.bf16.vlgmr.msrb.gmra.mxu2 %v7199_v43 }
 0x1be   :  { %v1081_v56 = vpop.f32.mrf.mxu1 }
 0x1bf   :  { %2053 = vmatpush.bf16.msrb.mxu0 %v5440_v45  ;;  %2066 = vmatpush.bf16.msrb.mxu1 %v5442_v48  ;;  %v5771_v56 = vor.u32 %v4746_v28, %v4400_v51 }
 0x1c0   :  { %2074 = vmatpush.bf16.msra.mxu2 %v5436_v40  ;;  %v951_v31 = vpop.f32.mrf.mxu3  ;;  %v1042_v48 = vpop.f32.mrf.mxu2 }
 0x1c1   :  { %1940 = vmatpush.bf16.msra.mxu3 %v5746_v34  ;;  %7255 = vst [vmem:[#allocation126_spill] sm:$0xff] %v5771_v56  ;;  %v4734_v31 = vld [vmem:[#allocation5 + $0x194] sm:$0xf] }
 0x1c3   :  { %2054 = vmatpush.bf16.msrb.mxu0 %v5450_v1  ;;  %2067 = vmatpush.bf16.msrb.mxu1 %v5452_v2  ;;  %v5773_v2 = vpop.f32.mrf.mxu0 }
 0x1c4   :  { %2075 = vmatpush.bf16.msra.mxu2 %v5446_v59  ;;  %7256 = vst [vmem:[#allocation127_spill] sm:$0xff] %v5773_v2 }
 0x1c5   :  { %1941 = vmatpush.bf16.msra.mxu3 %v5757_v21 }
 0x1c6   :  { %v5775_v38 = vpop.f32.mrf.mxu1 }
 0x1c7   :  { %2099 = vmatpush.bf16.msra.mxu0 %v5454_v5  ;;  %2112 = vmatpush.bf16.msra.mxu1 %v5456_v6  ;;  %v4376_v6 = vld [vmem:[#allocation5 + $0x1d8] sm:$0xf0]  ;;  %7257 = vst [vmem:[#allocation128_spill] sm:$0xff] %v5775_v38  ;;  %v5791_v38 = vor.u32 %v4734_v31, %v4352_v47 }
 0x1c8   :  { %2076 = vmatpush.bf16.msra.mxu2 %v5465_v26  ;;  %v5781_v48 = vor.u32 %v4740_v50, %v4376_v6  ;;  %v5784_v28 = vpop.f32.mrf.mxu3  ;;  %v5786_v51 = vpop.f32.mrf.mxu2 }
 0x1c9   :  { %1942 = vmatpush.bf16.msra.mxu3 %v5765_v25  ;;  %7259 = vst [vmem:[#allocation130_spill] sm:$0xff] %v5784_v28  ;;  %v7267_v28 = vld [vmem:[#allocation68_spill] sm:$0xff] }
 0x1ca   :  { %7258 = vst [vmem:[#allocation129_spill] sm:$0xff] %v5781_v48 }
 0x1cb   :  { %2100 = vmatpush.bf16.msra.mxu0 %v5469_v30  ;;  %2113 = vmatpush.bf16.msra.mxu1 %v5471_v33  ;;  %7260 = vst [vmem:[#allocation131_spill] sm:$0xff] %v5786_v51  ;;  %v1120_v2 = vpop.f32.mrf.mxu0  ;;  %v7266_v51 = vld [vmem:[#allocation67_spill] sm:$0xff] }
 0x1cc   :  { %2077 = vmatpush.bf16.msra.mxu2 %v5481_v52  ;;  %7261 = vst [vmem:[#allocation132_spill] sm:$0xff] %v5791_v38  ;;  %v7262_v2 = vld [vmem:[#allocation62_spill] sm:$0xff] }
 0x1cd   :  { %1943 = vmatpush.bf16.msra.mxu3 %v5771_v56 }
 0x1cf   :  { %2101 = vmatpush.bf16.msra.mxu0 %v5489_v55  ;;  %2114 = vmatpush.bf16.msra.mxu1 %v5491_v58  ;;  %v1133_v58 = vpop.f32.mrf.mxu1 }
 0x1d0   :  { %2078 = vmatpush.bf16.msra.mxu2 %v5494_v10  ;;  %v1003_v6 = vpop.f32.mrf.mxu3  ;;  %v1094_v50 = vpop.f32.mrf.mxu2  ;;  %v7263_v58 = vld [vmem:[#allocation64_spill] sm:$0xff] }
 0x1d1   :  { %1944 = vmatpush.bf16.msra.mxu3 %v5781_v48  ;;  %v7269_v6 = vld [vmem:[#allocation71_spill] sm:$0xff]  ;;  %v7288_v48 = vld [vmem:[#allocation9_spill] sm:$0xff] }
 0x1d3   :  { %2102 = vmatpush.bf16.msra.mxu0 %v5498_v16  ;;  %2115 = vmatpush.bf16.msra.mxu1 %v5500_v17  ;;  %v5804_v31 = vpop.f32.mrf.mxu0  ;;  %v7273_v17 = vld [vmem:[#allocation72_spill] sm:$0xff] }
 0x1d4   :  { %2079 = vmatpush.bf16.msra.mxu2 %v5503_v61  ;;  %7264 = vst [vmem:[#allocation133_spill] sm:$0xff] %v5804_v31  ;;  %v7274_v31 = vld [vmem:[#allocation75_spill] sm:$0xff] }
 0x1d5   :  { %1945 = vmatpush.bf16.msra.mxu3 %v5791_v38 }
 0x1d7   :  { %2103 = vmatpush.bf16.msra.mxu0 %v5507_v3  ;;  %2116 = vmatpush.bf16.msra.mxu1 %v5509_v4  ;;  %v5806_v47 = vpop.f32.mrf.mxu1  ;;  %v7289_v3 = vld [vmem:[#allocation19_spill] sm:$0xff] }
 0x1d8   :  { %1946 = vmatmul.bf16.vlgmr.msra.gmra.mxu3 %v7199_v43  ;;  %2080 = vmatpush.bf16.msra.mxu2 %v5518_v18  ;;  %7265 = vst [vmem:[#allocation134_spill] sm:$0xff] %v5806_v47  ;;  %v7268_v43 = vld [vmem:[#allocation70_spill] sm:$0xff]  ;;  %v5813_v50 = vpop.f32.mrf.mxu3  ;;  %v5815_v4 = vpop.f32.mrf.mxu2 }
 0x1d9   :  { %2086 = vmatpush.bf16.msrb.mxu3 %v5511_v54  ;;  %7270 = vst [vmem:[#allocation135_spill] sm:$0xff] %v5813_v50 }
 0x1da   :  { %7271 = vst [vmem:[#allocation136_spill] sm:$0xff] %v5815_v4 }
 0x1db   :  { %2104 = vmatpush.bf16.msra.mxu0 %v5522_v35  ;;  %2117 = vmatpush.bf16.msra.mxu1 %v7262_v2  ;;  %v7272_v2 = vld [vmem:[#allocation76_spill] sm:$0xff]  ;;  %v1172_v47 = vpop.f32.mrf.mxu0 }
 0x1dc   :  { %2125 = vmatpush.bf16.msrb.mxu2 %v5528_v11 }
 0x1dd   :  { %2087 = vmatpush.bf16.msrb.mxu3 %v7263_v58  ;;  %v7279_v58 = vld [vmem:[#allocation91_spill] sm:$0xff] }
 0x1df   :  { %2105 = vmatpush.bf16.msra.mxu0 %v7266_v51  ;;  %2118 = vmatpush.bf16.msra.mxu1 %v7267_v28  ;;  %v1185_v33 = vpop.f32.mrf.mxu1  ;;  %v7280_v51 = vld [vmem:[#allocation92_spill] sm:$0xff] }
 0x1e0   :  { %2126 = vmatpush.bf16.msrb.mxu2 %v5545_v15  ;;  %v1055_v28 = vpop.f32.mrf.mxu3  ;;  %v1146_v0 = vpop.f32.mrf.mxu2 }
 0x1e1   :  { %2088 = vmatpush.bf16.msrb.mxu3 %v7268_v43  ;;  %v7277_v43 = vld [vmem:[#allocation85_spill] sm:$0xff]  ;;  %v5834_v0 = vld [vmem:[%s6947_s4] sm:$0xff] }
 0x1e2   :  { %v224_v33 = vperm.slane %v5834_v0, 0 }
 0x1e3   :  { %2106 = vmatpush.bf16.msra.mxu0 %v7269_v6  ;;  %2119 = vmatpush.bf16.msra.mxu1 %v7273_v17  ;;  %v7278_v6 = vld [vmem:[#allocation86_spill] sm:$0xff]  ;;  %v1804_v50 = vpop.f32.mrf.mxu0 }
 0x1e4   :  { %2127 = vmatpush.bf16.msrb.mxu2 %v7272_v2 }
 0x1e5   :  { %2089 = vmatpush.bf16.msrb.mxu3 %v7274_v31 }
 0x1e7   :  { %v1817_v4 = vpop.f32.mrf.mxu1 }
 0x1e8   :  { %2128 = vmatpush.bf16.msrb.mxu2 %v7275_v29  ;;  %v5826_v17 = vpop.f32.mrf.mxu3  ;;  %v5828_v47 = vpop.f32.mrf.mxu2 }
 0x1e9   :  { %2090 = vmatpush.bf16.msrb.mxu3 %v7276_v13  ;;  %7281 = vst [vmem:[#allocation137_spill] sm:$0xff] %v5826_v17  ;;  %v7283_v17 = vld [vmem:[#allocation11_spill] sm:$0xff] }
 0x1ea   :  { %7282 = vst [vmem:[#allocation138_spill] sm:$0xff] %v5828_v47  ;;  %v599_v47 = vadd.f32 %v7283_v17, %v224_v33 }
 0x1eb   :  { %v1806_v28 = vpop.f32.mrf.mxu0 }
 0x1ec   :  { %2129 = vmatpush.bf16.msrb.mxu2 %v7277_v43 }
 0x1ed   :  { %2091 = vmatpush.bf16.msrb.mxu3 %v7278_v6 }
 0x1ef   :  { %v1819_v6 = vpop.f32.mrf.mxu1 }
 0x1f0   :  { %2130 = vmatpush.bf16.msrb.mxu2 %v7279_v58  ;;  %v1107_v13 = vpop.f32.mrf.mxu3  ;;  %v1198_v31 = vpop.f32.mrf.mxu2 }
 0x1f1   :  { %2092 = vmatpush.bf16.msrb.mxu3 %v7280_v51  ;;  %v1818_v51 = vadd.f32 %v1817_v4, %v1804_v50  ;;  %v226_v4 = vperm.slane %v5834_v0, 2  ;;  %v7285_v31 = vld [vmem:[#allocation12_spill] sm:$0xff] }
 0x1f4   :  { %2131 = vmatpush.bf16.msrb.mxu2 %v5624_v9  ;;  %v1951_v9 = vadd.f32 %v1818_v51, %v599_v47  ;;  %v625_v51 = vadd.f32 %v7285_v31, %v226_v4 }
 0x1f5   :  { %2093 = vmatpush.bf16.msrb.mxu3 %v5627_v42 }
 0x1f6   :  { %v4524_v54 = vmul.f32 -1.442695, %v1951_v9 }
 0x1f8   :  { %2132 = vmatpush.bf16.msrb.mxu2 %v5638_v23  ;;  %v5844_v42 = vpop.f32.mrf.mxu3  ;;  %4819 = vpow2.f32 %v4524_v54 }
 0x1f9   :  { %2138 = vmatpush.bf16.msra.mxu3 %v5629_v37  ;;  %7284 = vst [vmem:[#allocation11_spill] sm:$0xff] %v5844_v42 }
 0x1fc   :  { %v1830_v6 = vpop.f32.mrf.mxu2 }
 0x1fd   :  { %2139 = vmatpush.bf16.msra.mxu3 %v5648_v19 }
 0x1fe   :  { %v4820_v50 = vpop.eup %4819 }
 0x1ff   :  { %v1959_v9 = vadd.f32 1.0, %v4820_v50 }
 0x200   :  { %v1159_v33 = vpop.f32.mrf.mxu3 }
 0x201   :  { %2140 = vmatpush.bf16.msra.mxu3 %v5666_v36  ;;  %4821 = vrcp.f32 %v1959_v9  ;;  %vm1966_vm4 = vweird.f32 %v1959_v9 }
 0x203   :  { %v1856_v17 = vpop.f32.mrf.mxu0  ;;  %v1869_v13 = vpop.f32.mrf.mxu1 }
 0x204   :  { %v1870_v47 = vadd.f32 %v1869_v13, %v1856_v17  ;;  %v1832_v54 = vpop.f32.mrf.mxu2 }
 0x205   :  { %2141 = vmatpush.bf16.msra.mxu3 %v5679_v44 }
 0x206   :  { %v1991_v28 = vadd.f32 %v1870_v47, %v625_v51 }
 0x208   :  { %v4526_v42 = vmul.f32 -1.442695, %v1991_v28  ;;  %v5852_v36 = vpop.f32.mrf.mxu3 }
 0x209   :  { %2142 = vmatpush.bf16.msra.mxu3 %v5690_v60  ;;  %7286 = vst [vmem:[#allocation12_spill] sm:$0xff] %v5852_v36 }
 0x20a   :  { %4823 = vpow2.f32 %v4526_v42  ;;  %v5857_v42 = vld [vmem:[%s6949_s6] sm:$0x3] }
 0x20b   :  { %v1858_v60 = vpop.f32.mrf.mxu0  ;;  %v1871_v44 = vpop.f32.mrf.mxu1  ;;  %v5860_v28 = vperm.slane %v5857_v42, 0 }
 0x20c   :  { %v1972_v60 = vand.u32 2147483648, %v1959_v9 }
 0x20d   :  { %2143 = vmatpush.bf16.msra.mxu3 %v5703_v53  ;;  %v4822_v53 = vpop.eup %4821  ;;  %7287 = vst [vmem:[#allocation139_spill] sm:$0xff] %v5860_v28 }
 0x20e   :  { %v1962_v4 = vmul.f32 %v4822_v53, %v1959_v9  ;;  %vm1967_vm3 = vweird.f32 %v4822_v53 }
 0x20f   :  { %vm1968_vm5 = vmor %vm1966_vm4, %vm1967_vm3 }
 0x210   :  { %v4824_v19 = vpop.eup %4823  ;;  %v1211_v17 = vpop.f32.mrf.mxu3  ;;  %v1963_v50 = vsub.f32 1.0, %v1962_v4 }
 0x211   :  { %2144 = vmatpush.bf16.msra.mxu3 %v5715_v62  ;;  %v1999_v37 = vadd.f32 1.0, %v4824_v19  ;;  %v1970_v19 = vand.u32 2147483647, %v1959_v9  ;;  %v228_v17 = vperm.slane %v5834_v0, 4 }
 0x212   :  { %v1964_v13 = vmul.f32 %v4822_v53, %v1963_v50 }
 0x213   :  { %4825 = vrcp.f32 %v1999_v37  ;;  %vm1971_vm6 = vcmp.eq.f32.partialorder %v1970_v19, 8.507059e+37  ;;  %v651_v43 = vadd.f32 %v7288_v48, %v228_v17  ;;  %vm2006_vm8 = vweird.f32 %v1999_v37 }
 0x214   :  { %v1965_v47 = vadd.f32 %v4822_v53, %v1964_v13  ;;  %v1973_v13 = vor.u32 1.1754944e-38, %v1972_v60  ;;  %v2012_v60 = vand.u32 2147483648, %v1999_v37  ;;  %v2010_v19 = vand.u32 2147483647, %v1999_v37 }
 0x215   :  { %2145 = vmatpush.bf16.msra.mxu3 %v5723_v39  ;;  %v225_v39 = vperm.slane %v5834_v0, 1 }
 0x216   :  { %v1969_v36 = vsel %vm1968_vm5, %v4822_v53, %v1965_v47  ;;  %v2013_v48 = vor.u32 1.1754944e-38, %v2012_v60  ;;  %vm2011_vm10 = vcmp.eq.f32.partialorder %v2010_v19, 8.507059e+37  ;;  %v7295_v19 = vld [vmem:[#allocation93_spill] sm:$0xff] }
 0x217   :  { %v1974_v35 = vsel %vm1971_vm6, %v1973_v13, %v1969_v36  ;;  %v612_v56 = vadd.f32 %v7289_v3, %v225_v39  ;;  %v227_v39 = vperm.slane %v5834_v0, 3 }
 0x219   :  { %v4826_v31 = vpop.eup %4825 }
 0x21a   :  { %v2002_v44 = vmul.f32 %v4826_v31, %v1999_v37  ;;  %vm2007_vm7 = vweird.f32 %v4826_v31 }
 0x21b   :  { %v1843_v51 = vpop.f32.mrf.mxu3  ;;  %vm2008_vm9 = vmor %vm2006_vm8, %vm2007_vm7 }
 0x21c   :  { %v1882_v54 = vpop.f32.mrf.mxu2  ;;  %v2003_v62 = vsub.f32 1.0, %v2002_v44  ;;  %v1844_v58 = vadd.f32 %v1843_v51, %v1830_v6 }
 0x21e   :  { %v2004_v29 = vmul.f32 %v4826_v31, %v2003_v62  ;;  %v1952_v53 = vadd.f32 %v1844_v58, %v612_v56 }
 0x220   :  { %v2005_v44 = vadd.f32 %v4826_v31, %v2004_v29 }
 0x222   :  { %v2009_v36 = vsel %vm2008_vm9, %v4826_v31, %v2005_v44  ;;  %v7291_v31 = vld [vmem:[#allocation73_spill] sm:$0xff] }
 0x223   :  { %v1908_v33 = vpop.f32.mrf.mxu0  ;;  %v1921_v4 = vpop.f32.mrf.mxu1 }
 0x224   :  { %v1922_v50 = vadd.f32 %v1921_v4, %v1908_v33  ;;  %v1845_v38 = vpop.f32.mrf.mxu3  ;;  %v1884_v25 = vpop.f32.mrf.mxu2 }
 0x225   :  { %v4525_v38 = vmul.f32 -1.442695, %v1952_v53  ;;  %v7290_v25 = vld [vmem:[#allocation31_spill] sm:$0xff] }
 0x226   :  { %v2031_v23 = vadd.f32 %v1922_v50, %v5860_v28  ;;  %v638_v56 = vadd.f32 %v7290_v25, %v227_v39  ;;  %v7292_v50 = vld [vmem:[#allocation77_spill] sm:$0xff] }
 0x227   :  { %v7298_v25 = vld [vmem:[#allocation109_spill] sm:$0xff] }
 0x228   :  { %v2033_v9 = vmul.f32 %v2031_v23, %v1974_v35  ;;  %v2014_v35 = vsel %vm2011_vm10, %v2013_v48, %v2009_v36  ;;  %v7296_v36 = vld [vmem:[#allocation98_spill] sm:$0xff] }
 0x22a   :  { %v2035_v16 = vadd.f32 %v2033_v9, %v651_v43  ;;  %v7293_v9 = vld [vmem:[#allocation83_spill] sm:$0xff] }
 0x22b   :  { %v1910_v33 = vpop.f32.mrf.mxu0  ;;  %v1923_v47 = vpop.f32.mrf.mxu1 }
 0x22c   :  { %4827 = vtanh.f32 %v2035_v16  ;;  %v7294_v47 = vld [vmem:[#allocation89_spill] sm:$0xff] }
 0x22d   :  { %4829 = vpow2.f32 %v4525_v38 }
 0x232   :  { %v4828_v6 = vpop.eup %4827 }
 0x233   :  { %v2039_v3 = vsub.f32 0.0, %v4828_v6  ;;  %v4830_v16 = vpop.eup %4829 }
 0x234   :  { %v1960_v58 = vadd.f32 1.0, %v4830_v16  ;;  %v5888_v16 = vperm.slane %v5857_v42, 1 }
 0x235   :  { %v2041_v23 = vmul.f32 %v2039_v3, %v2014_v35  ;;  %v7297_v3 = vld [vmem:[#allocation104_spill] sm:$0xff] }
 0x236   :  { %4831 = vrcp.f32 %v1960_v58  ;;  %v1987_v39 = vand.u32 2147483648, %v1960_v58  ;;  %vm1981_vm12 = vweird.f32 %v1960_v58 }
 0x237   :  { %v5867_v62 = vadd.f32 %v4828_v6, %v2041_v23 }
 0x239   :  { %v2045_v29 = vpack.c.bf16 %v5867_v62, %v5867_v62 }
 0x23b   :  { %2055 = vmatmul.bf16.vlgmr.msrb.gmra.mxu0 %v2045_v29  ;;  %2081 = vmatmul.bf16.vlgmr.msra.gmra.mxu2 %v2045_v29  ;;  %v1895_v37 = vpop.f32.mrf.mxu3 }
 0x23c   :  { %v1896_v43 = vadd.f32 %v1895_v37, %v1882_v54  ;;  %2151 = vmatpush.bf16.msrb.mxu0 %v7291_v31  ;;  %2177 = vmatpush.bf16.msra.mxu2 %v5645_v49  ;;  %v4832_v33 = vpop.eup %4831  ;;  %v1985_v37 = vand.u32 2147483647, %v1960_v58 }
 0x23d   :  { %v1977_v60 = vmul.f32 %v4832_v33, %v1960_v58  ;;  %vm1982_vm11 = vweird.f32 %v4832_v33 }
 0x23e   :  { %v1992_v51 = vadd.f32 %v1896_v43, %v638_v56  ;;  %vm1983_vm13 = vmor %vm1981_vm12, %vm1982_vm11  ;;  %v229_v43 = vperm.slane %v5834_v0, 5  ;;  %vm1986_vm14 = vcmp.eq.f32.partialorder %v1985_v37, 8.507059e+37 }
 0x23f   :  { %v1978_v38 = vsub.f32 1.0, %v1977_v60  ;;  %v7300_v60 = vld [vmem:[#allocation10_spill] sm:$0xff] }
 0x240   :  { %v1934_v4 = vpop.f32.mrf.mxu2  ;;  %v4527_v17 = vmul.f32 -1.442695, %v1992_v51  ;;  %2152 = vmatpush.bf16.msrb.mxu0 %v7292_v50  ;;  %2178 = vmatpush.bf16.msra.mxu2 %v5659_v41 }
 0x241   :  { %v1979_v6 = vmul.f32 %v4832_v33, %v1978_v38  ;;  %v664_v38 = vadd.f32 %v7300_v60, %v229_v43  ;;  %v7305_v60 = vld [vmem:[#allocation84_spill] sm:$0xff] }
 0x242   :  { %4833 = vpow2.f32 %v4527_v17 }
 0x243   :  { %v1897_v13 = vpop.f32.mrf.mxu3  ;;  %v1980_v35 = vadd.f32 %v4832_v33, %v1979_v6 }
 0x244   :  { %2153 = vmatpush.bf16.msrb.mxu0 %v7293_v9  ;;  %2179 = vmatpush.bf16.msra.mxu2 %v5676_v14  ;;  %v7299_v13 = vld [vmem:[#allocation15_spill] sm:$0xff] }
 0x245   :  { %v1984_v17 = vsel %vm1983_vm13, %v4832_v33, %v1980_v35 }
 0x248   :  { %v1936_v54 = vpop.f32.mrf.mxu2  ;;  %v4834_v53 = vpop.eup %4833  ;;  %2154 = vmatpush.bf16.msrb.mxu0 %v7294_v47  ;;  %2180 = vmatpush.bf16.msra.mxu2 %v5686_v20 }
 0x249   :  { %v2000_v44 = vadd.f32 1.0, %v4834_v53  ;;  %v1988_v53 = vor.u32 1.1754944e-38, %v1987_v39 }
 0x24b   :  { %2107 = vmatmul.bf16.vlgmr.msra.gmra.mxu0 %v2045_v29  ;;  %2133 = vmatmul.bf16.vlgmr.msrb.gmra.mxu2 %v2045_v29  ;;  %4835 = vrcp.f32 %v2000_v44  ;;  %v1989_v58 = vsel %vm1986_vm14, %v1988_v53, %v1984_v17  ;;  %v2027_v39 = vand.u32 2147483648, %v2000_v44  ;;  %vm2021_vm0 = vweird.f32 %v2000_v44 }
 0x24c   :  { %2155 = vmatpush.bf16.msrb.mxu0 %v7295_v19  ;;  %2181 = vmatpush.bf16.msra.mxu2 %v5700_v32 }
 0x250   :  { %2156 = vmatpush.bf16.msrb.mxu0 %v7296_v36  ;;  %2182 = vmatpush.bf16.msra.mxu2 %v5708_v24 }
 0x251   :  { %v4836_v48 = vpop.eup %4835 }
 0x252   :  { %v2017_v23 = vmul.f32 %v4836_v48, %v2000_v44  ;;  %vm2022_vm15 = vweird.f32 %v4836_v48 }
 0x253   :  { %vm2023_vm1 = vmor %vm2021_vm0, %vm2022_vm15 }
 0x254   :  { %2157 = vmatpush.bf16.msrb.mxu0 %v7297_v3  ;;  %2183 = vmatpush.bf16.msra.mxu2 %v5720_v57  ;;  %v2018_v54 = vsub.f32 1.0, %v2017_v23 }
 0x258   :  { %2158 = vmatpush.bf16.msrb.mxu0 %v7298_v25  ;;  %2184 = vmatpush.bf16.msra.mxu2 %v5730_v8  ;;  %v7301_v8 = vld [vmem:[#allocation17_spill] sm:$0xff] }
 0x25b   :  { %v1947_v56 = vpop.f32.mrf.mxu3  ;;  %2159 = vmatmul.bf16.vlgmr.msrb.gmra.mxu0 %v2045_v29  ;;  %2185 = vmatmul.bf16.vlgmr.msra.gmra.mxu2 %v2045_v29  ;;  %v2025_v29 = vand.u32 2147483647, %v2000_v44 }
 0x25c   :  { %v1948_v51 = vadd.f32 %v1947_v56, %v1934_v4  ;;  %2299 = vmatpush.bf16.msra.mxu0 %v7299_v13  ;;  %2325 = vmatpush.bf16.msrb.mxu2 %v5414_v22  ;;  %v2019_v4 = vmul.f32 %v4836_v48, %v2018_v54  ;;  %v7302_v56 = vld [vmem:[#allocation21_spill] sm:$0xff] }
 0x25d   :  { %vm2026_vm2 = vcmp.eq.f32.partialorder %v2025_v29, 8.507059e+37  ;;  %v7313_v29 = vld [vmem:[#allocation55_spill] sm:$0xff] }
 0x25e   :  { %v2032_v42 = vadd.f32 %v1948_v51, %v5888_v16  ;;  %v2020_v23 = vadd.f32 %v4836_v48, %v2019_v4  ;;  %v2028_v51 = vor.u32 1.1754944e-38, %v2027_v39  ;;  %v7308_v4 = vld [vmem:[#allocation125_spill] sm:$0xff]  ;;  %v7312_v39 = vld [vmem:[#allocation126_spill] sm:$0xff] }
 0x260   :  { %v2034_v6 = vmul.f32 %v2032_v42, %v1989_v58  ;;  %2300 = vmatpush.bf16.msra.mxu0 %v7301_v8  ;;  %2326 = vmatpush.bf16.msrb.mxu2 %v5436_v40  ;;  %v2024_v37 = vsel %vm2023_vm1, %v4836_v48, %v2020_v23  ;;  %v7303_v48 = vld [vmem:[#allocation74_spill] sm:$0xff]  ;;  %v7311_v23 = vld [vmem:[#allocation99_spill] sm:$0xff] }
 0x261   :  { %v2029_v54 = vsel %vm2026_vm2, %v2028_v51, %v2024_v37  ;;  %v7304_v58 = vld [vmem:[#allocation78_spill] sm:$0xff]  ;;  %v7314_v37 = vld [vmem:[#allocation85_spill] sm:$0xff] }
 0x262   :  { %v2036_v33 = vadd.f32 %v2034_v6, %v664_v38  ;;  %v7306_v38 = vld [vmem:[#allocation90_spill] sm:$0xff]  ;;  %v7316_v51 = vld [vmem:[#allocation129_spill] sm:$0xff] }
 0x263   :  { %v1949_v35 = vpop.f32.mrf.mxu3  ;;  %v7307_v6 = vld [vmem:[#allocation94_spill] sm:$0xff] }
 0x264   :  { %4837 = vtanh.f32 %v2036_v33  ;;  %2301 = vmatpush.bf16.msra.mxu0 %v7302_v56  ;;  %2327 = vmatpush.bf16.msrb.mxu2 %v5446_v59  ;;  %v7309_v33 = vld [vmem:[#allocation52_spill] sm:$0xff]  ;;  %v7310_v35 = vld [vmem:[#allocation79_spill] sm:$0xff] }
 0x268   :  { %2302 = vmatpush.bf16.msra.mxu0 %v5400_v63  ;;  %2328 = vmatpush.bf16.msrb.mxu2 %v5465_v26 }
 0x26a   :  { %v4838_v43 = vpop.eup %4837 }
 0x26b   :  { %v2040_v17 = vsub.f32 0.0, %v4838_v43 }
 0x26c   :  { %2303 = vmatpush.bf16.msra.mxu0 %v5410_v12  ;;  %2329 = vmatpush.bf16.msrb.mxu2 %v5481_v52  ;;  %v7355_v52 = vld [vmem:[#allocation72_spill] sm:$0xff] }
 0x26d   :  { %v2042_v53 = vmul.f32 %v2040_v17, %v2029_v54  ;;  %v7317_v17 = vld [vmem:[#allocation61_spill] sm:$0xff]  ;;  %v7318_v54 = vld [vmem:[#allocation91_spill] sm:$0xff] }
 0x26f   :  { %v5905_v42 = vadd.f32 %v4838_v43, %v2042_v53  ;;  %v7315_v43 = vld [vmem:[#allocation105_spill] sm:$0xff]  ;;  %v7319_v53 = vld [vmem:[#allocation110_spill] sm:$0xff] }
 0x270   :  { %2304 = vmatpush.bf16.msra.mxu0 %v5427_v27  ;;  %2330 = vmatpush.bf16.msrb.mxu2 %v5494_v10  ;;  %v7341_v10 = vld [vmem:[#allocation40_spill] sm:$0xff]  ;;  %v7342_v27 = vld [vmem:[#allocation97_spill] sm:$0xff] }
 0x271   :  { %v2046_v44 = vpack.c.bf16 %v5905_v42, %v5905_v42 }
 0x273   :  { %2068 = vmatmul.bf16.vlgmr.msrb.gmra.mxu1 %v2046_v44  ;;  %2094 = vmatmul.bf16.vlgmr.msrb.gmra.mxu3 %v2046_v44 }
 0x274   :  { %2164 = vmatpush.bf16.msrb.mxu1 %v7303_v48  ;;  %2190 = vmatpush.bf16.msrb.mxu3 %v5725_v7 }
 0x275   :  { %2305 = vmatpush.bf16.msra.mxu0 %v5440_v45  ;;  %2331 = vmatpush.bf16.msrb.mxu2 %v5503_v61  ;;  %v7337_v61 = vld [vmem:[#allocation35_spill] sm:$0xff]  ;;  %v7340_v45 = vld [vmem:[#allocation96_spill] sm:$0xff] }
 0x278   :  { %2165 = vmatpush.bf16.msrb.mxu1 %v7304_v58  ;;  %2191 = vmatpush.bf16.msrb.mxu3 %v5734_v46 }
 0x279   :  { %2306 = vmatpush.bf16.msra.mxu0 %v5450_v1  ;;  %2332 = vmatpush.bf16.msrb.mxu2 %v5518_v18  ;;  %v7332_v18 = vld [vmem:[#allocation75_spill] sm:$0xff]  ;;  %v7336_v1 = vld [vmem:[#allocation86_spill] sm:$0xff] }
 0x27c   :  { %2166 = vmatpush.bf16.msrb.mxu1 %v7305_v60  ;;  %2192 = vmatpush.bf16.msrb.mxu3 %v5746_v34 }
 0x27d   :  { %2351 = vmatpush.bf16.msrb.mxu0 %v5454_v5  ;;  %2377 = vmatpush.bf16.msra.mxu2 %v5528_v11  ;;  %v7330_v11 = vld [vmem:[#allocation70_spill] sm:$0xff]  ;;  %v7331_v5 = vld [vmem:[#allocation24_spill] sm:$0xff] }
 0x280   :  { %2167 = vmatpush.bf16.msrb.mxu1 %v7306_v38  ;;  %2193 = vmatpush.bf16.msrb.mxu3 %v5757_v21 }
 0x281   :  { %2352 = vmatpush.bf16.msrb.mxu0 %v5469_v30  ;;  %2378 = vmatpush.bf16.msra.mxu2 %v5545_v15  ;;  %v7326_v15 = vld [vmem:[#allocation64_spill] sm:$0xff]  ;;  %v7329_v30 = vld [vmem:[#allocation22_spill] sm:$0xff] }
 0x283   :  { %2120 = vmatmul.bf16.vlgmr.msra.gmra.mxu1 %v2046_v44  ;;  %2146 = vmatmul.bf16.vlgmr.msra.gmra.mxu3 %v2046_v44 }
 0x284   :  { %2168 = vmatpush.bf16.msrb.mxu1 %v7307_v6  ;;  %2194 = vmatpush.bf16.msrb.mxu3 %v7308_v4 }
 0x285   :  { %2353 = vmatpush.bf16.msrb.mxu0 %v5489_v55  ;;  %2379 = vmatpush.bf16.msra.mxu2 %v7272_v2  ;;  %v7322_v2 = vld [vmem:[#allocation57_spill] sm:$0xff]  ;;  %v7323_v55 = vld [vmem:[#allocation67_spill] sm:$0xff] }
 0x288   :  { %2169 = vmatpush.bf16.msrb.mxu1 %v7311_v23  ;;  %2195 = vmatpush.bf16.msrb.mxu3 %v7312_v39 }
 0x289   :  { %2354 = vmatpush.bf16.msrb.mxu0 %v7309_v33  ;;  %2380 = vmatpush.bf16.msra.mxu2 %v7310_v35  ;;  %v7320_v33 = vld [vmem:[#allocation132_spill] sm:$0xff] }
 0x28a   :  { %v7321_v35 = vld [vmem:[#allocation16_spill] sm:$0xff] }
 0x28c   :  { %2170 = vmatpush.bf16.msrb.mxu1 %v7315_v43  ;;  %2196 = vmatpush.bf16.msrb.mxu3 %v7316_v51 }
 0x28d   :  { %2355 = vmatpush.bf16.msrb.mxu0 %v7313_v29  ;;  %2381 = vmatpush.bf16.msra.mxu2 %v7314_v37  ;;  %v7324_v29 = vld [vmem:[#allocation95_spill] sm:$0xff]  ;;  %v7325_v37 = vld [vmem:[#allocation18_spill] sm:$0xff] }
 0x290   :  { %2171 = vmatpush.bf16.msrb.mxu1 %v7319_v53  ;;  %2197 = vmatpush.bf16.msrb.mxu3 %v7320_v33 }
 0x291   :  { %2356 = vmatpush.bf16.msrb.mxu0 %v7317_v17  ;;  %2382 = vmatpush.bf16.msra.mxu2 %v7318_v54  ;;  %v7327_v17 = vld [vmem:[#allocation71_spill] sm:$0xff]  ;;  %v7328_v54 = vld [vmem:[#allocation100_spill] sm:$0xff] }
 0x293   :  { %2172 = vmatmul.bf16.vlgmr.msrb.gmra.mxu1 %v2046_v44  ;;  %2198 = vmatmul.bf16.vlgmr.msrb.gmra.mxu3 %v2046_v44  ;;  %v7335_v44 = vld [vmem:[#allocation30_spill] sm:$0xff] }
 0x294   :  { %2312 = vmatpush.bf16.msra.mxu1 %v7321_v35  ;;  %2338 = vmatpush.bf16.msra.mxu3 %v7322_v2 }
 0x295   :  { %2357 = vmatpush.bf16.msrb.mxu0 %v7323_v55  ;;  %2383 = vmatpush.bf16.msra.mxu2 %v7324_v29  ;;  %v7333_v55 = vld [vmem:[#allocation28_spill] sm:$0xff]  ;;  %v7334_v29 = vld [vmem:[#allocation82_spill] sm:$0xff] }
 0x298   :  { %2313 = vmatpush.bf16.msra.mxu1 %v7325_v37  ;;  %2339 = vmatpush.bf16.msra.mxu3 %v7326_v15  ;;  %v7358_v37 = vld [vmem:[#allocation47_spill] sm:$0xff] }
 0x299   :  { %2358 = vmatpush.bf16.msrb.mxu0 %v7327_v17  ;;  %2384 = vmatpush.bf16.msra.mxu2 %v7328_v54  ;;  %v7338_v17 = vld [vmem:[#allocation92_spill] sm:$0xff]  ;;  %v7339_v54 = vld [vmem:[#allocation38_spill] sm:$0xff] }
 0x29c   :  { %2314 = vmatpush.bf16.msra.mxu1 %v7329_v30  ;;  %2340 = vmatpush.bf16.msra.mxu3 %v7330_v11 }
 0x2a0   :  { %2315 = vmatpush.bf16.msra.mxu1 %v7331_v5  ;;  %2341 = vmatpush.bf16.msra.mxu3 %v7332_v18  ;;  %v7343_v18 = vld [vmem:[#allocation45_spill] sm:$0xff]  ;;  %v7351_v5 = vld [vmem:[#allocation62_spill] sm:$0xff] }
 0x2a4   :  { %2316 = vmatpush.bf16.msra.mxu1 %v7333_v55  ;;  %2342 = vmatpush.bf16.msra.mxu3 %v7334_v29  ;;  %v7344_v55 = vld [vmem:[#allocation103_spill] sm:$0xff]  ;;  %v7345_v29 = vld [vmem:[#allocation50_spill] sm:$0xff] }
 0x2a8   :  { %2317 = vmatpush.bf16.msra.mxu1 %v7335_v44  ;;  %2343 = vmatpush.bf16.msra.mxu3 %v7336_v1  ;;  %v7346_v44 = vld [vmem:[#allocation108_spill] sm:$0xff]  ;;  %v7347_v1 = vld [vmem:[#allocation53_spill] sm:$0xff] }
 0x2ac   :  { %2318 = vmatpush.bf16.msra.mxu1 %v7337_v61  ;;  %2344 = vmatpush.bf16.msra.mxu3 %v7338_v17  ;;  %v7348_v61 = vld [vmem:[#allocation111_spill] sm:$0xff] }
 0x2b0   :  { %2319 = vmatpush.bf16.msra.mxu1 %v7339_v54  ;;  %2345 = vmatpush.bf16.msra.mxu3 %v7340_v45  ;;  %v7349_v54 = vld [vmem:[#allocation56_spill] sm:$0xff] }
 0x2b1   :  { %v7350_v45 = vld [vmem:[#allocation112_spill] sm:$0xff] }
 0x2b4   :  { %2364 = vmatpush.bf16.msrb.mxu1 %v7341_v10  ;;  %2390 = vmatpush.bf16.msrb.mxu3 %v7342_v27  ;;  %v7352_v27 = vld [vmem:[#allocation115_spill] sm:$0xff] }
 0x2b8   :  { %2365 = vmatpush.bf16.msrb.mxu1 %v7343_v18  ;;  %2391 = vmatpush.bf16.msrb.mxu3 %v7344_v55  ;;  %v2056_v17 = vpop.f32.mrf.mxu0  ;;  %v7353_v55 = vld [vmem:[#allocation68_spill] sm:$0xff] }
 0x2bc   :  { %2366 = vmatpush.bf16.msrb.mxu1 %v7345_v29  ;;  %2392 = vmatpush.bf16.msrb.mxu3 %v7346_v44  ;;  %v7354_v29 = vld [vmem:[#allocation118_spill] sm:$0xff] }
 0x2be   :  { %v2082_v10 = vpop.f32.mrf.mxu2 }
 0x2c0   :  { %2367 = vmatpush.bf16.msrb.mxu1 %v7347_v1  ;;  %2393 = vmatpush.bf16.msrb.mxu3 %v7348_v61  ;;  %v2058_v18 = vpop.f32.mrf.mxu0  ;;  %v7356_v1 = vld [vmem:[#allocation119_spill] sm:$0xff] }
 0x2c1   :  { %v230_v18 = vperm.slane %v5834_v0, 6 }
 0x2c4   :  { %2368 = vmatpush.bf16.msrb.mxu1 %v7349_v54  ;;  %2394 = vmatpush.bf16.msrb.mxu3 %v7350_v45 }
 0x2c6   :  { %v2084_v44 = vpop.f32.mrf.mxu2 }
 0x2c7   :  { %v231_v44 = vperm.slane %v5834_v0, 7  ;;  %v7359_v0 = vld [vmem:[#allocation13_spill] sm:$0xff] }
 0x2c8   :  { %2369 = vmatpush.bf16.msrb.mxu1 %v7351_v5  ;;  %2395 = vmatpush.bf16.msrb.mxu3 %v7352_v27  ;;  %v2108_v61 = vpop.f32.mrf.mxu0 }
 0x2c9   :  { %v690_v59 = vadd.f32 %v7358_v37, %v231_v44  ;;  %v7360_v44 = vld [vmem:[#allocation14_spill] sm:$0xff] }
 0x2cc   :  { %2370 = vmatpush.bf16.msrb.mxu1 %v7353_v55  ;;  %2396 = vmatpush.bf16.msrb.mxu3 %v7354_v29  ;;  %v7357_v55 = vld [vmem:[#allocation20_spill] sm:$0xff] }
 0x2cd   :  { %v677_v63 = vadd.f32 %v7357_v55, %v230_v18 }
 0x2ce   :  { %v2134_v12 = vpop.f32.mrf.mxu2 }
 0x2d0   :  { %2371 = vmatpush.bf16.msrb.mxu1 %v7355_v52  ;;  %2397 = vmatpush.bf16.msrb.mxu3 %v7356_v1  ;;  %v2110_v54 = vpop.f32.mrf.mxu0 }
 0x2d6   :  { %v2136_v11 = vpop.f32.mrf.mxu2 }
 0x2d8   :  { %v2160_v45 = vpop.f32.mrf.mxu0 }
 0x2de   :  { %v5979_v30 = vpop.f32.mrf.mxu2 }
 0x2e0   :  { %v2162_v5 = vpop.f32.mrf.mxu0 }
 0x2e1   :  { %v5988_v5 = vld [vmem:[%s6947_s4 + $0x8] sm:$0xff] }
 0x2e6   :  { %v2188_v26 = vpop.f32.mrf.mxu2 }
 0x2f0   :  { %v2069_v27 = vpop.f32.mrf.mxu1 }
 0x2f1   :  { %v2070_v29 = vadd.f32 %v2069_v27, %v2056_v17  ;;  %v232_v27 = vperm.slane %v5988_v5, 0 }
 0x2f3   :  { %v2203_v52 = vadd.f32 %v2070_v29, %v677_v63  ;;  %v703_v29 = vadd.f32 %v7359_v0, %v232_v27 }
 0x2f5   :  { %v4528_v15 = vmul.f32 -1.442695, %v2203_v52 }
 0x2f6   :  { %v2095_v1 = vpop.f32.mrf.mxu3 }
 0x2f7   :  { %4839 = vpow2.f32 %v4528_v15  ;;  %v2096_v11 = vadd.f32 %v2095_v1, %v2082_v10 }
 0x2f8   :  { %v2071_v54 = vpop.f32.mrf.mxu1 }
 0x2f9   :  { %v2204_v56 = vadd.f32 %v2096_v11, %v690_v59  ;;  %v233_v59 = vperm.slane %v5988_v5, 1 }
 0x2fb   :  { %v4529_v26 = vmul.f32 -1.442695, %v2204_v56  ;;  %v716_v11 = vadd.f32 %v7360_v44, %v233_v59 }
 0x2fd   :  { %v4840_v2 = vpop.eup %4839  ;;  %4841 = vpow2.f32 %v4529_v26 }
 0x2fe   :  { %v2211_v55 = vadd.f32 1.0, %v4840_v2  ;;  %v2097_v63 = vpop.f32.mrf.mxu3 }
 0x300   :  { %4843 = vrcp.f32 %v2211_v55  ;;  %v2121_v52 = vpop.f32.mrf.mxu1  ;;  %vm2218_vm4 = vweird.f32 %v2211_v55  ;;  %v2222_v53 = vand.u32 2147483647, %v2211_v55 }
 0x301   :  { %v2122_v15 = vadd.f32 %v2121_v52, %v2108_v61 }
 0x302   :  { %vm2223_vm6 = vcmp.eq.f32.partialorder %v2222_v53, 8.507059e+37 }
 0x303   :  { %v4842_v1 = vpop.eup %4841  ;;  %v2243_v10 = vadd.f32 %v2122_v15, %v703_v29 }
 0x304   :  { %v2212_v37 = vadd.f32 1.0, %v4842_v1 }
 0x305   :  { %v4530_v17 = vmul.f32 -1.442695, %v2243_v10  ;;  %v2224_v10 = vand.u32 2147483648, %v2211_v55 }
 0x306   :  { %v4844_v18 = vpop.eup %4843  ;;  %4845 = vrcp.f32 %v2212_v37  ;;  %v2147_v56 = vpop.f32.mrf.mxu3  ;;  %vm2233_vm8 = vweird.f32 %v2212_v37 }
 0x307   :  { %4847 = vpow2.f32 %v4530_v17  ;;  %v2148_v54 = vadd.f32 %v2147_v56, %v2134_v12  ;;  %v2214_v2 = vmul.f32 %v4844_v18, %v2211_v55  ;;  %vm2219_vm3 = vweird.f32 %v4844_v18  ;;  %v7361_v55 = vld [vmem:[#allocation32_spill] sm:$0xff] }
 0x308   :  { %v2123_v26 = vpop.f32.mrf.mxu1  ;;  %vm2220_vm5 = vmor %vm2218_vm4, %vm2219_vm3  ;;  %v234_v17 = vperm.slane %v5988_v5, 2 }
 0x309   :  { %v2244_v63 = vadd.f32 %v2148_v54, %v716_v11  ;;  %v2215_v35 = vsub.f32 1.0, %v2214_v2  ;;  %v2225_v11 = vor.u32 1.1754944e-38, %v2224_v10 }
 0x30b   :  { %v4531_v33 = vmul.f32 -1.442695, %v2244_v63  ;;  %v2216_v27 = vmul.f32 %v4844_v18, %v2215_v35 }
 0x30c   :  { %v4846_v61 = vpop.eup %4845 }
 0x30d   :  { %v4848_v52 = vpop.eup %4847  ;;  %4849 = vpow2.f32 %v4531_v33  ;;  %v2217_v0 = vadd.f32 %v4844_v18, %v2216_v27  ;;  %v2229_v29 = vmul.f32 %v4846_v61, %v2212_v37  ;;  %vm2234_vm7 = vweird.f32 %v4846_v61 }
 0x30e   :  { %v2251_v15 = vadd.f32 1.0, %v4848_v52  ;;  %v2149_v1 = vpop.f32.mrf.mxu3  ;;  %v2239_v27 = vand.u32 2147483648, %v2212_v37  ;;  %v729_v52 = vadd.f32 %v7361_v55, %v234_v17  ;;  %vm2235_vm9 = vmor %vm2233_vm8, %vm2234_vm7 }
 0x30f   :  { %v2230_v59 = vsub.f32 1.0, %v2229_v29  ;;  %v2221_v44 = vsel %vm2220_vm5, %v4844_v18, %v2217_v0  ;;  %v2237_v1 = vand.u32 2147483647, %v2212_v37 }
 0x310   :  { %4851 = vrcp.f32 %v2251_v15  ;;  %v2173_v12 = vpop.f32.mrf.mxu1  ;;  %v2226_v63 = vsel %vm2223_vm6, %v2225_v11, %v2221_v44  ;;  %v2264_v11 = vand.u32 2147483648, %v2251_v15  ;;  %vm2258_vm12 = vweird.f32 %v2251_v15 }
 0x311   :  { %v2174_v56 = vadd.f32 %v2173_v12, %v2160_v45  ;;  %v2231_v35 = vmul.f32 %v4846_v61, %v2230_v59  ;;  %v235_v45 = vperm.slane %v5988_v5, 3  ;;  %v2240_v12 = vor.u32 1.1754944e-38, %v2239_v27 }
 0x312   :  { %vm2238_vm10 = vcmp.eq.f32.partialorder %v2237_v1, 8.507059e+37 }
 0x313   :  { %v4850_v54 = vpop.eup %4849  ;;  %v2283_v33 = vadd.f32 %v2174_v56, %v5860_v28  ;;  %v2232_v2 = vadd.f32 %v4846_v61, %v2231_v35  ;;  %v7362_v35 = vld [vmem:[#allocation65_spill] sm:$0xff] }
 0x314   :  { %v2252_v26 = vadd.f32 1.0, %v4850_v54  ;;  %v742_v37 = vadd.f32 %v7362_v35, %v235_v45 }
 0x315   :  { %v2285_v29 = vmul.f32 %v2283_v33, %v2226_v63  ;;  %v2236_v59 = vsel %vm2235_vm9, %v4846_v61, %v2232_v2  ;;  %v2262_v63 = vand.u32 2147483647, %v2251_v15  ;;  %v2265_v2 = vor.u32 1.1754944e-38, %v2264_v11 }
 0x316   :  { %v4852_v40 = vpop.eup %4851  ;;  %4853 = vrcp.f32 %v2252_v26  ;;  %v2199_v18 = vpop.f32.mrf.mxu3  ;;  %v2241_v54 = vsel %vm2238_vm10, %v2240_v12, %v2236_v59  ;;  %v2279_v45 = vand.u32 2147483648, %v2252_v26  ;;  %v2277_v59 = vand.u32 2147483647, %v2252_v26 }
 0x317   :  { %v2254_v0 = vmul.f32 %v4852_v40, %v2251_v15  ;;  %v2287_v53 = vadd.f32 %v2285_v29, %v729_v52  ;;  %v2200_v10 = vadd.f32 %v2199_v18, %v5979_v30  ;;  %vm2259_vm11 = vweird.f32 %v4852_v40 }
 0x318   :  { %v2175_v56 = vpop.f32.mrf.mxu1  ;;  %vm2260_vm13 = vmor %vm2258_vm12, %vm2259_vm11  ;;  %vm2263_vm14 = vcmp.eq.f32.partialorder %v2262_v63, 8.507059e+37  ;;  %vm2273_vm0 = vweird.f32 %v2252_v26  ;;  %v2280_v15 = vor.u32 1.1754944e-38, %v2279_v45  ;;  %vm2278_vm2 = vcmp.eq.f32.partialorder %v2277_v59, 8.507059e+37  ;;  %v7366_v63 = vld [vmem:[#allocation132_spill] sm:$0xff]  ;;  %v7376_v45 = vld [vmem:[#allocation70_spill] sm:$0xff] }
 0x319   :  { %v2255_v44 = vsub.f32 1.0, %v2254_v0  ;;  %4855 = vtanh.f32 %v2287_v53  ;;  %v2284_v17 = vadd.f32 %v2200_v10, %v5888_v16  ;;  %v7380_v59 = vld [vmem:[#allocation75_spill] sm:$0xff] }
 0x31b   :  { %v2256_v33 = vmul.f32 %v4852_v40, %v2255_v44  ;;  %v2286_v55 = vmul.f32 %v2284_v17, %v2241_v54 }
 0x31c   :  { %v4854_v28 = vpop.eup %4853 }
 0x31d   :  { %v2257_v52 = vadd.f32 %v4852_v40, %v2256_v33  ;;  %v2269_v30 = vmul.f32 %v4854_v28, %v2252_v26  ;;  %v2288_v61 = vadd.f32 %v2286_v55, %v742_v37  ;;  %vm2274_vm15 = vweird.f32 %v4854_v28  ;;  %v7365_v33 = vld [vmem:[#allocation110_spill] sm:$0xff]  ;;  %v7367_v55 = vld [vmem:[#allocation16_spill] sm:$0xff] }
 0x31e   :  { %v2201_v27 = vpop.f32.mrf.mxu3  ;;  %vm2275_vm1 = vmor %vm2273_vm0, %vm2274_vm15 }
 0x31f   :  { %v4856_v29 = vpop.eup %4855  ;;  %v2270_v1 = vsub.f32 1.0, %v2269_v30  ;;  %v2261_v18 = vsel %vm2260_vm13, %v4852_v40, %v2257_v52  ;;  %4857 = vtanh.f32 %v2288_v61  ;;  %v7368_v52 = vld [vmem:[#allocation57_spill] sm:$0xff]  ;;  %v7370_v61 = vld [vmem:[#allocation36_spill] sm:$0xff] }
 0x320   :  { %v2266_v0 = vsel %vm2263_vm14, %v2265_v2, %v2261_v18  ;;  %v2291_v53 = vsub.f32 %v5867_v62, %v4856_v29  ;;  %v7369_v30 = vld [vmem:[#allocation21_spill] sm:$0xff]  ;;  %v7371_v2 = vld [vmem:[#allocation18_spill] sm:$0xff]  ;;  %v7372_v27 = vld [vmem:[#allocation64_spill] sm:$0xff] }
 0x321   :  { %v2271_v10 = vmul.f32 %v4854_v28, %v2270_v1  ;;  %v7374_v1 = vld [vmem:[#allocation43_spill] sm:$0xff]  ;;  %v7375_v18 = vld [vmem:[#allocation22_spill] sm:$0xff] }
 0x322   :  { %v2293_v12 = vmul.f32 %v2291_v53, %v2266_v0  ;;  %v7377_v0 = vld [vmem:[#allocation27_spill] sm:$0xff]  ;;  %v7378_v53 = vld [vmem:[#allocation46_spill] sm:$0xff] }
 0x323   :  { %v2272_v56 = vadd.f32 %v4854_v28, %v2271_v10  ;;  %v7379_v10 = vld [vmem:[#allocation24_spill] sm:$0xff] }
 0x324   :  { %v6002_v44 = vadd.f32 %v4856_v29, %v2293_v12  ;;  %v7373_v29 = vld [vmem:[#allocation23_spill] sm:$0xff]  ;;  %v7381_v12 = vld [vmem:[#allocation29_spill] sm:$0xff] }
 0x325   :  { %v4858_v17 = vpop.eup %4857  ;;  %v2276_v35 = vsel %vm2275_vm1, %v4854_v28, %v2272_v56  ;;  %v7363_v28 = vld [vmem:[#allocation120_spill] sm:$0xff]  ;;  %v7382_v56 = vld [vmem:[#allocation51_spill] sm:$0xff] }
 0x326   :  { %v2297_v40 = vpack.c.bf16 %v6002_v44, %v6002_v44  ;;  %v2281_v37 = vsel %vm2278_vm2, %v2280_v15, %v2276_v35  ;;  %v2292_v11 = vsub.f32 %v5905_v42, %v4858_v17  ;;  %v7364_v42 = vld [vmem:[#allocation33_spill] sm:$0xff]  ;;  %v7383_v15 = vld [vmem:[#allocation28_spill] sm:$0xff]  ;;  %v7385_v35 = vld [vmem:[#allocation34_spill] sm:$0xff] }
 0x328   :  { %v2294_v62 = vmul.f32 %v2292_v11, %v2281_v37  ;;  %2307 = vmatmul.bf16.vlgmr.msra.gmra.mxu0 %v2297_v40  ;;  %2333 = vmatmul.bf16.vlgmr.msrb.gmra.mxu2 %v2297_v40  ;;  %v7387_v37 = vld [vmem:[#allocation30_spill] sm:$0xff] }
 0x329   :  { %2403 = vmatpush.bf16.msra.mxu0 %v7291_v31  ;;  %2429 = vmatpush.bf16.msrb.mxu2 %v5645_v49  ;;  %v7388_v11 = vld [vmem:[#allocation86_spill] sm:$0xff] }
 0x32a   :  { %v6009_v26 = vadd.f32 %v4858_v17, %v2294_v62  ;;  %v7384_v17 = vld [vmem:[#allocation82_spill] sm:$0xff]  ;;  %v7389_v62 = vld [vmem:[#allocation37_spill] sm:$0xff] }
 0x32c   :  { %v2298_v54 = vpack.c.bf16 %v6009_v26, %v6009_v26 }
 0x32d   :  { %2404 = vmatpush.bf16.msra.mxu0 %v7292_v50  ;;  %2430 = vmatpush.bf16.msrb.mxu2 %v5659_v41 }
 0x32e   :  { %2320 = vmatmul.bf16.vlgmr.msra.gmra.mxu1 %v2298_v54  ;;  %2346 = vmatmul.bf16.vlgmr.msra.gmra.mxu3 %v2298_v54 }
 0x32f   :  { %2416 = vmatpush.bf16.msra.mxu1 %v7303_v48  ;;  %2442 = vmatpush.bf16.msra.mxu3 %v5725_v7 }
 0x331   :  { %2405 = vmatpush.bf16.msra.mxu0 %v7293_v9  ;;  %2431 = vmatpush.bf16.msrb.mxu2 %v5676_v14 }
 0x333   :  { %2417 = vmatpush.bf16.msra.mxu1 %v7304_v58  ;;  %2443 = vmatpush.bf16.msra.mxu3 %v5734_v46 }
 0x335   :  { %2406 = vmatpush.bf16.msra.mxu0 %v7294_v47  ;;  %2432 = vmatpush.bf16.msrb.mxu2 %v5686_v20 }
 0x337   :  { %2418 = vmatpush.bf16.msra.mxu1 %v7305_v60  ;;  %2444 = vmatpush.bf16.msra.mxu3 %v5746_v34 }
 0x338   :  { %2359 = vmatmul.bf16.vlgmr.msrb.gmra.mxu0 %v2297_v40  ;;  %2385 = vmatmul.bf16.vlgmr.msra.gmra.mxu2 %v2297_v40 }
 0x339   :  { %2407 = vmatpush.bf16.msra.mxu0 %v7295_v19  ;;  %2433 = vmatpush.bf16.msrb.mxu2 %v5700_v32 }
 0x33b   :  { %2419 = vmatpush.bf16.msra.mxu1 %v7306_v38  ;;  %2445 = vmatpush.bf16.msra.mxu3 %v5757_v21 }
 0x33d   :  { %2408 = vmatpush.bf16.msra.mxu0 %v7296_v36  ;;  %2434 = vmatpush.bf16.msrb.mxu2 %v5708_v24 }
 0x33e   :  { %2372 = vmatmul.bf16.vlgmr.msrb.gmra.mxu1 %v2298_v54  ;;  %2398 = vmatmul.bf16.vlgmr.msrb.gmra.mxu3 %v2298_v54 }
 0x33f   :  { %2420 = vmatpush.bf16.msra.mxu1 %v7307_v6  ;;  %2446 = vmatpush.bf16.msra.mxu3 %v7308_v4 }
 0x341   :  { %2409 = vmatpush.bf16.msra.mxu0 %v7297_v3  ;;  %2435 = vmatpush.bf16.msrb.mxu2 %v5720_v57 }
 0x343   :  { %2421 = vmatpush.bf16.msra.mxu1 %v7311_v23  ;;  %2447 = vmatpush.bf16.msra.mxu3 %v7312_v39 }
 0x345   :  { %2410 = vmatpush.bf16.msra.mxu0 %v7298_v25  ;;  %2436 = vmatpush.bf16.msrb.mxu2 %v7363_v28 }
 0x347   :  { %2422 = vmatpush.bf16.msra.mxu1 %v7315_v43  ;;  %2448 = vmatpush.bf16.msra.mxu3 %v7316_v51 }
 0x348   :  { %2411 = vmatmul.bf16.vlgmr.msra.gmra.mxu0 %v2297_v40  ;;  %2437 = vmatmul.bf16.vlgmr.msrb.gmra.mxu2 %v2297_v40  ;;  %v7386_v40 = vld [vmem:[#allocation54_spill] sm:$0xff] }
 0x349   :  { %2551 = vmatpush.bf16.msrb.mxu0 %v7299_v13  ;;  %2577 = vmatpush.bf16.msra.mxu2 %v5414_v22 }
 0x34b   :  { %2423 = vmatpush.bf16.msra.mxu1 %v7365_v33  ;;  %2449 = vmatpush.bf16.msra.mxu3 %v7366_v63  ;;  %v7433_v63 = vld [vmem:[#allocation41_spill] sm:$0xff] }
 0x34d   :  { %2552 = vmatpush.bf16.msrb.mxu0 %v7301_v8  ;;  %2578 = vmatpush.bf16.msra.mxu2 %v7364_v42 }
 0x34e   :  { %2424 = vmatmul.bf16.vlgmr.msra.gmra.mxu1 %v2298_v54  ;;  %2450 = vmatmul.bf16.vlgmr.msra.gmra.mxu3 %v2298_v54  ;;  %v7390_v54 = vld [vmem:[#allocation60_spill] sm:$0xff] }
 0x34f   :  { %2564 = vmatpush.bf16.msrb.mxu1 %v7367_v55  ;;  %2590 = vmatpush.bf16.msrb.mxu3 %v7368_v52  ;;  %v7432_v52 = vld [vmem:[#allocation139_spill] sm:$0xff] }
 0x351   :  { %2553 = vmatpush.bf16.msrb.mxu0 %v7369_v30  ;;  %2579 = vmatpush.bf16.msra.mxu2 %v7370_v61  ;;  %v238_v30 = vperm.slane %v5988_v5, 6 }
 0x353   :  { %2565 = vmatpush.bf16.msrb.mxu1 %v7371_v2  ;;  %2591 = vmatpush.bf16.msrb.mxu3 %v7372_v27 }
 0x355   :  { %2554 = vmatpush.bf16.msrb.mxu0 %v7373_v29  ;;  %2580 = vmatpush.bf16.msra.mxu2 %v7374_v1 }
 0x357   :  { %2566 = vmatpush.bf16.msrb.mxu1 %v7375_v18  ;;  %2592 = vmatpush.bf16.msrb.mxu3 %v7376_v45  ;;  %v7428_v18 = vld [vmem:[#allocation26_spill] sm:$0xff] }
 0x359   :  { %2555 = vmatpush.bf16.msrb.mxu0 %v7377_v0  ;;  %2581 = vmatpush.bf16.msra.mxu2 %v7378_v53 }
 0x35b   :  { %2567 = vmatpush.bf16.msrb.mxu1 %v7379_v10  ;;  %2593 = vmatpush.bf16.msrb.mxu3 %v7380_v59  ;;  %v7391_v59 = vld [vmem:[#allocation39_spill] sm:$0xff] }
 0x35d   :  { %2556 = vmatpush.bf16.msrb.mxu0 %v7381_v12  ;;  %2582 = vmatpush.bf16.msra.mxu2 %v7382_v56  ;;  %v7392_v12 = vld [vmem:[#allocation63_spill] sm:$0xff] }
 0x35e   :  { %v7393_v56 = vld [vmem:[#allocation35_spill] sm:$0xff] }
 0x35f   :  { %2568 = vmatpush.bf16.msrb.mxu1 %v7383_v15  ;;  %2594 = vmatpush.bf16.msrb.mxu3 %v7384_v17  ;;  %v7394_v15 = vld [vmem:[#allocation92_spill] sm:$0xff] }
 0x360   :  { %v7395_v17 = vld [vmem:[#allocation44_spill] sm:$0xff] }
 0x361   :  { %2557 = vmatpush.bf16.msrb.mxu0 %v7385_v35  ;;  %2583 = vmatpush.bf16.msra.mxu2 %v7386_v40  ;;  %v7396_v35 = vld [vmem:[#allocation69_spill] sm:$0xff]  ;;  %v7397_v40 = vld [vmem:[#allocation38_spill] sm:$0xff] }
 0x363   :  { %2569 = vmatpush.bf16.msrb.mxu1 %v7387_v37  ;;  %2595 = vmatpush.bf16.msrb.mxu3 %v7388_v11  ;;  %v7398_v37 = vld [vmem:[#allocation96_spill] sm:$0xff] }
 0x364   :  { %v7399_v11 = vld [vmem:[#allocation40_spill] sm:$0xff] }
 0x365   :  { %2558 = vmatpush.bf16.msrb.mxu0 %v7389_v62  ;;  %2584 = vmatpush.bf16.msra.mxu2 %v7390_v54  ;;  %v7400_v62 = vld [vmem:[#allocation97_spill] sm:$0xff] }
 0x366   :  { %v7401_v54 = vld [vmem:[#allocation49_spill] sm:$0xff] }
 0x367   :  { %2570 = vmatpush.bf16.msrb.mxu1 %v7393_v56  ;;  %2596 = vmatpush.bf16.msrb.mxu3 %v7394_v15  ;;  %v7404_v56 = vld [vmem:[#allocation103_spill] sm:$0xff]  ;;  %v7405_v15 = vld [vmem:[#allocation52_spill] sm:$0xff] }
 0x369   :  { %2603 = vmatpush.bf16.msra.mxu0 %v7391_v59  ;;  %2629 = vmatpush.bf16.msrb.mxu2 %v7392_v12  ;;  %v7402_v59 = vld [vmem:[#allocation76_spill] sm:$0xff]  ;;  %v7403_v12 = vld [vmem:[#allocation45_spill] sm:$0xff] }
 0x36b   :  { %2571 = vmatpush.bf16.msrb.mxu1 %v7397_v40  ;;  %2597 = vmatpush.bf16.msrb.mxu3 %v7398_v37  ;;  %v7408_v40 = vld [vmem:[#allocation108_spill] sm:$0xff]  ;;  %v7409_v37 = vld [vmem:[#allocation55_spill] sm:$0xff] }
 0x36d   :  { %2604 = vmatpush.bf16.msra.mxu0 %v7395_v17  ;;  %2630 = vmatpush.bf16.msrb.mxu2 %v7396_v35  ;;  %v7406_v17 = vld [vmem:[#allocation79_spill] sm:$0xff]  ;;  %v7407_v35 = vld [vmem:[#allocation50_spill] sm:$0xff] }
 0x36f   :  { %2616 = vmatpush.bf16.msra.mxu1 %v7399_v11  ;;  %2642 = vmatpush.bf16.msra.mxu3 %v7400_v62  ;;  %v7410_v11 = vld [vmem:[#allocation85_spill] sm:$0xff] }
 0x370   :  { %v7411_v62 = vld [vmem:[#allocation53_spill] sm:$0xff] }
 0x371   :  { %2605 = vmatpush.bf16.msra.mxu0 %v7401_v54  ;;  %2631 = vmatpush.bf16.msrb.mxu2 %v7402_v59  ;;  %v7412_v54 = vld [vmem:[#allocation111_spill] sm:$0xff]  ;;  %v7413_v59 = vld [vmem:[#allocation61_spill] sm:$0xff] }
 0x373   :  { %2617 = vmatpush.bf16.msra.mxu1 %v7403_v12  ;;  %2643 = vmatpush.bf16.msra.mxu3 %v7404_v56  ;;  %v7414_v12 = vld [vmem:[#allocation91_spill] sm:$0xff]  ;;  %v7415_v56 = vld [vmem:[#allocation56_spill] sm:$0xff] }
 0x375   :  { %2606 = vmatpush.bf16.msra.mxu0 %v7405_v15  ;;  %2632 = vmatpush.bf16.msrb.mxu2 %v7406_v17  ;;  %v7416_v15 = vld [vmem:[#allocation112_spill] sm:$0xff]  ;;  %v7417_v17 = vld [vmem:[#allocation67_spill] sm:$0xff] }
 0x377   :  { %2618 = vmatpush.bf16.msra.mxu1 %v7407_v35  ;;  %2644 = vmatpush.bf16.msra.mxu3 %v7408_v40  ;;  %v7418_v35 = vld [vmem:[#allocation95_spill] sm:$0xff]  ;;  %v7419_v40 = vld [vmem:[#allocation62_spill] sm:$0xff] }
 0x379   :  { %2607 = vmatpush.bf16.msra.mxu0 %v7409_v37  ;;  %2633 = vmatpush.bf16.msrb.mxu2 %v7410_v11  ;;  %v7420_v37 = vld [vmem:[#allocation115_spill] sm:$0xff] }
 0x37a   :  { %v7421_v11 = vld [vmem:[#allocation71_spill] sm:$0xff] }
 0x37b   :  { %2619 = vmatpush.bf16.msra.mxu1 %v7411_v62  ;;  %2645 = vmatpush.bf16.msra.mxu3 %v7412_v54  ;;  %v7422_v62 = vld [vmem:[#allocation100_spill] sm:$0xff] }
 0x37c   :  { %v7423_v54 = vld [vmem:[#allocation68_spill] sm:$0xff] }
 0x37d   :  { %2608 = vmatpush.bf16.msra.mxu0 %v7413_v59  ;;  %2634 = vmatpush.bf16.msrb.mxu2 %v7414_v12  ;;  %v7424_v59 = vld [vmem:[#allocation118_spill] sm:$0xff]  ;;  %v7425_v12 = vld [vmem:[#allocation72_spill] sm:$0xff] }
 0x37f   :  { %2620 = vmatpush.bf16.msra.mxu1 %v7415_v56  ;;  %2646 = vmatpush.bf16.msra.mxu3 %v7416_v15  ;;  %v7426_v56 = vld [vmem:[#allocation119_spill] sm:$0xff] }
 0x381   :  { %2609 = vmatpush.bf16.msra.mxu0 %v7417_v17  ;;  %2635 = vmatpush.bf16.msrb.mxu2 %v7418_v35  ;;  %v236_v17 = vperm.slane %v5988_v5, 4 }
 0x383   :  { %2621 = vmatpush.bf16.msra.mxu1 %v7419_v40  ;;  %2647 = vmatpush.bf16.msra.mxu3 %v7420_v37  ;;  %v7427_v40 = vld [vmem:[#allocation25_spill] sm:$0xff] }
 0x384   :  { %v755_v53 = vadd.f32 %v7427_v40, %v236_v17 }
 0x385   :  { %2610 = vmatpush.bf16.msra.mxu0 %v7421_v11  ;;  %2636 = vmatpush.bf16.msrb.mxu2 %v7422_v62  ;;  %v237_v11 = vperm.slane %v5988_v5, 5 }
 0x387   :  { %2622 = vmatpush.bf16.msra.mxu1 %v7423_v54  ;;  %2648 = vmatpush.bf16.msra.mxu3 %v7424_v59  ;;  %v768_v59 = vadd.f32 %v7428_v18, %v237_v11 }
 0x38b   :  { %2623 = vmatpush.bf16.msra.mxu1 %v7425_v12  ;;  %2649 = vmatpush.bf16.msra.mxu3 %v7426_v56 }
 0x3a5   :  { %v2308_v15 = vpop.f32.mrf.mxu0 }
 0x3ab   :  { %v2321_v35 = vpop.f32.mrf.mxu1  ;;  %v2334_v10 = vpop.f32.mrf.mxu2 }
 0x3ac   :  { %v2322_v37 = vadd.f32 %v2321_v35, %v2308_v15  ;;  %v7429_v35 = vld [vmem:[#allocation48_spill] sm:$0xff] }
 0x3ad   :  { %v2310_v0 = vpop.f32.mrf.mxu0  ;;  %v781_v40 = vadd.f32 %v7429_v35, %v238_v30 }
 0x3ae   :  { %v2455_v62 = vadd.f32 %v2322_v37, %v755_v53 }
 0x3b0   :  { %v4532_v45 = vmul.f32 -1.442695, %v2455_v62 }
 0x3b1   :  { %v2347_v54 = vpop.f32.mrf.mxu3 }
 0x3b2   :  { %4859 = vpow2.f32 %v4532_v45  ;;  %v2348_v12 = vadd.f32 %v2347_v54, %v2334_v10 }
 0x3b3   :  { %v2323_v1 = vpop.f32.mrf.mxu1  ;;  %v2336_v56 = vpop.f32.mrf.mxu2 }
 0x3b4   :  { %v2456_v29 = vadd.f32 %v2348_v12, %v768_v59  ;;  %v239_v1 = vperm.slane %v5988_v5, 7 }
 0x3b5   :  { %v2360_v27 = vpop.f32.mrf.mxu0 }
 0x3b6   :  { %v4533_v2 = vmul.f32 -1.442695, %v2456_v29 }
 0x3b8   :  { %v4860_v61 = vpop.eup %4859  ;;  %4861 = vpow2.f32 %v4533_v2 }
 0x3b9   :  { %v2463_v15 = vadd.f32 1.0, %v4860_v61  ;;  %v2349_v0 = vpop.f32.mrf.mxu3  ;;  %v7430_v61 = vld [vmem:[#allocation87_spill] sm:$0xff] }
 0x3ba   :  { %v794_v56 = vadd.f32 %v7430_v61, %v239_v1  ;;  %v6122_v1 = vld [vmem:[%s6947_s4 + $0x10] sm:$0xff] }
 0x3bb   :  { %4863 = vrcp.f32 %v2463_v15  ;;  %v2373_v17 = vpop.f32.mrf.mxu1  ;;  %v2386_v53 = vpop.f32.mrf.mxu2  ;;  %7431 = vst [vmem:[#allocation9_spill] sm:$0xff] %v6122_v1  ;;  %vm2470_vm4 = vweird.f32 %v2463_v15 }
 0x3bc   :  { %v2374_v37 = vadd.f32 %v2373_v17, %v2360_v27 }
 0x3bd   :  { %v2362_v18 = vpop.f32.mrf.mxu0 }
 0x3be   :  { %v4862_v45 = vpop.eup %4861  ;;  %v2495_v10 = vadd.f32 %v2374_v37, %v781_v40 }
 0x3bf   :  { %v6114_v59 = vadd.f32 1.0, %v4862_v45 }
 0x3c0   :  { %v4534_v29 = vmul.f32 -1.442695, %v2495_v10 }
 0x3c1   :  { %v4864_v12 = vpop.eup %4863  ;;  %4865 = vrcp.f32 %v6114_v59  ;;  %v2399_v2 = vpop.f32.mrf.mxu3  ;;  %vm2485_vm8 = vweird.f32 %v6114_v59 }
 0x3c2   :  { %4867 = vpow2.f32 %v4534_v29  ;;  %v2400_v11 = vadd.f32 %v2399_v2, %v2386_v53  ;;  %v2466_v62 = vmul.f32 %v4864_v12, %v2463_v15  ;;  %vm2471_vm3 = vweird.f32 %v4864_v12 }
 0x3c3   :  { %v2375_v54 = vpop.f32.mrf.mxu1  ;;  %v2388_v30 = vpop.f32.mrf.mxu2  ;;  %v2476_v29 = vand.u32 2147483648, %v2463_v15  ;;  %v2474_v2 = vand.u32 2147483647, %v2463_v15  ;;  %vm2472_vm5 = vmor %vm2470_vm4, %vm2471_vm3 }
 0x3c4   :  { %v2496_v27 = vadd.f32 %v2400_v11, %v794_v56  ;;  %v2467_v0 = vsub.f32 1.0, %v2466_v62  ;;  %v240_v62 = vperm.slane %v6122_v1, 0 }
 0x3c5   :  { %v2412_v17 = vpop.f32.mrf.mxu0  ;;  %vm2475_vm6 = vcmp.eq.f32.partialorder %v2474_v2, 8.507059e+37 }
 0x3c6   :  { %v4535_v35 = vmul.f32 -1.442695, %v2496_v27  ;;  %v2468_v5 = vmul.f32 %v4864_v12, %v2467_v0  ;;  %v2477_v0 = vor.u32 1.1754944e-38, %v2476_v29  ;;  %v807_v33 = vadd.f32 %v7433_v63, %v240_v62  ;;  %v7434_v62 = vld [vmem:[#allocation42_spill] sm:$0xff] }
 0x3c7   :  { %v4866_v40 = vpop.eup %4865 }
 0x3c8   :  { %v4868_v37 = vpop.eup %4867  ;;  %4869 = vpow2.f32 %v4535_v35  ;;  %v2469_v18 = vadd.f32 %v4864_v12, %v2468_v5  ;;  %v2481_v45 = vmul.f32 %v4866_v40, %v6114_v59  ;;  %vm2486_vm7 = vweird.f32 %v4866_v40 }
 0x3c9   :  { %v2503_v53 = vadd.f32 1.0, %v4868_v37  ;;  %v2401_v10 = vpop.f32.mrf.mxu3  ;;  %vm2487_vm9 = vmor %vm2485_vm8, %vm2486_vm7 }
 0x3ca   :  { %v2482_v61 = vsub.f32 1.0, %v2481_v45  ;;  %v2473_v30 = vsel %vm2472_vm5, %v4864_v12, %v2469_v18  ;;  %v2491_v45 = vand.u32 2147483648, %v6114_v59  ;;  %v2489_v12 = vand.u32 2147483647, %v6114_v59 }
 0x3cb   :  { %4871 = vrcp.f32 %v2503_v53  ;;  %v2425_v56 = vpop.f32.mrf.mxu1  ;;  %v2438_v11 = vpop.f32.mrf.mxu2  ;;  %v2478_v15 = vsel %vm2475_vm6, %v2477_v0, %v2473_v30  ;;  %v241_v18 = vperm.slane %v6122_v1, 1  ;;  %vm2510_vm12 = vweird.f32 %v2503_v53 }
 0x3cc   :  { %v2426_v54 = vadd.f32 %v2425_v56, %v2412_v17  ;;  %v2483_v27 = vmul.f32 %v4866_v40, %v2482_v61  ;;  %v2492_v30 = vor.u32 1.1754944e-38, %v2491_v45  ;;  %vm2490_vm10 = vcmp.eq.f32.partialorder %v2489_v12, 8.507059e+37 }
 0x3cd   :  { %v2414_v35 = vpop.f32.mrf.mxu0  ;;  %v820_v59 = vadd.f32 %v7434_v62, %v241_v18 }
 0x3ce   :  { %v4870_v5 = vpop.eup %4869  ;;  %v2535_v37 = vadd.f32 %v2426_v54, %v7432_v52  ;;  %v2484_v10 = vadd.f32 %v4866_v40, %v2483_v27  ;;  %v2514_v52 = vand.u32 2147483647, %v2503_v53 }
 0x3cf   :  { %v2504_v55 = vadd.f32 1.0, %v4870_v5  ;;  %v2516_v5 = vand.u32 2147483648, %v2503_v53 }
 0x3d0   :  { %v2537_v42 = vmul.f32 %v2535_v37, %v2478_v15  ;;  %v2488_v54 = vsel %vm2487_vm9, %v4866_v40, %v2484_v10  ;;  %vm2515_vm14 = vcmp.eq.f32.partialorder %v2514_v52, 8.507059e+37 }
 0x3d1   :  { %v4872_v17 = vpop.eup %4871  ;;  %4873 = vrcp.f32 %v2504_v55  ;;  %v2451_v29 = vpop.f32.mrf.mxu3  ;;  %v2493_v37 = vsel %vm2490_vm10, %v2492_v30, %v2488_v54  ;;  %v2531_v18 = vand.u32 2147483648, %v2504_v55  ;;  %v2529_v54 = vand.u32 2147483647, %v2504_v55 }
 0x3d2   :  { %v2506_v2 = vmul.f32 %v4872_v17, %v2503_v53  ;;  %v2539_v61 = vadd.f32 %v2537_v42, %v807_v33  ;;  %v2452_v56 = vadd.f32 %v2451_v29, %v2438_v11  ;;  %vm2511_vm11 = vweird.f32 %v4872_v17 }
 0x3d3   :  { %v2427_v27 = vpop.f32.mrf.mxu1  ;;  %v2440_v0 = vpop.f32.mrf.mxu2  ;;  %vm2512_vm13 = vmor %vm2510_vm12, %vm2511_vm11  ;;  %v2517_v11 = vor.u32 1.1754944e-38, %v2516_v5  ;;  %vm2525_vm0 = vweird.f32 %v2504_v55  ;;  %vm2530_vm2 = vcmp.eq.f32.partialorder %v2529_v54, 8.507059e+37  ;;  %v7438_v5 = vld [vmem:[#allocation132_spill] sm:$0xff]  ;;  %v7453_v54 = vld [vmem:[#allocation29_spill] sm:$0xff] }
 0x3d4   :  { %v2507_v35 = vsub.f32 1.0, %v2506_v2  ;;  %4875 = vtanh.f32 %v2539_v61  ;;  %v2536_v63 = vadd.f32 %v2452_v56, %v5888_v16 }
 0x3d6   :  { %v2508_v15 = vmul.f32 %v4872_v17, %v2507_v35  ;;  %v2538_v1 = vmul.f32 %v2536_v63, %v2493_v37  ;;  %v7439_v37 = vld [vmem:[#allocation16_spill] sm:$0xff] }
 0x3d7   :  { %v4874_v8 = vpop.eup %4873 }
 0x3d8   :  { %v2509_v42 = vadd.f32 %v4872_v17, %v2508_v15  ;;  %v2521_v33 = vmul.f32 %v4874_v8, %v2504_v55  ;;  %v2540_v40 = vadd.f32 %v2538_v1, %v820_v59  ;;  %vm2526_vm15 = vweird.f32 %v4874_v8  ;;  %v7437_v59 = vld [vmem:[#allocation110_spill] sm:$0xff]  ;;  %v7440_v15 = vld [vmem:[#allocation57_spill] sm:$0xff] }
 0x3d9   :  { %v2453_v10 = vpop.f32.mrf.mxu3  ;;  %vm2527_vm1 = vmor %vm2525_vm0, %vm2526_vm15  ;;  %v2532_v1 = vor.u32 1.1754944e-38, %v2531_v18  ;;  %v7449_v18 = vld [vmem:[#allocation27_spill] sm:$0xff] }
 0x3da   :  { %v4876_v45 = vpop.eup %4875  ;;  %v2522_v12 = vsub.f32 1.0, %v2521_v33  ;;  %v2513_v29 = vsel %vm2512_vm13, %v4872_v17, %v2509_v42  ;;  %4877 = vtanh.f32 %v2540_v40  ;;  %v7441_v42 = vld [vmem:[#allocation21_spill] sm:$0xff]  ;;  %v7442_v33 = vld [vmem:[#allocation36_spill] sm:$0xff]  ;;  %v7443_v40 = vld [vmem:[#allocation18_spill] sm:$0xff] }
 0x3db   :  { %v2518_v2 = vsel %vm2515_vm14, %v2517_v11, %v2513_v29  ;;  %v2543_v61 = vsub.f32 %v6002_v44, %v4876_v45  ;;  %v7444_v11 = vld [vmem:[#allocation64_spill] sm:$0xff]  ;;  %v7445_v10 = vld [vmem:[#allocation23_spill] sm:$0xff]  ;;  %v7448_v29 = vld [vmem:[#allocation70_spill] sm:$0xff] }
 0x3dc   :  { %v2523_v56 = vmul.f32 %v4874_v8, %v2522_v12  ;;  %v7447_v12 = vld [vmem:[#allocation22_spill] sm:$0xff] }
 0x3dd   :  { %v2545_v30 = vmul.f32 %v2543_v61, %v2518_v2  ;;  %v7450_v2 = vld [vmem:[#allocation46_spill] sm:$0xff]  ;;  %v7451_v61 = vld [vmem:[#allocation24_spill] sm:$0xff] }
 0x3de   :  { %v2524_v27 = vadd.f32 %v4874_v8, %v2523_v56  ;;  %v7452_v56 = vld [vmem:[#allocation75_spill] sm:$0xff] }
 0x3df   :  { %v6134_v53 = vadd.f32 %v4876_v45, %v2545_v30  ;;  %v7446_v45 = vld [vmem:[#allocation43_spill] sm:$0xff] }
 0x3e0   :  { %v4878_v0 = vpop.eup %4877  ;;  %v2528_v52 = vsel %vm2527_vm1, %v4874_v8, %v2524_v27  ;;  %v7435_v8 = vld [vmem:[#allocation17_spill] sm:$0xff]  ;;  %v7454_v30 = vld [vmem:[#allocation51_spill] sm:$0xff]  ;;  %v7455_v27 = vld [vmem:[#allocation28_spill] sm:$0xff] }
 0x3e1   :  { %v2549_v17 = vpack.c.bf16 %v6134_v53, %v6134_v53  ;;  %v2533_v35 = vsel %vm2530_vm2, %v2532_v1, %v2528_v52  ;;  %v2544_v63 = vsub.f32 %v6009_v26, %v4878_v0  ;;  %v7436_v26 = vld [vmem:[#allocation33_spill] sm:$0xff]  ;;  %v7456_v1 = vld [vmem:[#allocation82_spill] sm:$0xff] }
 0x3e2   :  { %v7458_v52 = vld [vmem:[#allocation54_spill] sm:$0xff] }
 0x3e3   :  { %v2546_v44 = vmul.f32 %v2544_v63, %v2533_v35  ;;  %2559 = vmatmul.bf16.vlgmr.msrb.gmra.mxu0 %v2549_v17  ;;  %2585 = vmatmul.bf16.vlgmr.msra.gmra.mxu2 %v2549_v17  ;;  %v7460_v35 = vld [vmem:[#allocation86_spill] sm:$0xff]  ;;  %v7461_v63 = vld [vmem:[#allocation37_spill] sm:$0xff] }
 0x3e4   :  { %2655 = vmatpush.bf16.msrb.mxu0 %v7291_v31  ;;  %2681 = vmatpush.bf16.msra.mxu2 %v5645_v49 }
 0x3e5   :  { %v6141_v55 = vadd.f32 %v4878_v0, %v2546_v44  ;;  %v7457_v0 = vld [vmem:[#allocation34_spill] sm:$0xff]  ;;  %v7462_v44 = vld [vmem:[#allocation60_spill] sm:$0xff] }
 0x3e7   :  { %v2550_v62 = vpack.c.bf16 %v6141_v55, %v6141_v55 }
 0x3e8   :  { %2656 = vmatpush.bf16.msrb.mxu0 %v7292_v50  ;;  %2682 = vmatpush.bf16.msra.mxu2 %v5659_v41 }
 0x3e9   :  { %2572 = vmatmul.bf16.vlgmr.msrb.gmra.mxu1 %v2550_v62  ;;  %2598 = vmatmul.bf16.vlgmr.msrb.gmra.mxu3 %v2550_v62 }
 0x3ea   :  { %2668 = vmatpush.bf16.msrb.mxu1 %v7303_v48  ;;  %2694 = vmatpush.bf16.msrb.mxu3 %v5725_v7 }
 0x3ec   :  { %2657 = vmatpush.bf16.msrb.mxu0 %v7293_v9  ;;  %2683 = vmatpush.bf16.msra.mxu2 %v5676_v14 }
 0x3ee   :  { %2669 = vmatpush.bf16.msrb.mxu1 %v7304_v58  ;;  %2695 = vmatpush.bf16.msrb.mxu3 %v5734_v46 }
 0x3f0   :  { %2658 = vmatpush.bf16.msrb.mxu0 %v7294_v47  ;;  %2684 = vmatpush.bf16.msra.mxu2 %v5686_v20 }
 0x3f2   :  { %2670 = vmatpush.bf16.msrb.mxu1 %v7305_v60  ;;  %2696 = vmatpush.bf16.msrb.mxu3 %v5746_v34 }
 0x3f3   :  { %2611 = vmatmul.bf16.vlgmr.msra.gmra.mxu0 %v2549_v17  ;;  %2637 = vmatmul.bf16.vlgmr.msrb.gmra.mxu2 %v2549_v17 }
 0x3f4   :  { %2659 = vmatpush.bf16.msrb.mxu0 %v7295_v19  ;;  %2685 = vmatpush.bf16.msra.mxu2 %v5700_v32 }
 0x3f6   :  { %2671 = vmatpush.bf16.msrb.mxu1 %v7306_v38  ;;  %2697 = vmatpush.bf16.msrb.mxu3 %v5757_v21 }
 0x3f8   :  { %2660 = vmatpush.bf16.msrb.mxu0 %v7296_v36  ;;  %2686 = vmatpush.bf16.msra.mxu2 %v5708_v24 }
 0x3f9   :  { %2624 = vmatmul.bf16.vlgmr.msra.gmra.mxu1 %v2550_v62  ;;  %2650 = vmatmul.bf16.vlgmr.msra.gmra.mxu3 %v2550_v62 }
 0x3fa   :  { %2672 = vmatpush.bf16.msrb.mxu1 %v7307_v6  ;;  %2698 = vmatpush.bf16.msrb.mxu3 %v7308_v4 }
 0x3fc   :  { %2661 = vmatpush.bf16.msrb.mxu0 %v7297_v3  ;;  %2687 = vmatpush.bf16.msra.mxu2 %v5720_v57 }
 0x3fe   :  { %2673 = vmatpush.bf16.msrb.mxu1 %v7311_v23  ;;  %2699 = vmatpush.bf16.msrb.mxu3 %v7312_v39 }
 0x400   :  { %2662 = vmatpush.bf16.msrb.mxu0 %v7298_v25  ;;  %2688 = vmatpush.bf16.msra.mxu2 %v7363_v28 }
 0x402   :  { %2674 = vmatpush.bf16.msrb.mxu1 %v7315_v43  ;;  %2700 = vmatpush.bf16.msrb.mxu3 %v7316_v51 }
 0x403   :  { %2663 = vmatmul.bf16.vlgmr.msrb.gmra.mxu0 %v2549_v17  ;;  %2689 = vmatmul.bf16.vlgmr.msra.gmra.mxu2 %v2549_v17  ;;  %v7459_v17 = vld [vmem:[#allocation30_spill] sm:$0xff] }
 0x404   :  { %2803 = vmatpush.bf16.msra.mxu0 %v7299_v13  ;;  %2829 = vmatpush.bf16.msrb.mxu2 %v5414_v22 }
 0x406   :  { %2675 = vmatpush.bf16.msrb.mxu1 %v7437_v59  ;;  %2701 = vmatpush.bf16.msrb.mxu3 %v7438_v5  ;;  %v7505_v5 = vld [vmem:[#allocation88_spill] sm:$0xff] }
 0x408   :  { %2804 = vmatpush.bf16.msra.mxu0 %v7435_v8  ;;  %2830 = vmatpush.bf16.msrb.mxu2 %v7436_v26 }
 0x409   :  { %2676 = vmatmul.bf16.vlgmr.msrb.gmra.mxu1 %v2550_v62  ;;  %2702 = vmatmul.bf16.vlgmr.msrb.gmra.mxu3 %v2550_v62  ;;  %v7463_v62 = vld [vmem:[#allocation39_spill] sm:$0xff] }
 0x40a   :  { %2816 = vmatpush.bf16.msra.mxu1 %v7439_v37  ;;  %2842 = vmatpush.bf16.msra.mxu3 %v7440_v15 }
 0x40c   :  { %2805 = vmatpush.bf16.msra.mxu0 %v7441_v42  ;;  %2831 = vmatpush.bf16.msrb.mxu2 %v7442_v33 }
 0x40e   :  { %2817 = vmatpush.bf16.msra.mxu1 %v7443_v40  ;;  %2843 = vmatpush.bf16.msra.mxu3 %v7444_v11 }
 0x410   :  { %2806 = vmatpush.bf16.msra.mxu0 %v7445_v10  ;;  %2832 = vmatpush.bf16.msrb.mxu2 %v7446_v45 }
 0x412   :  { %2818 = vmatpush.bf16.msra.mxu1 %v7447_v12  ;;  %2844 = vmatpush.bf16.msra.mxu3 %v7448_v29  ;;  %v7501_v12 = vld [vmem:[#allocation106_spill] sm:$0xff] }
 0x414   :  { %2807 = vmatpush.bf16.msra.mxu0 %v7449_v18  ;;  %2833 = vmatpush.bf16.msrb.mxu2 %v7450_v2 }
 0x416   :  { %2819 = vmatpush.bf16.msra.mxu1 %v7451_v61  ;;  %2845 = vmatpush.bf16.msra.mxu3 %v7452_v56 }
 0x418   :  { %2808 = vmatpush.bf16.msra.mxu0 %v7453_v54  ;;  %2834 = vmatpush.bf16.msrb.mxu2 %v7454_v30  ;;  %v7464_v54 = vld [vmem:[#allocation63_spill] sm:$0xff] }
 0x419   :  { %v7465_v30 = vld [vmem:[#allocation35_spill] sm:$0xff] }
 0x41a   :  { %2820 = vmatpush.bf16.msra.mxu1 %v7455_v27  ;;  %2846 = vmatpush.bf16.msra.mxu3 %v7456_v1  ;;  %v7466_v27 = vld [vmem:[#allocation92_spill] sm:$0xff] }
 0x41b   :  { %v7467_v1 = vld [vmem:[#allocation44_spill] sm:$0xff] }
 0x41c   :  { %2809 = vmatpush.bf16.msra.mxu0 %v7457_v0  ;;  %2835 = vmatpush.bf16.msrb.mxu2 %v7458_v52  ;;  %v7468_v0 = vld [vmem:[#allocation69_spill] sm:$0xff]  ;;  %v7469_v52 = vld [vmem:[#allocation38_spill] sm:$0xff] }
 0x41e   :  { %2821 = vmatpush.bf16.msra.mxu1 %v7459_v17  ;;  %2847 = vmatpush.bf16.msra.mxu3 %v7460_v35  ;;  %v7470_v17 = vld [vmem:[#allocation96_spill] sm:$0xff] }
 0x41f   :  { %v7471_v35 = vld [vmem:[#allocation40_spill] sm:$0xff] }
 0x420   :  { %2810 = vmatpush.bf16.msra.mxu0 %v7461_v63  ;;  %2836 = vmatpush.bf16.msrb.mxu2 %v7462_v44  ;;  %v7472_v63 = vld [vmem:[#allocation97_spill] sm:$0xff] }
 0x421   :  { %v7473_v44 = vld [vmem:[#allocation49_spill] sm:$0xff] }
 0x422   :  { %2822 = vmatpush.bf16.msra.mxu1 %v7465_v30  ;;  %2848 = vmatpush.bf16.msra.mxu3 %v7466_v27  ;;  %v7476_v30 = vld [vmem:[#allocation103_spill] sm:$0xff]  ;;  %v7477_v27 = vld [vmem:[#allocation52_spill] sm:$0xff] }
 0x424   :  { %2855 = vmatpush.bf16.msrb.mxu0 %v7463_v62  ;;  %2881 = vmatpush.bf16.msra.mxu2 %v7464_v54  ;;  %v7474_v62 = vld [vmem:[#allocation76_spill] sm:$0xff]  ;;  %v7475_v54 = vld [vmem:[#allocation45_spill] sm:$0xff] }
 0x426   :  { %2823 = vmatpush.bf16.msra.mxu1 %v7469_v52  ;;  %2849 = vmatpush.bf16.msra.mxu3 %v7470_v17  ;;  %v7480_v52 = vld [vmem:[#allocation108_spill] sm:$0xff]  ;;  %v7481_v17 = vld [vmem:[#allocation55_spill] sm:$0xff] }
 0x428   :  { %2856 = vmatpush.bf16.msrb.mxu0 %v7467_v1  ;;  %2882 = vmatpush.bf16.msra.mxu2 %v7468_v0  ;;  %v7478_v1 = vld [vmem:[#allocation79_spill] sm:$0xff]  ;;  %v7479_v0 = vld [vmem:[#allocation50_spill] sm:$0xff] }
 0x42a   :  { %2868 = vmatpush.bf16.msrb.mxu1 %v7471_v35  ;;  %2894 = vmatpush.bf16.msrb.mxu3 %v7472_v63  ;;  %v7482_v35 = vld [vmem:[#allocation85_spill] sm:$0xff] }
 0x42b   :  { %v7483_v63 = vld [vmem:[#allocation53_spill] sm:$0xff] }
 0x42c   :  { %2857 = vmatpush.bf16.msrb.mxu0 %v7473_v44  ;;  %2883 = vmatpush.bf16.msra.mxu2 %v7474_v62  ;;  %v7484_v44 = vld [vmem:[#allocation111_spill] sm:$0xff]  ;;  %v7485_v62 = vld [vmem:[#allocation61_spill] sm:$0xff] }
 0x42e   :  { %2869 = vmatpush.bf16.msrb.mxu1 %v7475_v54  ;;  %2895 = vmatpush.bf16.msrb.mxu3 %v7476_v30  ;;  %v7486_v54 = vld [vmem:[#allocation91_spill] sm:$0xff]  ;;  %v7487_v30 = vld [vmem:[#allocation56_spill] sm:$0xff] }
 0x430   :  { %2858 = vmatpush.bf16.msrb.mxu0 %v7477_v27  ;;  %2884 = vmatpush.bf16.msra.mxu2 %v7478_v1  ;;  %v7488_v27 = vld [vmem:[#allocation112_spill] sm:$0xff]  ;;  %v7489_v1 = vld [vmem:[#allocation67_spill] sm:$0xff] }
 0x432   :  { %2870 = vmatpush.bf16.msrb.mxu1 %v7479_v0  ;;  %2896 = vmatpush.bf16.msrb.mxu3 %v7480_v52  ;;  %v7490_v0 = vld [vmem:[#allocation95_spill] sm:$0xff]  ;;  %v7491_v52 = vld [vmem:[#allocation62_spill] sm:$0xff] }
 0x434   :  { %2859 = vmatpush.bf16.msrb.mxu0 %v7481_v17  ;;  %2885 = vmatpush.bf16.msra.mxu2 %v7482_v35  ;;  %v7492_v17 = vld [vmem:[#allocation115_spill] sm:$0xff] }
 0x435   :  { %v7493_v35 = vld [vmem:[#allocation71_spill] sm:$0xff] }
 0x436   :  { %2871 = vmatpush.bf16.msrb.mxu1 %v7483_v63  ;;  %2897 = vmatpush.bf16.msrb.mxu3 %v7484_v44  ;;  %v7494_v63 = vld [vmem:[#allocation100_spill] sm:$0xff] }
 0x437   :  { %v7495_v44 = vld [vmem:[#allocation68_spill] sm:$0xff] }
 0x438   :  { %2860 = vmatpush.bf16.msrb.mxu0 %v7485_v62  ;;  %2886 = vmatpush.bf16.msra.mxu2 %v7486_v54  ;;  %v7496_v62 = vld [vmem:[#allocation118_spill] sm:$0xff]  ;;  %v7497_v54 = vld [vmem:[#allocation72_spill] sm:$0xff] }
 0x43a   :  { %2872 = vmatpush.bf16.msrb.mxu1 %v7487_v30  ;;  %2898 = vmatpush.bf16.msrb.mxu3 %v7488_v27  ;;  %v7498_v30 = vld [vmem:[#allocation119_spill] sm:$0xff] }
 0x43c   :  { %2861 = vmatpush.bf16.msrb.mxu0 %v7489_v1  ;;  %2887 = vmatpush.bf16.msra.mxu2 %v7490_v0  ;;  %v7499_v1 = vld [vmem:[#allocation9_spill] sm:$0xff] }
 0x43d   :  { %v242_v56 = vperm.slane %v7499_v1, 2  ;;  %v244_v42 = vperm.slane %v7499_v1, 4 }
 0x43e   :  { %2873 = vmatpush.bf16.msrb.mxu1 %v7491_v52  ;;  %2899 = vmatpush.bf16.msrb.mxu3 %v7492_v17  ;;  %v7500_v52 = vld [vmem:[#allocation66_spill] sm:$0xff] }
 0x43f   :  { %v833_v2 = vadd.f32 %v7500_v52, %v242_v56 }
 0x440   :  { %2862 = vmatpush.bf16.msrb.mxu0 %v7493_v35  ;;  %2888 = vmatpush.bf16.msra.mxu2 %v7494_v63  ;;  %v243_v35 = vperm.slane %v7499_v1, 3 }
 0x442   :  { %2874 = vmatpush.bf16.msrb.mxu1 %v7495_v44  ;;  %2900 = vmatpush.bf16.msrb.mxu3 %v7496_v62  ;;  %v846_v62 = vadd.f32 %v7501_v12, %v243_v35 }
 0x446   :  { %2875 = vmatpush.bf16.msrb.mxu1 %v7497_v54  ;;  %2901 = vmatpush.bf16.msrb.mxu3 %v7498_v30 }
 0x460   :  { %v2560_v27 = vpop.f32.mrf.mxu0 }
 0x466   :  { %v2573_v0 = vpop.f32.mrf.mxu1  ;;  %v2586_v61 = vpop.f32.mrf.mxu2 }
 0x467   :  { %v2574_v17 = vadd.f32 %v2573_v0, %v2560_v27  ;;  %v7502_v0 = vld [vmem:[#allocation58_spill] sm:$0xff] }
 0x468   :  { %v2562_v18 = vpop.f32.mrf.mxu0  ;;  %v859_v52 = vadd.f32 %v7502_v0, %v244_v42 }
 0x469   :  { %v2707_v63 = vadd.f32 %v2574_v17, %v833_v2 }
 0x46b   :  { %v4536_v29 = vmul.f32 -1.442695, %v2707_v63 }
 0x46c   :  { %v2599_v44 = vpop.f32.mrf.mxu3 }
 0x46d   :  { %4879 = vpow2.f32 %v4536_v29  ;;  %v2600_v54 = vadd.f32 %v2599_v44, %v2586_v61 }
 0x46e   :  { %v2575_v45 = vpop.f32.mrf.mxu1  ;;  %v2588_v30 = vpop.f32.mrf.mxu2 }
 0x46f   :  { %v2708_v10 = vadd.f32 %v2600_v54, %v846_v62  ;;  %v245_v45 = vperm.slane %v7499_v1, 5 }
 0x470   :  { %v2612_v11 = vpop.f32.mrf.mxu0 }
 0x471   :  { %v4537_v40 = vmul.f32 -1.442695, %v2708_v10 }
 0x473   :  { %v4880_v33 = vpop.eup %4879  ;;  %4881 = vpow2.f32 %v4537_v40 }
 0x474   :  { %v2715_v56 = vadd.f32 1.0, %v4880_v33  ;;  %v2601_v18 = vpop.f32.mrf.mxu3  ;;  %v7503_v33 = vld [vmem:[#allocation59_spill] sm:$0xff] }
 0x475   :  { %v872_v35 = vadd.f32 %v7503_v33, %v245_v45 }
 0x476   :  { %4883 = vrcp.f32 %v2715_v56  ;;  %v2625_v27 = vpop.f32.mrf.mxu1  ;;  %v2638_v2 = vpop.f32.mrf.mxu2  ;;  %v2728_v45 = vand.u32 2147483648, %v2715_v56  ;;  %vm2722_vm4 = vweird.f32 %v2715_v56 }
 0x477   :  { %v2626_v17 = vadd.f32 %v2625_v27, %v2612_v11 }
 0x478   :  { %v2614_v12 = vpop.f32.mrf.mxu0 }
 0x479   :  { %v4882_v29 = vpop.eup %4881  ;;  %v2747_v61 = vadd.f32 %v2626_v17, %v859_v52 }
 0x47a   :  { %v6246_v54 = vadd.f32 1.0, %v4882_v29 }
 0x47b   :  { %v4538_v10 = vmul.f32 -1.442695, %v2747_v61 }
 0x47c   :  { %v4884_v30 = vpop.eup %4883  ;;  %4885 = vrcp.f32 %v6246_v54  ;;  %v2651_v40 = vpop.f32.mrf.mxu3  ;;  %vm2737_vm8 = vweird.f32 %v6246_v54 }
 0x47d   :  { %4887 = vpow2.f32 %v4538_v10  ;;  %v2652_v63 = vadd.f32 %v2651_v40, %v2638_v2  ;;  %v2718_v44 = vmul.f32 %v4884_v30, %v2715_v56  ;;  %vm2723_vm3 = vweird.f32 %v4884_v30 }
 0x47e   :  { %v2627_v62 = vpop.f32.mrf.mxu1  ;;  %v2640_v42 = vpop.f32.mrf.mxu2  ;;  %v2726_v2 = vand.u32 2147483647, %v2715_v56  ;;  %vm2724_vm5 = vmor %vm2722_vm4, %vm2723_vm3 }
 0x47f   :  { %v2748_v11 = vadd.f32 %v2652_v63, %v872_v35  ;;  %v2719_v18 = vsub.f32 1.0, %v2718_v44  ;;  %v246_v35 = vperm.slane %v7499_v1, 6  ;;  %v2729_v42 = vor.u32 1.1754944e-38, %v2728_v45 }
 0x480   :  { %v2664_v27 = vpop.f32.mrf.mxu0  ;;  %vm2727_vm6 = vcmp.eq.f32.partialorder %v2726_v2, 8.507059e+37 }
 0x481   :  { %v4539_v0 = vmul.f32 -1.442695, %v2748_v11  ;;  %v2720_v12 = vmul.f32 %v4884_v30, %v2719_v18  ;;  %v885_v59 = vadd.f32 %v7505_v5, %v246_v35  ;;  %v7506_v35 = vld [vmem:[#allocation116_spill] sm:$0xff] }
 0x482   :  { %v4886_v52 = vpop.eup %4885 }
 0x483   :  { %v4888_v17 = vpop.eup %4887  ;;  %4889 = vpow2.f32 %v4539_v0  ;;  %v2721_v29 = vadd.f32 %v4884_v30, %v2720_v12  ;;  %v2733_v61 = vmul.f32 %v4886_v52, %v6246_v54  ;;  %v7504_v0 = vld [vmem:[#allocation139_spill] sm:$0xff]  ;;  %vm2738_vm7 = vweird.f32 %v4886_v52 }
 0x484   :  { %v2755_v15 = vadd.f32 1.0, %v4888_v17  ;;  %v2653_v37 = vpop.f32.mrf.mxu3  ;;  %vm2739_vm9 = vmor %vm2737_vm8, %vm2738_vm7 }
 0x485   :  { %v2734_v10 = vsub.f32 1.0, %v2733_v61  ;;  %v2725_v44 = vsel %vm2724_vm5, %v4884_v30, %v2721_v29  ;;  %v2743_v61 = vand.u32 2147483648, %v6246_v54  ;;  %v2741_v30 = vand.u32 2147483647, %v6246_v54 }
 0x486   :  { %4891 = vrcp.f32 %v2755_v15  ;;  %v2677_v40 = vpop.f32.mrf.mxu1  ;;  %v2690_v33 = vpop.f32.mrf.mxu2  ;;  %v2730_v56 = vsel %vm2727_vm6, %v2729_v42, %v2725_v44  ;;  %v247_v29 = vperm.slane %v7499_v1, 7  ;;  %vm2762_vm12 = vweird.f32 %v2755_v15 }
 0x487   :  { %v2678_v63 = vadd.f32 %v2677_v40, %v2664_v27  ;;  %v2735_v62 = vmul.f32 %v4886_v52, %v2734_v10  ;;  %v2744_v44 = vor.u32 1.1754944e-38, %v2743_v61  ;;  %vm2742_vm10 = vcmp.eq.f32.partialorder %v2741_v30, 8.507059e+37 }
 0x488   :  { %v2666_v11 = vpop.f32.mrf.mxu0  ;;  %v898_v54 = vadd.f32 %v7506_v35, %v247_v29 }
 0x489   :  { %v4890_v18 = vpop.eup %4889  ;;  %v2787_v12 = vadd.f32 %v2678_v63, %v7504_v0  ;;  %v2736_v37 = vadd.f32 %v4886_v52, %v2735_v62 }
 0x48a   :  { %v2756_v17 = vadd.f32 1.0, %v4890_v18  ;;  %v2768_v18 = vand.u32 2147483648, %v2755_v15 }
 0x48b   :  { %v2789_v26 = vmul.f32 %v2787_v12, %v2730_v56  ;;  %v2740_v63 = vsel %vm2739_vm9, %v4886_v52, %v2736_v37  ;;  %v2766_v56 = vand.u32 2147483647, %v2755_v15 }
 0x48c   :  { %v4892_v27 = vpop.eup %4891  ;;  %4893 = vrcp.f32 %v2756_v17  ;;  %v2703_v45 = vpop.f32.mrf.mxu3  ;;  %v2745_v12 = vsel %vm2742_vm10, %v2744_v44, %v2740_v63  ;;  %v2783_v29 = vand.u32 2147483648, %v2756_v17  ;;  %v2781_v63 = vand.u32 2147483647, %v2756_v17 }
 0x48d   :  { %v2758_v2 = vmul.f32 %v4892_v27, %v2755_v15  ;;  %v2791_v10 = vadd.f32 %v2789_v26, %v885_v59  ;;  %v2704_v40 = vadd.f32 %v2703_v45, %v2690_v33  ;;  %vm2763_vm11 = vweird.f32 %v4892_v27 }
 0x48e   :  { %v2679_v62 = vpop.f32.mrf.mxu1  ;;  %v2692_v42 = vpop.f32.mrf.mxu2  ;;  %vm2764_vm13 = vmor %vm2762_vm12, %vm2763_vm11  ;;  %v2769_v33 = vor.u32 1.1754944e-38, %v2768_v18  ;;  %vm2767_vm14 = vcmp.eq.f32.partialorder %v2766_v56, 8.507059e+37  ;;  %vm2777_vm0 = vweird.f32 %v2756_v17  ;;  %v2784_v15 = vor.u32 1.1754944e-38, %v2783_v29  ;;  %v7509_v18 = vld [vmem:[#allocation110_spill] sm:$0xff]  ;;  %v7512_v56 = vld [vmem:[#allocation57_spill] sm:$0xff] }
 0x48f   :  { %v2759_v11 = vsub.f32 1.0, %v2758_v2  ;;  %4895 = vtanh.f32 %v2791_v10  ;;  %v2788_v5 = vadd.f32 %v2704_v40, %v5888_v16  ;;  %vm2782_vm2 = vcmp.eq.f32.partialorder %v2781_v63, 8.507059e+37  ;;  %v7521_v29 = vld [vmem:[#allocation27_spill] sm:$0xff]  ;;  %v7525_v63 = vld [vmem:[#allocation29_spill] sm:$0xff] }
 0x491   :  { %v2760_v1 = vmul.f32 %v4892_v27, %v2759_v11  ;;  %v2790_v0 = vmul.f32 %v2788_v5, %v2745_v12  ;;  %v7510_v12 = vld [vmem:[#allocation132_spill] sm:$0xff] }
 0x492   :  { %v4894_v8 = vpop.eup %4893 }
 0x493   :  { %v2761_v26 = vadd.f32 %v4892_v27, %v2760_v1  ;;  %v2773_v59 = vmul.f32 %v4894_v8, %v2756_v17  ;;  %v2792_v52 = vadd.f32 %v2790_v0, %v898_v54  ;;  %vm2778_vm15 = vweird.f32 %v4894_v8  ;;  %v7511_v1 = vld [vmem:[#allocation16_spill] sm:$0xff] }
 0x494   :  { %v2705_v37 = vpop.f32.mrf.mxu3  ;;  %vm2779_vm1 = vmor %vm2777_vm0, %vm2778_vm15 }
 0x495   :  { %v4896_v61 = vpop.eup %4895  ;;  %v2774_v30 = vsub.f32 1.0, %v2773_v59  ;;  %v2765_v45 = vsel %vm2764_vm13, %v4892_v27, %v2761_v26  ;;  %4897 = vtanh.f32 %v2792_v52  ;;  %v7513_v26 = vld [vmem:[#allocation21_spill] sm:$0xff]  ;;  %v7514_v59 = vld [vmem:[#allocation36_spill] sm:$0xff]  ;;  %v7515_v52 = vld [vmem:[#allocation18_spill] sm:$0xff] }
 0x496   :  { %v2770_v2 = vsel %vm2767_vm14, %v2769_v33, %v2765_v45  ;;  %v2795_v10 = vsub.f32 %v6134_v53, %v4896_v61  ;;  %v7516_v33 = vld [vmem:[#allocation64_spill] sm:$0xff]  ;;  %v7517_v37 = vld [vmem:[#allocation23_spill] sm:$0xff]  ;;  %v7520_v45 = vld [vmem:[#allocation70_spill] sm:$0xff] }
 0x497   :  { %v2775_v40 = vmul.f32 %v4894_v8, %v2774_v30  ;;  %v7519_v30 = vld [vmem:[#allocation22_spill] sm:$0xff] }
 0x498   :  { %v2797_v44 = vmul.f32 %v2795_v10, %v2770_v2  ;;  %v7522_v2 = vld [vmem:[#allocation46_spill] sm:$0xff]  ;;  %v7523_v10 = vld [vmem:[#allocation24_spill] sm:$0xff] }
 0x499   :  { %v2776_v62 = vadd.f32 %v4894_v8, %v2775_v40  ;;  %v7524_v40 = vld [vmem:[#allocation75_spill] sm:$0xff] }
 0x49a   :  { %v6261_v0 = vadd.f32 %v4896_v61, %v2797_v44  ;;  %v7518_v61 = vld [vmem:[#allocation43_spill] sm:$0xff] }
 0x49b   :  { %v4898_v42 = vpop.eup %4897  ;;  %v2780_v11 = vsel %vm2779_vm1, %v4894_v8, %v2776_v62  ;;  %v7508_v8 = vld [vmem:[#allocation33_spill] sm:$0xff]  ;;  %v7526_v44 = vld [vmem:[#allocation51_spill] sm:$0xff]  ;;  %v7527_v62 = vld [vmem:[#allocation28_spill] sm:$0xff] }
 0x49c   :  { %v2801_v27 = vpack.c.bf16 %v6261_v0, %v6261_v0  ;;  %v2785_v5 = vsel %vm2782_vm2, %v2784_v15, %v2780_v11  ;;  %v2796_v35 = vsub.f32 %v6141_v55, %v4898_v42  ;;  %v7507_v55 = vld [vmem:[#allocation17_spill] sm:$0xff]  ;;  %v7528_v15 = vld [vmem:[#allocation82_spill] sm:$0xff] }
 0x49d   :  { %v7530_v11 = vld [vmem:[#allocation54_spill] sm:$0xff] }
 0x49e   :  { %v2798_v53 = vmul.f32 %v2796_v35, %v2785_v5  ;;  %2811 = vmatmul.bf16.vlgmr.msra.gmra.mxu0 %v2801_v27  ;;  %2837 = vmatmul.bf16.vlgmr.msrb.gmra.mxu2 %v2801_v27  ;;  %v7532_v5 = vld [vmem:[#allocation86_spill] sm:$0xff]  ;;  %v7533_v35 = vld [vmem:[#allocation37_spill] sm:$0xff] }
 0x49f   :  { %2907 = vmatpush.bf16.msra.mxu0 %v7291_v31  ;;  %2933 = vmatpush.bf16.msrb.mxu2 %v5645_v49 }
 0x4a0   :  { %v6268_v17 = vadd.f32 %v4898_v42, %v2798_v53  ;;  %v7529_v42 = vld [vmem:[#allocation34_spill] sm:$0xff]  ;;  %v7534_v53 = vld [vmem:[#allocation60_spill] sm:$0xff] }
 0x4a2   :  { %v2802_v54 = vpack.c.bf16 %v6268_v17, %v6268_v17 }
 0x4a3   :  { %2908 = vmatpush.bf16.msra.mxu0 %v7292_v50  ;;  %2934 = vmatpush.bf16.msrb.mxu2 %v5659_v41 }
 0x4a4   :  { %2824 = vmatmul.bf16.vlgmr.msra.gmra.mxu1 %v2802_v54  ;;  %2850 = vmatmul.bf16.vlgmr.msra.gmra.mxu3 %v2802_v54 }
 0x4a5   :  { %2920 = vmatpush.bf16.msra.mxu1 %v7303_v48  ;;  %2946 = vmatpush.bf16.msra.mxu3 %v5725_v7 }
 0x4a7   :  { %2909 = vmatpush.bf16.msra.mxu0 %v7293_v9  ;;  %2935 = vmatpush.bf16.msrb.mxu2 %v5676_v14 }
 0x4a9   :  { %2921 = vmatpush.bf16.msra.mxu1 %v7304_v58  ;;  %2947 = vmatpush.bf16.msra.mxu3 %v5734_v46 }
 0x4ab   :  { %2910 = vmatpush.bf16.msra.mxu0 %v7294_v47  ;;  %2936 = vmatpush.bf16.msrb.mxu2 %v5686_v20 }
 0x4ad   :  { %2922 = vmatpush.bf16.msra.mxu1 %v7305_v60  ;;  %2948 = vmatpush.bf16.msra.mxu3 %v5746_v34 }
 0x4ae   :  { %2863 = vmatmul.bf16.vlgmr.msrb.gmra.mxu0 %v2801_v27  ;;  %2889 = vmatmul.bf16.vlgmr.msra.gmra.mxu2 %v2801_v27 }
 0x4af   :  { %2911 = vmatpush.bf16.msra.mxu0 %v7295_v19  ;;  %2937 = vmatpush.bf16.msrb.mxu2 %v5700_v32 }
 0x4b1   :  { %2923 = vmatpush.bf16.msra.mxu1 %v7306_v38  ;;  %2949 = vmatpush.bf16.msra.mxu3 %v5757_v21 }
 0x4b3   :  { %2912 = vmatpush.bf16.msra.mxu0 %v7296_v36  ;;  %2938 = vmatpush.bf16.msrb.mxu2 %v5708_v24 }
 0x4b4   :  { %2876 = vmatmul.bf16.vlgmr.msrb.gmra.mxu1 %v2802_v54  ;;  %2902 = vmatmul.bf16.vlgmr.msrb.gmra.mxu3 %v2802_v54 }
 0x4b5   :  { %2924 = vmatpush.bf16.msra.mxu1 %v7307_v6  ;;  %2950 = vmatpush.bf16.msra.mxu3 %v7308_v4 }
 0x4b7   :  { %2913 = vmatpush.bf16.msra.mxu0 %v7297_v3  ;;  %2939 = vmatpush.bf16.msrb.mxu2 %v5720_v57 }
 0x4b9   :  { %2925 = vmatpush.bf16.msra.mxu1 %v7311_v23  ;;  %2951 = vmatpush.bf16.msra.mxu3 %v7312_v39 }
 0x4bb   :  { %2914 = vmatpush.bf16.msra.mxu0 %v7298_v25  ;;  %2940 = vmatpush.bf16.msrb.mxu2 %v7363_v28 }
 0x4bd   :  { %2926 = vmatpush.bf16.msra.mxu1 %v7315_v43  ;;  %2952 = vmatpush.bf16.msra.mxu3 %v7316_v51 }
 0x4be   :  { %2915 = vmatmul.bf16.vlgmr.msra.gmra.mxu0 %v2801_v27  ;;  %2941 = vmatmul.bf16.vlgmr.msrb.gmra.mxu2 %v2801_v27  ;;  %v7531_v27 = vld [vmem:[#allocation30_spill] sm:$0xff] }
 0x4bf   :  { %3055 = vmatpush.bf16.msrb.mxu0 %v7299_v13  ;;  %3081 = vmatpush.bf16.msra.mxu2 %v5414_v22 }
 0x4c1   :  { %2927 = vmatpush.bf16.msra.mxu1 %v7509_v18  ;;  %2953 = vmatpush.bf16.msra.mxu3 %v7510_v12  ;;  %v7577_v12 = vld [vmem:[#allocation101_spill] sm:$0xff] }
 0x4c3   :  { %3056 = vmatpush.bf16.msrb.mxu0 %v7507_v55  ;;  %3082 = vmatpush.bf16.msra.mxu2 %v7508_v8 }
 0x4c4   :  { %2928 = vmatmul.bf16.vlgmr.msra.gmra.mxu1 %v2802_v54  ;;  %2954 = vmatmul.bf16.vlgmr.msra.gmra.mxu3 %v2802_v54  ;;  %v7535_v54 = vld [vmem:[#allocation39_spill] sm:$0xff] }
 0x4c5   :  { %3068 = vmatpush.bf16.msrb.mxu1 %v7511_v1  ;;  %3094 = vmatpush.bf16.msrb.mxu3 %v7512_v56 }
 0x4c7   :  { %3057 = vmatpush.bf16.msrb.mxu0 %v7513_v26  ;;  %3083 = vmatpush.bf16.msra.mxu2 %v7514_v59 }
 0x4c9   :  { %3069 = vmatpush.bf16.msrb.mxu1 %v7515_v52  ;;  %3095 = vmatpush.bf16.msrb.mxu3 %v7516_v33 }
 0x4cb   :  { %3058 = vmatpush.bf16.msrb.mxu0 %v7517_v37  ;;  %3084 = vmatpush.bf16.msra.mxu2 %v7518_v61 }
 0x4cd   :  { %3070 = vmatpush.bf16.msrb.mxu1 %v7519_v30  ;;  %3096 = vmatpush.bf16.msrb.mxu3 %v7520_v45 }
 0x4cf   :  { %3059 = vmatpush.bf16.msrb.mxu0 %v7521_v29  ;;  %3085 = vmatpush.bf16.msra.mxu2 %v7522_v2 }
 0x4d1   :  { %3071 = vmatpush.bf16.msrb.mxu1 %v7523_v10  ;;  %3097 = vmatpush.bf16.msrb.mxu3 %v7524_v40 }
 0x4d3   :  { %3060 = vmatpush.bf16.msrb.mxu0 %v7525_v63  ;;  %3086 = vmatpush.bf16.msra.mxu2 %v7526_v44  ;;  %v7536_v63 = vld [vmem:[#allocation63_spill] sm:$0xff] }
 0x4d4   :  { %v7537_v44 = vld [vmem:[#allocation35_spill] sm:$0xff] }
 0x4d5   :  { %3072 = vmatpush.bf16.msrb.mxu1 %v7527_v62  ;;  %3098 = vmatpush.bf16.msrb.mxu3 %v7528_v15  ;;  %v7538_v62 = vld [vmem:[#allocation92_spill] sm:$0xff] }
 0x4d6   :  { %v7539_v15 = vld [vmem:[#allocation44_spill] sm:$0xff] }
 0x4d7   :  { %3061 = vmatpush.bf16.msrb.mxu0 %v7529_v42  ;;  %3087 = vmatpush.bf16.msra.mxu2 %v7530_v11  ;;  %v7540_v42 = vld [vmem:[#allocation69_spill] sm:$0xff]  ;;  %v7541_v11 = vld [vmem:[#allocation38_spill] sm:$0xff] }
 0x4d9   :  { %3073 = vmatpush.bf16.msrb.mxu1 %v7531_v27  ;;  %3099 = vmatpush.bf16.msrb.mxu3 %v7532_v5  ;;  %v7542_v27 = vld [vmem:[#allocation96_spill] sm:$0xff] }
 0x4da   :  { %v7543_v5 = vld [vmem:[#allocation40_spill] sm:$0xff] }
 0x4db   :  { %3062 = vmatpush.bf16.msrb.mxu0 %v7533_v35  ;;  %3088 = vmatpush.bf16.msra.mxu2 %v7534_v53  ;;  %v7544_v35 = vld [vmem:[#allocation97_spill] sm:$0xff] }
 0x4dc   :  { %v7545_v53 = vld [vmem:[#allocation49_spill] sm:$0xff] }
 0x4dd   :  { %3074 = vmatpush.bf16.msrb.mxu1 %v7537_v44  ;;  %3100 = vmatpush.bf16.msrb.mxu3 %v7538_v62  ;;  %v7548_v44 = vld [vmem:[#allocation103_spill] sm:$0xff]  ;;  %v7549_v62 = vld [vmem:[#allocation52_spill] sm:$0xff] }
 0x4df   :  { %3107 = vmatpush.bf16.msra.mxu0 %v7535_v54  ;;  %3133 = vmatpush.bf16.msrb.mxu2 %v7536_v63  ;;  %v7546_v54 = vld [vmem:[#allocation76_spill] sm:$0xff]  ;;  %v7547_v63 = vld [vmem:[#allocation45_spill] sm:$0xff] }
 0x4e1   :  { %3075 = vmatpush.bf16.msrb.mxu1 %v7541_v11  ;;  %3101 = vmatpush.bf16.msrb.mxu3 %v7542_v27  ;;  %v7552_v11 = vld [vmem:[#allocation108_spill] sm:$0xff]  ;;  %v7553_v27 = vld [vmem:[#allocation55_spill] sm:$0xff] }
 0x4e3   :  { %3108 = vmatpush.bf16.msra.mxu0 %v7539_v15  ;;  %3134 = vmatpush.bf16.msrb.mxu2 %v7540_v42  ;;  %v7550_v15 = vld [vmem:[#allocation79_spill] sm:$0xff]  ;;  %v7551_v42 = vld [vmem:[#allocation50_spill] sm:$0xff] }
 0x4e5   :  { %3120 = vmatpush.bf16.msra.mxu1 %v7543_v5  ;;  %3146 = vmatpush.bf16.msra.mxu3 %v7544_v35  ;;  %v7554_v5 = vld [vmem:[#allocation85_spill] sm:$0xff] }
 0x4e6   :  { %v7555_v35 = vld [vmem:[#allocation53_spill] sm:$0xff] }
 0x4e7   :  { %3109 = vmatpush.bf16.msra.mxu0 %v7545_v53  ;;  %3135 = vmatpush.bf16.msrb.mxu2 %v7546_v54  ;;  %v7556_v53 = vld [vmem:[#allocation111_spill] sm:$0xff]  ;;  %v7557_v54 = vld [vmem:[#allocation61_spill] sm:$0xff] }
 0x4e9   :  { %3121 = vmatpush.bf16.msra.mxu1 %v7547_v63  ;;  %3147 = vmatpush.bf16.msra.mxu3 %v7548_v44  ;;  %v7558_v63 = vld [vmem:[#allocation91_spill] sm:$0xff]  ;;  %v7559_v44 = vld [vmem:[#allocation56_spill] sm:$0xff] }
 0x4eb   :  { %3110 = vmatpush.bf16.msra.mxu0 %v7549_v62  ;;  %3136 = vmatpush.bf16.msrb.mxu2 %v7550_v15  ;;  %v7560_v62 = vld [vmem:[#allocation112_spill] sm:$0xff]  ;;  %v7561_v15 = vld [vmem:[#allocation67_spill] sm:$0xff] }
 0x4ed   :  { %3122 = vmatpush.bf16.msra.mxu1 %v7551_v42  ;;  %3148 = vmatpush.bf16.msra.mxu3 %v7552_v11  ;;  %v7562_v42 = vld [vmem:[#allocation95_spill] sm:$0xff]  ;;  %v7563_v11 = vld [vmem:[#allocation62_spill] sm:$0xff] }
 0x4ef   :  { %3111 = vmatpush.bf16.msra.mxu0 %v7553_v27  ;;  %3137 = vmatpush.bf16.msrb.mxu2 %v7554_v5  ;;  %v7564_v27 = vld [vmem:[#allocation115_spill] sm:$0xff] }
 0x4f0   :  { %v7565_v5 = vld [vmem:[#allocation71_spill] sm:$0xff] }
 0x4f1   :  { %3123 = vmatpush.bf16.msra.mxu1 %v7555_v35  ;;  %3149 = vmatpush.bf16.msra.mxu3 %v7556_v53  ;;  %v7566_v35 = vld [vmem:[#allocation100_spill] sm:$0xff] }
 0x4f2   :  { %v7567_v53 = vld [vmem:[#allocation68_spill] sm:$0xff] }
 0x4f3   :  { %3112 = vmatpush.bf16.msra.mxu0 %v7557_v54  ;;  %3138 = vmatpush.bf16.msrb.mxu2 %v7558_v63  ;;  %v7568_v54 = vld [vmem:[#allocation118_spill] sm:$0xff]  ;;  %v7569_v63 = vld [vmem:[#allocation72_spill] sm:$0xff] }
 0x4f5   :  { %3124 = vmatpush.bf16.msra.mxu1 %v7559_v44  ;;  %3150 = vmatpush.bf16.msra.mxu3 %v7560_v62  ;;  %v7570_v44 = vld [vmem:[#allocation119_spill] sm:$0xff]  ;;  %v7572_v62 = vld [vmem:[#allocation80_spill] sm:$0xff] }
 0x4f7   :  { %3113 = vmatpush.bf16.msra.mxu0 %v7561_v15  ;;  %3139 = vmatpush.bf16.msrb.mxu2 %v7562_v42  ;;  %v6369_v42 = vld [vmem:[%s6947_s4 + $0x18] sm:$0xff] }
 0x4f8   :  { %7571 = vst [vmem:[#allocation19_spill] sm:$0xff] %v6369_v42  ;;  %v250_v26 = vperm.slane %v6369_v42, 2 }
 0x4f9   :  { %3125 = vmatpush.bf16.msra.mxu1 %v7563_v11  ;;  %3151 = vmatpush.bf16.msra.mxu3 %v7564_v27  ;;  %v248_v27 = vperm.slane %v6369_v42, 0 }
 0x4fb   :  { %3114 = vmatpush.bf16.msra.mxu0 %v7565_v5  ;;  %3140 = vmatpush.bf16.msrb.mxu2 %v7566_v35  ;;  %v911_v35 = vadd.f32 %v7572_v62, %v248_v27 }
 0x4fd   :  { %3126 = vmatpush.bf16.msra.mxu1 %v7567_v53  ;;  %3152 = vmatpush.bf16.msra.mxu3 %v7568_v54  ;;  %v249_v54 = vperm.slane %v6369_v42, 1 }
 0x501   :  { %3127 = vmatpush.bf16.msra.mxu1 %v7569_v63  ;;  %3153 = vmatpush.bf16.msra.mxu3 %v7570_v44  ;;  %v7573_v44 = vld [vmem:[#allocation81_spill] sm:$0xff] }
 0x502   :  { %v924_v29 = vadd.f32 %v7573_v44, %v249_v54 }
 0x51b   :  { %v2812_v11 = vpop.f32.mrf.mxu0 }
 0x521   :  { %v2825_v15 = vpop.f32.mrf.mxu1  ;;  %v2838_v5 = vpop.f32.mrf.mxu2 }
 0x522   :  { %v2826_v40 = vadd.f32 %v2825_v15, %v2812_v11 }
 0x523   :  { %v2814_v53 = vpop.f32.mrf.mxu0 }
 0x524   :  { %v2959_v10 = vadd.f32 %v2826_v40, %v911_v35 }
 0x526   :  { %v4540_v63 = vmul.f32 -1.442695, %v2959_v10  ;;  %v7574_v10 = vld [vmem:[#allocation107_spill] sm:$0xff] }
 0x527   :  { %v2851_v2 = vpop.f32.mrf.mxu3  ;;  %v937_v27 = vadd.f32 %v7574_v10, %v250_v26 }
 0x528   :  { %4899 = vpow2.f32 %v4540_v63  ;;  %v2852_v45 = vadd.f32 %v2851_v2, %v2838_v5 }
 0x529   :  { %v2827_v30 = vpop.f32.mrf.mxu1  ;;  %v2840_v61 = vpop.f32.mrf.mxu2 }
 0x52a   :  { %v2960_v37 = vadd.f32 %v2852_v45, %v924_v29  ;;  %v251_v30 = vperm.slane %v6369_v42, 3 }
 0x52b   :  { %v2864_v33 = vpop.f32.mrf.mxu0 }
 0x52c   :  { %v4541_v52 = vmul.f32 -1.442695, %v2960_v37 }
 0x52e   :  { %v4900_v59 = vpop.eup %4899  ;;  %4901 = vpow2.f32 %v4541_v52 }
 0x52f   :  { %v2967_v62 = vadd.f32 1.0, %v4900_v59  ;;  %v2853_v15 = vpop.f32.mrf.mxu3  ;;  %v7575_v59 = vld [vmem:[#allocation123_spill] sm:$0xff] }
 0x530   :  { %v950_v2 = vadd.f32 %v7575_v59, %v251_v30 }
 0x531   :  { %4903 = vrcp.f32 %v2967_v62  ;;  %v2877_v11 = vpop.f32.mrf.mxu1  ;;  %v2890_v40 = vpop.f32.mrf.mxu2  ;;  %v2980_v30 = vand.u32 2147483648, %v2967_v62  ;;  %vm2974_vm4 = vweird.f32 %v2967_v62 }
 0x532   :  { %v2878_v35 = vadd.f32 %v2877_v11, %v2864_v33 }
 0x533   :  { %v2866_v44 = vpop.f32.mrf.mxu0 }
 0x534   :  { %v4902_v63 = vpop.eup %4901  ;;  %v2999_v61 = vadd.f32 %v2878_v35, %v937_v27 }
 0x535   :  { %v6378_v45 = vadd.f32 1.0, %v4902_v63 }
 0x536   :  { %v4542_v37 = vmul.f32 -1.442695, %v2999_v61 }
 0x537   :  { %v4904_v29 = vpop.eup %4903  ;;  %4905 = vrcp.f32 %v6378_v45  ;;  %v2903_v52 = vpop.f32.mrf.mxu3  ;;  %vm2989_vm8 = vweird.f32 %v6378_v45 }
 0x538   :  { %4907 = vpow2.f32 %v4542_v37  ;;  %v2904_v5 = vadd.f32 %v2903_v52, %v2890_v40  ;;  %v2970_v53 = vmul.f32 %v4904_v29, %v2967_v62  ;;  %vm2975_vm3 = vweird.f32 %v4904_v29 }
 0x539   :  { %v2879_v54 = vpop.f32.mrf.mxu1  ;;  %v2892_v26 = vpop.f32.mrf.mxu2  ;;  %v2978_v40 = vand.u32 2147483647, %v2967_v62  ;;  %vm2976_vm5 = vmor %vm2974_vm4, %vm2975_vm3 }
 0x53a   :  { %v3000_v33 = vadd.f32 %v2904_v5, %v950_v2  ;;  %v2971_v15 = vsub.f32 1.0, %v2970_v53  ;;  %v252_v2 = vperm.slane %v6369_v42, 4  ;;  %v2981_v26 = vor.u32 1.1754944e-38, %v2980_v30 }
 0x53b   :  { %v2916_v11 = vpop.f32.mrf.mxu0  ;;  %vm2979_vm6 = vcmp.eq.f32.partialorder %v2978_v40, 8.507059e+37 }
 0x53c   :  { %v4543_v10 = vmul.f32 -1.442695, %v3000_v33  ;;  %v2972_v44 = vmul.f32 %v4904_v29, %v2971_v15  ;;  %v963_v18 = vadd.f32 %v7577_v12, %v252_v2  ;;  %v7578_v2 = vld [vmem:[#allocation102_spill] sm:$0xff] }
 0x53d   :  { %v4906_v27 = vpop.eup %4905 }
 0x53e   :  { %v4908_v35 = vpop.eup %4907  ;;  %4909 = vpow2.f32 %v4543_v10  ;;  %v2973_v63 = vadd.f32 %v4904_v29, %v2972_v44  ;;  %v2985_v61 = vmul.f32 %v4906_v27, %v6378_v45  ;;  %v7576_v10 = vld [vmem:[#allocation139_spill] sm:$0xff]  ;;  %vm2990_vm7 = vweird.f32 %v4906_v27 }
 0x53f   :  { %v3007_v56 = vadd.f32 1.0, %v4908_v35  ;;  %v2905_v1 = vpop.f32.mrf.mxu3  ;;  %vm2991_vm9 = vmor %vm2989_vm8, %vm2990_vm7 }
 0x540   :  { %v2986_v37 = vsub.f32 1.0, %v2985_v61  ;;  %v2977_v53 = vsel %vm2976_vm5, %v4904_v29, %v2973_v63  ;;  %v2995_v61 = vand.u32 2147483648, %v6378_v45  ;;  %v2993_v29 = vand.u32 2147483647, %v6378_v45 }
 0x541   :  { %4911 = vrcp.f32 %v3007_v56  ;;  %v2929_v52 = vpop.f32.mrf.mxu1  ;;  %v2942_v59 = vpop.f32.mrf.mxu2  ;;  %v2982_v62 = vsel %vm2979_vm6, %v2981_v26, %v2977_v53  ;;  %v253_v63 = vperm.slane %v6369_v42, 5  ;;  %vm3014_vm12 = vweird.f32 %v3007_v56 }
 0x542   :  { %v2930_v5 = vadd.f32 %v2929_v52, %v2916_v11  ;;  %v2987_v54 = vmul.f32 %v4906_v27, %v2986_v37  ;;  %v2996_v53 = vor.u32 1.1754944e-38, %v2995_v61  ;;  %vm2994_vm10 = vcmp.eq.f32.partialorder %v2993_v29, 8.507059e+37 }
 0x543   :  { %v2918_v33 = vpop.f32.mrf.mxu0  ;;  %v976_v45 = vadd.f32 %v7578_v2, %v253_v63 }
 0x544   :  { %v4910_v15 = vpop.eup %4909  ;;  %v3039_v44 = vadd.f32 %v2930_v5, %v7576_v10  ;;  %v2988_v1 = vadd.f32 %v4906_v27, %v2987_v54  ;;  %v3018_v10 = vand.u32 2147483647, %v3007_v56 }
 0x545   :  { %v3008_v35 = vadd.f32 1.0, %v4910_v15  ;;  %v3020_v15 = vand.u32 2147483648, %v3007_v56 }
 0x546   :  { %v3041_v8 = vmul.f32 %v3039_v44, %v2982_v62  ;;  %v2992_v5 = vsel %vm2991_vm9, %v4906_v27, %v2988_v1  ;;  %vm3019_vm14 = vcmp.eq.f32.partialorder %v3018_v10, 8.507059e+37 }
 0x547   :  { %v4912_v11 = vpop.eup %4911  ;;  %4913 = vrcp.f32 %v3008_v35  ;;  %v2955_v30 = vpop.f32.mrf.mxu3  ;;  %v2997_v44 = vsel %vm2994_vm10, %v2996_v53, %v2992_v5  ;;  %v3035_v63 = vand.u32 2147483648, %v3008_v35  ;;  %v3033_v5 = vand.u32 2147483647, %v3008_v35 }
 0x548   :  { %v3010_v40 = vmul.f32 %v4912_v11, %v3007_v56  ;;  %v3043_v37 = vadd.f32 %v3041_v8, %v963_v18  ;;  %v2956_v52 = vadd.f32 %v2955_v30, %v2942_v59  ;;  %vm3015_vm11 = vweird.f32 %v4912_v11 }
 0x549   :  { %v2931_v54 = vpop.f32.mrf.mxu1  ;;  %v2944_v26 = vpop.f32.mrf.mxu2  ;;  %vm3016_vm13 = vmor %vm3014_vm12, %vm3015_vm11  ;;  %v3021_v59 = vor.u32 1.1754944e-38, %v3020_v15  ;;  %vm3029_vm0 = vweird.f32 %v3008_v35  ;;  %v3036_v56 = vor.u32 1.1754944e-38, %v3035_v63  ;;  %vm3034_vm2 = vcmp.eq.f32.partialorder %v3033_v5, 8.507059e+37  ;;  %v7582_v15 = vld [vmem:[#allocation132_spill] sm:$0xff]  ;;  %v7593_v63 = vld [vmem:[#allocation27_spill] sm:$0xff] }
 0x54a   :  { %v3011_v33 = vsub.f32 1.0, %v3010_v40  ;;  %4915 = vtanh.f32 %v3043_v37  ;;  %v3040_v12 = vadd.f32 %v2956_v52, %v5888_v16  ;;  %v7597_v5 = vld [vmem:[#allocation29_spill] sm:$0xff] }
 0x54c   :  { %v3012_v62 = vmul.f32 %v4912_v11, %v3011_v33  ;;  %v3042_v42 = vmul.f32 %v3040_v12, %v2997_v44  ;;  %v7583_v44 = vld [vmem:[#allocation16_spill] sm:$0xff] }
 0x54d   :  { %v4914_v55 = vpop.eup %4913 }
 0x54e   :  { %v3013_v8 = vadd.f32 %v4912_v11, %v3012_v62  ;;  %v3025_v18 = vmul.f32 %v4914_v55, %v3008_v35  ;;  %v3044_v27 = vadd.f32 %v3042_v42, %v976_v45  ;;  %vm3030_vm15 = vweird.f32 %v4914_v55  ;;  %v7581_v45 = vld [vmem:[#allocation110_spill] sm:$0xff]  ;;  %v7584_v62 = vld [vmem:[#allocation57_spill] sm:$0xff] }
 0x54f   :  { %v2957_v1 = vpop.f32.mrf.mxu3  ;;  %vm3031_vm1 = vmor %vm3029_vm0, %vm3030_vm15 }
 0x550   :  { %v4916_v61 = vpop.eup %4915  ;;  %v3026_v29 = vsub.f32 1.0, %v3025_v18  ;;  %v3017_v30 = vsel %vm3016_vm13, %v4912_v11, %v3013_v8  ;;  %4917 = vtanh.f32 %v3044_v27  ;;  %v7585_v8 = vld [vmem:[#allocation21_spill] sm:$0xff]  ;;  %v7586_v18 = vld [vmem:[#allocation36_spill] sm:$0xff]  ;;  %v7587_v27 = vld [vmem:[#allocation18_spill] sm:$0xff] }
 0x551   :  { %v3022_v40 = vsel %vm3019_vm14, %v3021_v59, %v3017_v30  ;;  %v3047_v37 = vsub.f32 %v6261_v0, %v4916_v61  ;;  %v7588_v59 = vld [vmem:[#allocation64_spill] sm:$0xff]  ;;  %v7589_v1 = vld [vmem:[#allocation23_spill] sm:$0xff]  ;;  %v7592_v30 = vld [vmem:[#allocation70_spill] sm:$0xff] }
 0x552   :  { %v3027_v52 = vmul.f32 %v4914_v55, %v3026_v29  ;;  %v7591_v29 = vld [vmem:[#allocation22_spill] sm:$0xff] }
 0x553   :  { %v3049_v53 = vmul.f32 %v3047_v37, %v3022_v40  ;;  %v7594_v40 = vld [vmem:[#allocation46_spill] sm:$0xff]  ;;  %v7595_v37 = vld [vmem:[#allocation24_spill] sm:$0xff] }
 0x554   :  { %v3028_v54 = vadd.f32 %v4914_v55, %v3027_v52  ;;  %v7596_v52 = vld [vmem:[#allocation75_spill] sm:$0xff] }
 0x555   :  { %v6393_v42 = vadd.f32 %v4916_v61, %v3049_v53  ;;  %v7590_v61 = vld [vmem:[#allocation43_spill] sm:$0xff] }
 0x556   :  { %v4918_v26 = vpop.eup %4917  ;;  %v3032_v10 = vsel %vm3031_vm1, %v4914_v55, %v3028_v54  ;;  %v7580_v55 = vld [vmem:[#allocation33_spill] sm:$0xff]  ;;  %v7598_v53 = vld [vmem:[#allocation51_spill] sm:$0xff]  ;;  %v7599_v54 = vld [vmem:[#allocation28_spill] sm:$0xff] }
 0x557   :  { %v3053_v11 = vpack.c.bf16 %v6393_v42, %v6393_v42  ;;  %v3037_v33 = vsel %vm3034_vm2, %v3036_v56, %v3032_v10  ;;  %v3048_v12 = vsub.f32 %v6268_v17, %v4918_v26  ;;  %v7579_v17 = vld [vmem:[#allocation17_spill] sm:$0xff]  ;;  %v7600_v56 = vld [vmem:[#allocation82_spill] sm:$0xff] }
 0x558   :  { %v7602_v10 = vld [vmem:[#allocation54_spill] sm:$0xff] }
 0x559   :  { %v3050_v0 = vmul.f32 %v3048_v12, %v3037_v33  ;;  %3063 = vmatmul.bf16.vlgmr.msrb.gmra.mxu0 %v3053_v11  ;;  %3089 = vmatmul.bf16.vlgmr.msra.gmra.mxu2 %v3053_v11  ;;  %v7604_v33 = vld [vmem:[#allocation86_spill] sm:$0xff]  ;;  %v7605_v12 = vld [vmem:[#allocation37_spill] sm:$0xff] }
 0x55a   :  { %3159 = vmatpush.bf16.msrb.mxu0 %v7291_v31  ;;  %3185 = vmatpush.bf16.msra.mxu2 %v5645_v49 }
 0x55b   :  { %v6400_v35 = vadd.f32 %v4918_v26, %v3050_v0  ;;  %v7601_v26 = vld [vmem:[#allocation34_spill] sm:$0xff]  ;;  %v7606_v0 = vld [vmem:[#allocation60_spill] sm:$0xff] }
 0x55d   :  { %v3054_v2 = vpack.c.bf16 %v6400_v35, %v6400_v35 }
 0x55e   :  { %3160 = vmatpush.bf16.msrb.mxu0 %v7292_v50  ;;  %3186 = vmatpush.bf16.msra.mxu2 %v5659_v41 }
 0x55f   :  { %3076 = vmatmul.bf16.vlgmr.msrb.gmra.mxu1 %v3054_v2  ;;  %3102 = vmatmul.bf16.vlgmr.msrb.gmra.mxu3 %v3054_v2 }
 0x560   :  { %3172 = vmatpush.bf16.msrb.mxu1 %v7303_v48  ;;  %3198 = vmatpush.bf16.msrb.mxu3 %v5725_v7 }
 0x562   :  { %3161 = vmatpush.bf16.msrb.mxu0 %v7293_v9  ;;  %3187 = vmatpush.bf16.msra.mxu2 %v5676_v14 }
 0x564   :  { %3173 = vmatpush.bf16.msrb.mxu1 %v7304_v58  ;;  %3199 = vmatpush.bf16.msrb.mxu3 %v5734_v46 }
 0x566   :  { %3162 = vmatpush.bf16.msrb.mxu0 %v7294_v47  ;;  %3188 = vmatpush.bf16.msra.mxu2 %v5686_v20 }
 0x568   :  { %3174 = vmatpush.bf16.msrb.mxu1 %v7305_v60  ;;  %3200 = vmatpush.bf16.msrb.mxu3 %v5746_v34 }
 0x569   :  { %3115 = vmatmul.bf16.vlgmr.msra.gmra.mxu0 %v3053_v11  ;;  %3141 = vmatmul.bf16.vlgmr.msrb.gmra.mxu2 %v3053_v11 }
 0x56a   :  { %3163 = vmatpush.bf16.msrb.mxu0 %v7295_v19  ;;  %3189 = vmatpush.bf16.msra.mxu2 %v5700_v32 }
 0x56c   :  { %3175 = vmatpush.bf16.msrb.mxu1 %v7306_v38  ;;  %3201 = vmatpush.bf16.msrb.mxu3 %v5757_v21 }
 0x56e   :  { %3164 = vmatpush.bf16.msrb.mxu0 %v7296_v36  ;;  %3190 = vmatpush.bf16.msra.mxu2 %v5708_v24 }
 0x56f   :  { %3128 = vmatmul.bf16.vlgmr.msra.gmra.mxu1 %v3054_v2  ;;  %3154 = vmatmul.bf16.vlgmr.msra.gmra.mxu3 %v3054_v2 }
 0x570   :  { %3176 = vmatpush.bf16.msrb.mxu1 %v7307_v6  ;;  %3202 = vmatpush.bf16.msrb.mxu3 %v7308_v4 }
 0x572   :  { %3165 = vmatpush.bf16.msrb.mxu0 %v7297_v3  ;;  %3191 = vmatpush.bf16.msra.mxu2 %v5720_v57 }
 0x574   :  { %3177 = vmatpush.bf16.msrb.mxu1 %v7311_v23  ;;  %3203 = vmatpush.bf16.msrb.mxu3 %v7312_v39 }
 0x576   :  { %3166 = vmatpush.bf16.msrb.mxu0 %v7298_v25  ;;  %3192 = vmatpush.bf16.msra.mxu2 %v7363_v28 }
 0x578   :  { %3178 = vmatpush.bf16.msrb.mxu1 %v7315_v43  ;;  %3204 = vmatpush.bf16.msrb.mxu3 %v7316_v51 }
 0x579   :  { %3167 = vmatmul.bf16.vlgmr.msrb.gmra.mxu0 %v3053_v11  ;;  %3193 = vmatmul.bf16.vlgmr.msra.gmra.mxu2 %v3053_v11  ;;  %v7603_v11 = vld [vmem:[#allocation30_spill] sm:$0xff] }
 0x57a   :  { %3307 = vmatpush.bf16.msra.mxu0 %v7299_v13  ;;  %3333 = vmatpush.bf16.msrb.mxu2 %v5414_v22 }
 0x57c   :  { %3179 = vmatpush.bf16.msrb.mxu1 %v7581_v45  ;;  %3205 = vmatpush.bf16.msrb.mxu3 %v7582_v15  ;;  %v7650_v15 = vld [vmem:[#allocation124_spill] sm:$0xff] }
 0x57e   :  { %3308 = vmatpush.bf16.msra.mxu0 %v7579_v17  ;;  %3334 = vmatpush.bf16.msrb.mxu2 %v7580_v55 }
 0x57f   :  { %3180 = vmatmul.bf16.vlgmr.msrb.gmra.mxu1 %v3054_v2  ;;  %3206 = vmatmul.bf16.vlgmr.msrb.gmra.mxu3 %v3054_v2  ;;  %v7607_v2 = vld [vmem:[#allocation39_spill] sm:$0xff] }
 0x580   :  { %3320 = vmatpush.bf16.msra.mxu1 %v7583_v44  ;;  %3346 = vmatpush.bf16.msra.mxu3 %v7584_v62 }
 0x582   :  { %3309 = vmatpush.bf16.msra.mxu0 %v7585_v8  ;;  %3335 = vmatpush.bf16.msrb.mxu2 %v7586_v18 }
 0x584   :  { %3321 = vmatpush.bf16.msra.mxu1 %v7587_v27  ;;  %3347 = vmatpush.bf16.msra.mxu3 %v7588_v59  ;;  %v6505_v59 = vld [vmem:[%s6947_s4 + $0x20] sm:$0xff] }
 0x585   :  { %7646 = vst [vmem:[#allocation31_spill] sm:$0xff] %v6505_v59 }
 0x586   :  { %3310 = vmatpush.bf16.msra.mxu0 %v7589_v1  ;;  %3336 = vmatpush.bf16.msrb.mxu2 %v7590_v61 }
 0x588   :  { %3322 = vmatpush.bf16.msra.mxu1 %v7591_v29  ;;  %3348 = vmatpush.bf16.msra.mxu3 %v7592_v30  ;;  %v7645_v29 = vld [vmem:[#allocation130_spill] sm:$0xff] }
 0x58a   :  { %3311 = vmatpush.bf16.msra.mxu0 %v7593_v63  ;;  %3337 = vmatpush.bf16.msrb.mxu2 %v7594_v40 }
 0x58c   :  { %3323 = vmatpush.bf16.msra.mxu1 %v7595_v37  ;;  %3349 = vmatpush.bf16.msra.mxu3 %v7596_v52 }
 0x58e   :  { %3312 = vmatpush.bf16.msra.mxu0 %v7597_v5  ;;  %3338 = vmatpush.bf16.msrb.mxu2 %v7598_v53  ;;  %v7608_v5 = vld [vmem:[#allocation63_spill] sm:$0xff] }
 0x58f   :  { %v7609_v53 = vld [vmem:[#allocation35_spill] sm:$0xff] }
 0x590   :  { %3324 = vmatpush.bf16.msra.mxu1 %v7599_v54  ;;  %3350 = vmatpush.bf16.msra.mxu3 %v7600_v56  ;;  %v7610_v54 = vld [vmem:[#allocation92_spill] sm:$0xff] }
 0x591   :  { %v7611_v56 = vld [vmem:[#allocation44_spill] sm:$0xff] }
 0x592   :  { %3313 = vmatpush.bf16.msra.mxu0 %v7601_v26  ;;  %3339 = vmatpush.bf16.msrb.mxu2 %v7602_v10  ;;  %v7612_v26 = vld [vmem:[#allocation69_spill] sm:$0xff]  ;;  %v7613_v10 = vld [vmem:[#allocation38_spill] sm:$0xff] }
 0x594   :  { %3325 = vmatpush.bf16.msra.mxu1 %v7603_v11  ;;  %3351 = vmatpush.bf16.msra.mxu3 %v7604_v33  ;;  %v7614_v11 = vld [vmem:[#allocation96_spill] sm:$0xff] }
 0x595   :  { %v7615_v33 = vld [vmem:[#allocation40_spill] sm:$0xff] }
 0x596   :  { %3314 = vmatpush.bf16.msra.mxu0 %v7605_v12  ;;  %3340 = vmatpush.bf16.msrb.mxu2 %v7606_v0  ;;  %v7616_v12 = vld [vmem:[#allocation97_spill] sm:$0xff] }
 0x597   :  { %v7617_v0 = vld [vmem:[#allocation49_spill] sm:$0xff] }
 0x598   :  { %3326 = vmatpush.bf16.msra.mxu1 %v7609_v53  ;;  %3352 = vmatpush.bf16.msra.mxu3 %v7610_v54  ;;  %v7620_v53 = vld [vmem:[#allocation103_spill] sm:$0xff]  ;;  %v7621_v54 = vld [vmem:[#allocation52_spill] sm:$0xff] }
 0x59a   :  { %3359 = vmatpush.bf16.msrb.mxu0 %v7607_v2  ;;  %3385 = vmatpush.bf16.msra.mxu2 %v7608_v5  ;;  %v7618_v2 = vld [vmem:[#allocation76_spill] sm:$0xff]  ;;  %v7619_v5 = vld [vmem:[#allocation45_spill] sm:$0xff] }
 0x59c   :  { %3327 = vmatpush.bf16.msra.mxu1 %v7613_v10  ;;  %3353 = vmatpush.bf16.msra.mxu3 %v7614_v11  ;;  %v7624_v10 = vld [vmem:[#allocation108_spill] sm:$0xff]  ;;  %v7625_v11 = vld [vmem:[#allocation55_spill] sm:$0xff] }
 0x59e   :  { %3360 = vmatpush.bf16.msrb.mxu0 %v7611_v56  ;;  %3386 = vmatpush.bf16.msra.mxu2 %v7612_v26  ;;  %v7622_v56 = vld [vmem:[#allocation79_spill] sm:$0xff]  ;;  %v7623_v26 = vld [vmem:[#allocation50_spill] sm:$0xff] }
 0x5a0   :  { %3372 = vmatpush.bf16.msrb.mxu1 %v7615_v33  ;;  %3398 = vmatpush.bf16.msrb.mxu3 %v7616_v12  ;;  %v7626_v33 = vld [vmem:[#allocation85_spill] sm:$0xff] }
 0x5a1   :  { %v7627_v12 = vld [vmem:[#allocation53_spill] sm:$0xff] }
 0x5a2   :  { %3361 = vmatpush.bf16.msrb.mxu0 %v7617_v0  ;;  %3387 = vmatpush.bf16.msra.mxu2 %v7618_v2  ;;  %v7628_v0 = vld [vmem:[#allocation111_spill] sm:$0xff]  ;;  %v7629_v2 = vld [vmem:[#allocation61_spill] sm:$0xff] }
 0x5a4   :  { %3373 = vmatpush.bf16.msrb.mxu1 %v7619_v5  ;;  %3399 = vmatpush.bf16.msrb.mxu3 %v7620_v53  ;;  %v7630_v5 = vld [vmem:[#allocation91_spill] sm:$0xff]  ;;  %v7631_v53 = vld [vmem:[#allocation56_spill] sm:$0xff] }
 0x5a6   :  { %3362 = vmatpush.bf16.msrb.mxu0 %v7621_v54  ;;  %3388 = vmatpush.bf16.msra.mxu2 %v7622_v56  ;;  %v7632_v54 = vld [vmem:[#allocation112_spill] sm:$0xff]  ;;  %v7633_v56 = vld [vmem:[#allocation67_spill] sm:$0xff] }
 0x5a8   :  { %3374 = vmatpush.bf16.msrb.mxu1 %v7623_v26  ;;  %3400 = vmatpush.bf16.msrb.mxu3 %v7624_v10  ;;  %v7634_v26 = vld [vmem:[#allocation95_spill] sm:$0xff]  ;;  %v7635_v10 = vld [vmem:[#allocation62_spill] sm:$0xff] }
 0x5aa   :  { %3363 = vmatpush.bf16.msrb.mxu0 %v7625_v11  ;;  %3389 = vmatpush.bf16.msra.mxu2 %v7626_v33  ;;  %v7636_v11 = vld [vmem:[#allocation115_spill] sm:$0xff] }
 0x5ab   :  { %v7637_v33 = vld [vmem:[#allocation71_spill] sm:$0xff] }
 0x5ac   :  { %3375 = vmatpush.bf16.msrb.mxu1 %v7627_v12  ;;  %3401 = vmatpush.bf16.msrb.mxu3 %v7628_v0  ;;  %v7638_v12 = vld [vmem:[#allocation100_spill] sm:$0xff] }
 0x5ad   :  { %v7639_v0 = vld [vmem:[#allocation68_spill] sm:$0xff] }
 0x5ae   :  { %3364 = vmatpush.bf16.msrb.mxu0 %v7629_v2  ;;  %3390 = vmatpush.bf16.msra.mxu2 %v7630_v5  ;;  %v7640_v2 = vld [vmem:[#allocation118_spill] sm:$0xff]  ;;  %v7641_v5 = vld [vmem:[#allocation72_spill] sm:$0xff] }
 0x5b0   :  { %3376 = vmatpush.bf16.msrb.mxu1 %v7631_v53  ;;  %3402 = vmatpush.bf16.msrb.mxu3 %v7632_v54  ;;  %v7642_v53 = vld [vmem:[#allocation119_spill] sm:$0xff] }
 0x5b2   :  { %3365 = vmatpush.bf16.msrb.mxu0 %v7633_v56  ;;  %3391 = vmatpush.bf16.msra.mxu2 %v7634_v26  ;;  %v7643_v56 = vld [vmem:[#allocation19_spill] sm:$0xff] }
 0x5b3   :  { %v254_v52 = vperm.slane %v7643_v56, 6 }
 0x5b4   :  { %3377 = vmatpush.bf16.msrb.mxu1 %v7635_v10  ;;  %3403 = vmatpush.bf16.msrb.mxu3 %v7636_v11  ;;  %v7644_v10 = vld [vmem:[#allocation117_spill] sm:$0xff] }
 0x5b5   :  { %v989_v40 = vadd.f32 %v7644_v10, %v254_v52 }
 0x5b6   :  { %3366 = vmatpush.bf16.msrb.mxu0 %v7637_v33  ;;  %3392 = vmatpush.bf16.msra.mxu2 %v7638_v12  ;;  %v255_v33 = vperm.slane %v7643_v56, 7  ;;  %v256_v56 = vperm.slane %v6505_v59, 0 }
 0x5b8   :  { %3378 = vmatpush.bf16.msrb.mxu1 %v7639_v0  ;;  %3404 = vmatpush.bf16.msrb.mxu3 %v7640_v2  ;;  %v1002_v2 = vadd.f32 %v7645_v29, %v255_v33 }
 0x5bc   :  { %3379 = vmatpush.bf16.msrb.mxu1 %v7641_v5  ;;  %3405 = vmatpush.bf16.msrb.mxu3 %v7642_v53 }
 0x5d6   :  { %v3064_v54 = vpop.f32.mrf.mxu0 }
 0x5dc   :  { %v3077_v26 = vpop.f32.mrf.mxu1  ;;  %v3090_v37 = vpop.f32.mrf.mxu2 }
 0x5dd   :  { %v3078_v11 = vadd.f32 %v3077_v26, %v3064_v54 }
 0x5de   :  { %v3066_v63 = vpop.f32.mrf.mxu0 }
 0x5df   :  { %v3211_v12 = vadd.f32 %v3078_v11, %v989_v40  ;;  %v257_v11 = vperm.slane %v6505_v59, 1 }
 0x5e1   :  { %v4544_v30 = vmul.f32 -1.442695, %v3211_v12 }
 0x5e2   :  { %v3103_v0 = vpop.f32.mrf.mxu3 }
 0x5e3   :  { %4919 = vpow2.f32 %v4544_v30  ;;  %v3104_v5 = vadd.f32 %v3103_v0, %v3090_v37  ;;  %v7647_v37 = vld [vmem:[#allocation113_spill] sm:$0xff] }
 0x5e4   :  { %v3079_v61 = vpop.f32.mrf.mxu1  ;;  %v3092_v53 = vpop.f32.mrf.mxu2 }
 0x5e5   :  { %v3212_v1 = vadd.f32 %v3104_v5, %v1002_v2  ;;  %v1015_v61 = vadd.f32 %v7647_v37, %v256_v56 }
 0x5e6   :  { %v3116_v52 = vpop.f32.mrf.mxu0 }
 0x5e7   :  { %v4545_v54 = vmul.f32 -1.442695, %v3212_v1 }
 0x5e9   :  { %v4920_v63 = vpop.eup %4919  ;;  %4921 = vpow2.f32 %v4545_v54  ;;  %v7648_v54 = vld [vmem:[#allocation114_spill] sm:$0xff] }
 0x5ea   :  { %v3219_v40 = vadd.f32 1.0, %v4920_v63  ;;  %v3105_v26 = vpop.f32.mrf.mxu3  ;;  %v1028_v63 = vadd.f32 %v7648_v54, %v257_v11 }
 0x5ec   :  { %4923 = vrcp.f32 %v3219_v40  ;;  %v3129_v29 = vpop.f32.mrf.mxu1  ;;  %v3142_v30 = vpop.f32.mrf.mxu2  ;;  %v3232_v11 = vand.u32 2147483648, %v3219_v40  ;;  %vm3226_vm4 = vweird.f32 %v3219_v40 }
 0x5ed   :  { %v3130_v53 = vadd.f32 %v3129_v29, %v3116_v52 }
 0x5ee   :  { %v3118_v5 = vpop.f32.mrf.mxu0 }
 0x5ef   :  { %v4922_v10 = vpop.eup %4921  ;;  %v3251_v33 = vadd.f32 %v3130_v53, %v1015_v61 }
 0x5f0   :  { %v6510_v12 = vadd.f32 1.0, %v4922_v10 }
 0x5f1   :  { %v4546_v1 = vmul.f32 -1.442695, %v3251_v33 }
 0x5f2   :  { %v4924_v0 = vpop.eup %4923  ;;  %4925 = vrcp.f32 %v6510_v12  ;;  %v3155_v2 = vpop.f32.mrf.mxu3  ;;  %vm3241_vm8 = vweird.f32 %v6510_v12 }
 0x5f3   :  { %4927 = vpow2.f32 %v4546_v1  ;;  %v3156_v26 = vadd.f32 %v3155_v2, %v3142_v30  ;;  %v3222_v27 = vmul.f32 %v4924_v0, %v3219_v40  ;;  %vm3227_vm3 = vweird.f32 %v4924_v0 }
 0x5f4   :  { %v3131_v18 = vpop.f32.mrf.mxu1  ;;  %v3144_v56 = vpop.f32.mrf.mxu2  ;;  %v3230_v30 = vand.u32 2147483647, %v3219_v40  ;;  %vm3228_vm5 = vmor %vm3226_vm4, %vm3227_vm3  ;;  %v258_v2 = vperm.slane %v6505_v59, 2 }
 0x5f5   :  { %v3252_v52 = vadd.f32 %v3156_v26, %v1028_v63  ;;  %v3223_v29 = vsub.f32 1.0, %v3222_v27  ;;  %v3233_v56 = vor.u32 1.1754944e-38, %v3232_v11 }
 0x5f6   :  { %v3168_v37 = vpop.f32.mrf.mxu0  ;;  %vm3231_vm6 = vcmp.eq.f32.partialorder %v3230_v30, 8.507059e+37  ;;  %v1041_v45 = vadd.f32 %v7650_v15, %v258_v2  ;;  %v7651_v2 = vld [vmem:[#allocation135_spill] sm:$0xff] }
 0x5f7   :  { %v4547_v5 = vmul.f32 -1.442695, %v3252_v52  ;;  %v3224_v8 = vmul.f32 %v4924_v0, %v3223_v29  ;;  %v7649_v29 = vld [vmem:[#allocation139_spill] sm:$0xff] }
 0x5f8   :  { %v4926_v61 = vpop.eup %4925 }
 0x5f9   :  { %v4928_v53 = vpop.eup %4927  ;;  %4929 = vpow2.f32 %v4547_v5  ;;  %v3225_v10 = vadd.f32 %v4924_v0, %v3224_v8  ;;  %v3237_v33 = vmul.f32 %v4926_v61, %v6510_v12  ;;  %vm3242_vm7 = vweird.f32 %v4926_v61 }
 0x5fa   :  { %v3259_v62 = vadd.f32 1.0, %v4928_v53  ;;  %v3157_v44 = vpop.f32.mrf.mxu3  ;;  %vm3243_vm9 = vmor %vm3241_vm8, %vm3242_vm7 }
 0x5fb   :  { %v3238_v1 = vsub.f32 1.0, %v3237_v33  ;;  %v3229_v63 = vsel %vm3228_vm5, %v4924_v0, %v3225_v10  ;;  %v3247_v33 = vand.u32 2147483648, %v6510_v12  ;;  %v3245_v0 = vand.u32 2147483647, %v6510_v12 }
 0x5fc   :  { %4931 = vrcp.f32 %v3259_v62  ;;  %v3181_v18 = vpop.f32.mrf.mxu1  ;;  %v3194_v27 = vpop.f32.mrf.mxu2  ;;  %v3234_v40 = vsel %vm3231_vm6, %v3233_v56, %v3229_v63  ;;  %v259_v10 = vperm.slane %v6505_v59, 3  ;;  %vm3266_vm12 = vweird.f32 %v3259_v62 }
 0x5fd   :  { %v3182_v54 = vadd.f32 %v3181_v18, %v3168_v37  ;;  %v3239_v26 = vmul.f32 %v4926_v61, %v3238_v1  ;;  %v3248_v63 = vor.u32 1.1754944e-38, %v3247_v33  ;;  %vm3246_vm10 = vcmp.eq.f32.partialorder %v3245_v0, 8.507059e+37 }
 0x5fe   :  { %v3170_v8 = vpop.f32.mrf.mxu0  ;;  %v1054_v12 = vadd.f32 %v7651_v2, %v259_v10 }
 0x5ff   :  { %v4930_v52 = vpop.eup %4929  ;;  %v3291_v5 = vadd.f32 %v3182_v54, %v7649_v29  ;;  %v3240_v44 = vadd.f32 %v4926_v61, %v3239_v26  ;;  %v3270_v29 = vand.u32 2147483647, %v3259_v62 }
 0x600   :  { %v3260_v53 = vadd.f32 1.0, %v4930_v52  ;;  %v3272_v52 = vand.u32 2147483648, %v3259_v62 }
 0x601   :  { %v3293_v55 = vmul.f32 %v3291_v5, %v3234_v40  ;;  %v3244_v54 = vsel %vm3243_vm9, %v4926_v61, %v3240_v44  ;;  %vm3271_vm14 = vcmp.eq.f32.partialorder %v3270_v29, 8.507059e+37 }
 0x602   :  { %v4932_v37 = vpop.eup %4931  ;;  %4933 = vrcp.f32 %v3260_v53  ;;  %v3207_v11 = vpop.f32.mrf.mxu3  ;;  %v3249_v5 = vsel %vm3246_vm10, %v3248_v63, %v3244_v54  ;;  %v3287_v10 = vand.u32 2147483648, %v3260_v53  ;;  %v3285_v54 = vand.u32 2147483647, %v3260_v53 }
 0x603   :  { %v3262_v30 = vmul.f32 %v4932_v37, %v3259_v62  ;;  %v3295_v1 = vadd.f32 %v3293_v55, %v1041_v45  ;;  %v3208_v18 = vadd.f32 %v3207_v11, %v3194_v27  ;;  %vm3267_vm11 = vweird.f32 %v4932_v37 }
 0x604   :  { %v3183_v26 = vpop.f32.mrf.mxu1  ;;  %v3196_v56 = vpop.f32.mrf.mxu2  ;;  %vm3268_vm13 = vmor %vm3266_vm12, %vm3267_vm11  ;;  %v3273_v27 = vor.u32 1.1754944e-38, %v3272_v52  ;;  %vm3281_vm0 = vweird.f32 %v3260_v53  ;;  %v3288_v62 = vor.u32 1.1754944e-38, %v3287_v10  ;;  %vm3286_vm2 = vcmp.eq.f32.partialorder %v3285_v54, 8.507059e+37  ;;  %v7655_v52 = vld [vmem:[#allocation132_spill] sm:$0xff] }
 0x605   :  { %v3263_v8 = vsub.f32 1.0, %v3262_v30  ;;  %4935 = vtanh.f32 %v3295_v1  ;;  %v3292_v15 = vadd.f32 %v3208_v18, %v5888_v16  ;;  %v7668_v10 = vld [vmem:[#allocation24_spill] sm:$0xff] }
 0x606   :  { %v7672_v54 = vld [vmem:[#allocation28_spill] sm:$0xff] }
 0x607   :  { %v3264_v40 = vmul.f32 %v4932_v37, %v3263_v8  ;;  %v3294_v59 = vmul.f32 %v3292_v15, %v3249_v5  ;;  %v7656_v5 = vld [vmem:[#allocation16_spill] sm:$0xff] }
 0x608   :  { %v4934_v17 = vpop.eup %4933 }
 0x609   :  { %v3265_v55 = vadd.f32 %v4932_v37, %v3264_v40  ;;  %v3277_v45 = vmul.f32 %v4934_v17, %v3260_v53  ;;  %v3296_v61 = vadd.f32 %v3294_v59, %v1054_v12  ;;  %vm3282_vm15 = vweird.f32 %v4934_v17  ;;  %v7654_v12 = vld [vmem:[#allocation110_spill] sm:$0xff]  ;;  %v7657_v40 = vld [vmem:[#allocation57_spill] sm:$0xff] }
 0x60a   :  { %v3209_v44 = vpop.f32.mrf.mxu3  ;;  %vm3283_vm1 = vmor %vm3281_vm0, %vm3282_vm15 }
 0x60b   :  { %v4936_v33 = vpop.eup %4935  ;;  %v3278_v0 = vsub.f32 1.0, %v3277_v45  ;;  %v3269_v11 = vsel %vm3268_vm13, %v4932_v37, %v3265_v55  ;;  %4937 = vtanh.f32 %v3296_v61  ;;  %v7660_v55 = vld [vmem:[#allocation18_spill] sm:$0xff]  ;;  %v7661_v45 = vld [vmem:[#allocation64_spill] sm:$0xff]  ;;  %v7662_v61 = vld [vmem:[#allocation23_spill] sm:$0xff] }
 0x60c   :  { %v3274_v30 = vsel %vm3271_vm14, %v3273_v27, %v3269_v11  ;;  %v3299_v1 = vsub.f32 %v6393_v42, %v4936_v33  ;;  %v7663_v27 = vld [vmem:[#allocation43_spill] sm:$0xff]  ;;  %v7664_v44 = vld [vmem:[#allocation22_spill] sm:$0xff] }
 0x60d   :  { %v3279_v18 = vmul.f32 %v4934_v17, %v3278_v0  ;;  %v7666_v0 = vld [vmem:[#allocation27_spill] sm:$0xff]  ;;  %v7667_v11 = vld [vmem:[#allocation46_spill] sm:$0xff] }
 0x60e   :  { %v3301_v63 = vmul.f32 %v3299_v1, %v3274_v30  ;;  %v7669_v30 = vld [vmem:[#allocation75_spill] sm:$0xff]  ;;  %v7670_v1 = vld [vmem:[#allocation29_spill] sm:$0xff] }
 0x60f   :  { %v3280_v26 = vadd.f32 %v4934_v17, %v3279_v18  ;;  %v7671_v18 = vld [vmem:[#allocation51_spill] sm:$0xff] }
 0x610   :  { %v6525_v59 = vadd.f32 %v4936_v33, %v3301_v63  ;;  %v7665_v33 = vld [vmem:[#allocation70_spill] sm:$0xff] }
 0x611   :  { %v4938_v56 = vpop.eup %4937  ;;  %v3284_v29 = vsel %vm3283_vm1, %v4934_v17, %v3280_v26  ;;  %v7653_v17 = vld [vmem:[#allocation33_spill] sm:$0xff]  ;;  %v7673_v63 = vld [vmem:[#allocation82_spill] sm:$0xff] }
 0x612   :  { %v3305_v37 = vpack.c.bf16 %v6525_v59, %v6525_v59  ;;  %v3289_v8 = vsel %vm3286_vm2, %v3288_v62, %v3284_v29  ;;  %v3300_v15 = vsub.f32 %v6400_v35, %v4938_v56  ;;  %v7652_v35 = vld [vmem:[#allocation17_spill] sm:$0xff]  ;;  %v7674_v26 = vld [vmem:[#allocation34_spill] sm:$0xff] }
 0x613   :  { %v7675_v62 = vld [vmem:[#allocation54_spill] sm:$0xff] }
 0x614   :  { %v3302_v42 = vmul.f32 %v3300_v15, %v3289_v8  ;;  %3315 = vmatmul.bf16.vlgmr.msra.gmra.mxu0 %v3305_v37  ;;  %3341 = vmatmul.bf16.vlgmr.msrb.gmra.mxu2 %v3305_v37  ;;  %v7677_v29 = vld [vmem:[#allocation86_spill] sm:$0xff]  ;;  %v7679_v8 = vld [vmem:[#allocation60_spill] sm:$0xff]  ;;  %v7680_v15 = vld [vmem:[#allocation39_spill] sm:$0xff] }
 0x615   :  { %3411 = vmatpush.bf16.msra.mxu0 %v7291_v31  ;;  %3437 = vmatpush.bf16.msrb.mxu2 %v5645_v49 }
 0x616   :  { %v6532_v53 = vadd.f32 %v4938_v56, %v3302_v42  ;;  %v7676_v56 = vld [vmem:[#allocation30_spill] sm:$0xff]  ;;  %v7681_v42 = vld [vmem:[#allocation63_spill] sm:$0xff] }
 0x618   :  { %v3306_v2 = vpack.c.bf16 %v6532_v53, %v6532_v53 }
 0x619   :  { %3412 = vmatpush.bf16.msra.mxu0 %v7292_v50  ;;  %3438 = vmatpush.bf16.msrb.mxu2 %v5659_v41 }
 0x61a   :  { %3328 = vmatmul.bf16.vlgmr.msra.gmra.mxu1 %v3306_v2  ;;  %3354 = vmatmul.bf16.vlgmr.msra.gmra.mxu3 %v3306_v2 }
 0x61b   :  { %3424 = vmatpush.bf16.msra.mxu1 %v7303_v48  ;;  %3450 = vmatpush.bf16.msra.mxu3 %v5725_v7 }
 0x61d   :  { %3413 = vmatpush.bf16.msra.mxu0 %v7293_v9  ;;  %3439 = vmatpush.bf16.msrb.mxu2 %v5676_v14 }
 0x61f   :  { %3425 = vmatpush.bf16.msra.mxu1 %v7304_v58  ;;  %3451 = vmatpush.bf16.msra.mxu3 %v5734_v46 }
 0x621   :  { %3414 = vmatpush.bf16.msra.mxu0 %v7294_v47  ;;  %3440 = vmatpush.bf16.msrb.mxu2 %v5686_v20 }
 0x623   :  { %3426 = vmatpush.bf16.msra.mxu1 %v7305_v60  ;;  %3452 = vmatpush.bf16.msra.mxu3 %v5746_v34 }
 0x624   :  { %3367 = vmatmul.bf16.vlgmr.msrb.gmra.mxu0 %v3305_v37  ;;  %3393 = vmatmul.bf16.vlgmr.msra.gmra.mxu2 %v3305_v37 }
 0x625   :  { %3415 = vmatpush.bf16.msra.mxu0 %v7295_v19  ;;  %3441 = vmatpush.bf16.msrb.mxu2 %v5700_v32 }
 0x627   :  { %3427 = vmatpush.bf16.msra.mxu1 %v7306_v38  ;;  %3453 = vmatpush.bf16.msra.mxu3 %v5757_v21 }
 0x629   :  { %3416 = vmatpush.bf16.msra.mxu0 %v7296_v36  ;;  %3442 = vmatpush.bf16.msrb.mxu2 %v5708_v24 }
 0x62a   :  { %3380 = vmatmul.bf16.vlgmr.msrb.gmra.mxu1 %v3306_v2  ;;  %3406 = vmatmul.bf16.vlgmr.msrb.gmra.mxu3 %v3306_v2 }
 0x62b   :  { %3428 = vmatpush.bf16.msra.mxu1 %v7307_v6  ;;  %3454 = vmatpush.bf16.msra.mxu3 %v7308_v4 }
 0x62d   :  { %3417 = vmatpush.bf16.msra.mxu0 %v7297_v3  ;;  %3443 = vmatpush.bf16.msrb.mxu2 %v5720_v57 }
 0x62f   :  { %3429 = vmatpush.bf16.msra.mxu1 %v7311_v23  ;;  %3455 = vmatpush.bf16.msra.mxu3 %v7312_v39 }
 0x631   :  { %3418 = vmatpush.bf16.msra.mxu0 %v7298_v25  ;;  %3444 = vmatpush.bf16.msrb.mxu2 %v7363_v28 }
 0x633   :  { %3430 = vmatpush.bf16.msra.mxu1 %v7315_v43  ;;  %3456 = vmatpush.bf16.msra.mxu3 %v7316_v51 }
 0x634   :  { %3419 = vmatmul.bf16.vlgmr.msra.gmra.mxu0 %v3305_v37  ;;  %3445 = vmatmul.bf16.vlgmr.msrb.gmra.mxu2 %v3305_v37  ;;  %v7678_v37 = vld [vmem:[#allocation37_spill] sm:$0xff] }
 0x635   :  { %3559 = vmatpush.bf16.msrb.mxu0 %v7299_v13  ;;  %3585 = vmatpush.bf16.msra.mxu2 %v5414_v22  ;;  %v7658_v22 = vld [vmem:[#allocation21_spill] sm:$0xff]  ;;  %v7659_v13 = vld [vmem:[#allocation36_spill] sm:$0xff] }
 0x637   :  { %3431 = vmatpush.bf16.msra.mxu1 %v7654_v12  ;;  %3457 = vmatpush.bf16.msra.mxu3 %v7655_v52 }
 0x639   :  { %3560 = vmatpush.bf16.msrb.mxu0 %v7652_v35  ;;  %3586 = vmatpush.bf16.msra.mxu2 %v7653_v17  ;;  %v7683_v35 = vld [vmem:[#allocation92_spill] sm:$0xff] }
 0x63a   :  { %3432 = vmatmul.bf16.vlgmr.msra.gmra.mxu1 %v3306_v2  ;;  %3458 = vmatmul.bf16.vlgmr.msra.gmra.mxu3 %v3306_v2  ;;  %v7682_v2 = vld [vmem:[#allocation35_spill] sm:$0xff]  ;;  %v7684_v17 = vld [vmem:[#allocation44_spill] sm:$0xff] }
 0x63b   :  { %3572 = vmatpush.bf16.msrb.mxu1 %v7656_v5  ;;  %3598 = vmatpush.bf16.msrb.mxu3 %v7657_v40  ;;  %v7685_v5 = vld [vmem:[#allocation69_spill] sm:$0xff]  ;;  %v7686_v40 = vld [vmem:[#allocation38_spill] sm:$0xff] }
 0x63d   :  { %3561 = vmatpush.bf16.msrb.mxu0 %v7658_v22  ;;  %3587 = vmatpush.bf16.msra.mxu2 %v7659_v13  ;;  %v7687_v22 = vld [vmem:[#allocation96_spill] sm:$0xff] }
 0x63e   :  { %v7688_v13 = vld [vmem:[#allocation40_spill] sm:$0xff] }
 0x63f   :  { %3573 = vmatpush.bf16.msrb.mxu1 %v7660_v55  ;;  %3599 = vmatpush.bf16.msrb.mxu3 %v7661_v45  ;;  %v7689_v55 = vld [vmem:[#allocation97_spill] sm:$0xff] }
 0x640   :  { %v7690_v45 = vld [vmem:[#allocation49_spill] sm:$0xff] }
 0x641   :  { %3562 = vmatpush.bf16.msrb.mxu0 %v7662_v61  ;;  %3588 = vmatpush.bf16.msra.mxu2 %v7663_v27  ;;  %v7691_v61 = vld [vmem:[#allocation76_spill] sm:$0xff]  ;;  %v7692_v27 = vld [vmem:[#allocation45_spill] sm:$0xff] }
 0x643   :  { %3574 = vmatpush.bf16.msrb.mxu1 %v7664_v44  ;;  %3600 = vmatpush.bf16.msrb.mxu3 %v7665_v33  ;;  %v7693_v44 = vld [vmem:[#allocation103_spill] sm:$0xff]  ;;  %v7694_v33 = vld [vmem:[#allocation52_spill] sm:$0xff] }
 0x645   :  { %3563 = vmatpush.bf16.msrb.mxu0 %v7666_v0  ;;  %3589 = vmatpush.bf16.msra.mxu2 %v7667_v11  ;;  %v7695_v0 = vld [vmem:[#allocation79_spill] sm:$0xff]  ;;  %v7696_v11 = vld [vmem:[#allocation50_spill] sm:$0xff] }
 0x647   :  { %3575 = vmatpush.bf16.msrb.mxu1 %v7668_v10  ;;  %3601 = vmatpush.bf16.msrb.mxu3 %v7669_v30  ;;  %v7697_v10 = vld [vmem:[#allocation108_spill] sm:$0xff]  ;;  %v7698_v30 = vld [vmem:[#allocation55_spill] sm:$0xff] }
 0x649   :  { %3564 = vmatpush.bf16.msrb.mxu0 %v7670_v1  ;;  %3590 = vmatpush.bf16.msra.mxu2 %v7671_v18  ;;  %v7699_v1 = vld [vmem:[#allocation85_spill] sm:$0xff] }
 0x64a   :  { %v7700_v18 = vld [vmem:[#allocation53_spill] sm:$0xff] }
 0x64b   :  { %3576 = vmatpush.bf16.msrb.mxu1 %v7672_v54  ;;  %3602 = vmatpush.bf16.msrb.mxu3 %v7673_v63  ;;  %v7701_v54 = vld [vmem:[#allocation111_spill] sm:$0xff]  ;;  %v7702_v63 = vld [vmem:[#allocation61_spill] sm:$0xff] }
 0x64d   :  { %3565 = vmatpush.bf16.msrb.mxu0 %v7674_v26  ;;  %3591 = vmatpush.bf16.msra.mxu2 %v7675_v62  ;;  %v7703_v26 = vld [vmem:[#allocation91_spill] sm:$0xff]  ;;  %v7704_v62 = vld [vmem:[#allocation56_spill] sm:$0xff] }
 0x64f   :  { %3577 = vmatpush.bf16.msrb.mxu1 %v7676_v56  ;;  %3603 = vmatpush.bf16.msrb.mxu3 %v7677_v29  ;;  %v7705_v56 = vld [vmem:[#allocation112_spill] sm:$0xff]  ;;  %v7706_v29 = vld [vmem:[#allocation67_spill] sm:$0xff] }
 0x651   :  { %3566 = vmatpush.bf16.msrb.mxu0 %v7678_v37  ;;  %3592 = vmatpush.bf16.msra.mxu2 %v7679_v8  ;;  %v7707_v37 = vld [vmem:[#allocation95_spill] sm:$0xff]  ;;  %v7708_v8 = vld [vmem:[#allocation62_spill] sm:$0xff] }
 0x653   :  { %3578 = vmatpush.bf16.msrb.mxu1 %v7682_v2  ;;  %3604 = vmatpush.bf16.msrb.mxu3 %v7683_v35  ;;  %v7711_v2 = vld [vmem:[#allocation100_spill] sm:$0xff] }
 0x654   :  { %v7712_v35 = vld [vmem:[#allocation68_spill] sm:$0xff] }
 0x655   :  { %3611 = vmatpush.bf16.msra.mxu0 %v7680_v15  ;;  %3637 = vmatpush.bf16.msrb.mxu2 %v7681_v42  ;;  %v7709_v15 = vld [vmem:[#allocation115_spill] sm:$0xff] }
 0x656   :  { %v7710_v42 = vld [vmem:[#allocation71_spill] sm:$0xff] }
 0x657   :  { %3579 = vmatpush.bf16.msrb.mxu1 %v7686_v40  ;;  %3605 = vmatpush.bf16.msrb.mxu3 %v7687_v22  ;;  %v7715_v40 = vld [vmem:[#allocation119_spill] sm:$0xff] }
 0x659   :  { %3612 = vmatpush.bf16.msra.mxu0 %v7684_v17  ;;  %3638 = vmatpush.bf16.msrb.mxu2 %v7685_v5  ;;  %v7713_v17 = vld [vmem:[#allocation118_spill] sm:$0xff]  ;;  %v7714_v5 = vld [vmem:[#allocation72_spill] sm:$0xff] }
 0x65b   :  { %3624 = vmatpush.bf16.msra.mxu1 %v7688_v13  ;;  %3650 = vmatpush.bf16.msra.mxu3 %v7689_v55  ;;  %v7716_v13 = vld [vmem:[#allocation31_spill] sm:$0xff] }
 0x65c   :  { %v260_v55 = vperm.slane %v7716_v13, 4 }
 0x65d   :  { %3613 = vmatpush.bf16.msra.mxu0 %v7690_v45  ;;  %3639 = vmatpush.bf16.msrb.mxu2 %v7691_v61 }
 0x65f   :  { %3625 = vmatpush.bf16.msra.mxu1 %v7692_v27  ;;  %3651 = vmatpush.bf16.msra.mxu3 %v7693_v44  ;;  %v7717_v27 = vld [vmem:[#allocation121_spill] sm:$0xff] }
 0x660   :  { %v1067_v44 = vadd.f32 %v7717_v27, %v260_v55 }
 0x661   :  { %3614 = vmatpush.bf16.msra.mxu0 %v7694_v33  ;;  %3640 = vmatpush.bf16.msrb.mxu2 %v7695_v0 }
 0x663   :  { %3626 = vmatpush.bf16.msra.mxu1 %v7696_v11  ;;  %3652 = vmatpush.bf16.msra.mxu3 %v7697_v10  ;;  %v261_v11 = vperm.slane %v7716_v13, 5 }
 0x665   :  { %3615 = vmatpush.bf16.msra.mxu0 %v7698_v30  ;;  %3641 = vmatpush.bf16.msrb.mxu2 %v7699_v1 }
 0x667   :  { %3627 = vmatpush.bf16.msra.mxu1 %v7700_v18  ;;  %3653 = vmatpush.bf16.msra.mxu3 %v7701_v54  ;;  %v7718_v18 = vld [vmem:[#allocation122_spill] sm:$0xff] }
 0x668   :  { %v1080_v54 = vadd.f32 %v7718_v18, %v261_v11 }
 0x669   :  { %3616 = vmatpush.bf16.msra.mxu0 %v7702_v63  ;;  %3642 = vmatpush.bf16.msrb.mxu2 %v7703_v26 }
 0x66b   :  { %3628 = vmatpush.bf16.msra.mxu1 %v7704_v62  ;;  %3654 = vmatpush.bf16.msra.mxu3 %v7705_v56 }
 0x66d   :  { %3617 = vmatpush.bf16.msra.mxu0 %v7706_v29  ;;  %3643 = vmatpush.bf16.msrb.mxu2 %v7707_v37 }
 0x66f   :  { %3629 = vmatpush.bf16.msra.mxu1 %v7708_v8  ;;  %3655 = vmatpush.bf16.msra.mxu3 %v7709_v15  ;;  %v262_v15 = vperm.slane %v7716_v13, 6 }
 0x671   :  { %3618 = vmatpush.bf16.msra.mxu0 %v7710_v42  ;;  %3644 = vmatpush.bf16.msrb.mxu2 %v7711_v2 }
 0x673   :  { %3630 = vmatpush.bf16.msra.mxu1 %v7712_v35  ;;  %3656 = vmatpush.bf16.msra.mxu3 %v7713_v17 }
 0x677   :  { %3631 = vmatpush.bf16.msra.mxu1 %v7714_v5  ;;  %3657 = vmatpush.bf16.msra.mxu3 %v7715_v40  ;;  %v7719_v5 = vld [vmem:[#allocation131_spill] sm:$0xff] }
 0x678   :  { %v1093_v40 = vadd.f32 %v7719_v5, %v262_v15 }
 0x691   :  { %v3316_v22 = vpop.f32.mrf.mxu0 }
 0x697   :  { %v3329_v45 = vpop.f32.mrf.mxu1  ;;  %v3342_v61 = vpop.f32.mrf.mxu2 }
 0x698   :  { %v3330_v33 = vadd.f32 %v3329_v45, %v3316_v22 }
 0x699   :  { %v3318_v0 = vpop.f32.mrf.mxu0 }
 0x69a   :  { %v3463_v10 = vadd.f32 %v3330_v33, %v1067_v44 }
 0x69c   :  { %v4548_v30 = vmul.f32 -1.442695, %v3463_v10  ;;  %v7720_v10 = vld [vmem:[#allocation137_spill] sm:$0xff] }
 0x69d   :  { %v3355_v1 = vpop.f32.mrf.mxu3 }
 0x69e   :  { %4939 = vpow2.f32 %v4548_v30  ;;  %v3356_v63 = vadd.f32 %v3355_v1, %v3342_v61  ;;  %v263_v61 = vperm.slane %v7716_v13, 7 }
 0x69f   :  { %v3331_v26 = vpop.f32.mrf.mxu1  ;;  %v3344_v62 = vpop.f32.mrf.mxu2 }
 0x6a0   :  { %v3464_v56 = vadd.f32 %v3356_v63, %v1080_v54  ;;  %v1106_v30 = vadd.f32 %v7720_v10, %v263_v61 }
 0x6a1   :  { %v3368_v29 = vpop.f32.mrf.mxu0 }
 0x6a2   :  { %v4549_v37 = vmul.f32 -1.442695, %v3464_v56 }
 0x6a4   :  { %v4940_v8 = vpop.eup %4939  ;;  %4941 = vpow2.f32 %v4549_v37 }
 0x6a5   :  { %v3471_v42 = vadd.f32 1.0, %v4940_v8  ;;  %v3357_v2 = vpop.f32.mrf.mxu3 }
 0x6a7   :  { %4943 = vrcp.f32 %v3471_v42  ;;  %v3381_v35 = vpop.f32.mrf.mxu1  ;;  %v3394_v17 = vpop.f32.mrf.mxu2  ;;  %vm3478_vm4 = vweird.f32 %v3471_v42 }
 0x6a8   :  { %v3382_v22 = vadd.f32 %v3381_v35, %v3368_v29  ;;  %v6645_v35 = vld [vmem:[%s6947_s4 + $0x28] sm:$0xff] }
 0x6a9   :  { %v3370_v55 = vpop.f32.mrf.mxu0  ;;  %7721 = vst [vmem:[#allocation73_spill] sm:$0xff] %v6645_v35 }
 0x6aa   :  { %v4942_v45 = vpop.eup %4941  ;;  %v3503_v27 = vadd.f32 %v3382_v22, %v1093_v40  ;;  %v3484_v40 = vand.u32 2147483648, %v3471_v42  ;;  %v3482_v22 = vand.u32 2147483647, %v3471_v42 }
 0x6ab   :  { %v6637_v44 = vadd.f32 1.0, %v4942_v45 }
 0x6ac   :  { %v4550_v33 = vmul.f32 -1.442695, %v3503_v27  ;;  %v264_v27 = vperm.slane %v6645_v35, 0  ;;  %vm3483_vm6 = vcmp.eq.f32.partialorder %v3482_v22, 8.507059e+37 }
 0x6ad   :  { %v4944_v0 = vpop.eup %4943  ;;  %4945 = vrcp.f32 %v6637_v44  ;;  %v3407_v11 = vpop.f32.mrf.mxu3  ;;  %vm3493_vm8 = vweird.f32 %v6637_v44 }
 0x6ae   :  { %4947 = vpow2.f32 %v4550_v33  ;;  %v3408_v1 = vadd.f32 %v3407_v11, %v3394_v17  ;;  %v3474_v18 = vmul.f32 %v4944_v0, %v3471_v42  ;;  %vm3479_vm3 = vweird.f32 %v4944_v0 }
 0x6af   :  { %v3383_v54 = vpop.f32.mrf.mxu1  ;;  %v3396_v63 = vpop.f32.mrf.mxu2  ;;  %vm3480_vm5 = vmor %vm3478_vm4, %vm3479_vm3 }
 0x6b0   :  { %v3504_v26 = vadd.f32 %v3408_v1, %v1106_v30  ;;  %v3475_v62 = vsub.f32 1.0, %v3474_v18  ;;  %v3485_v30 = vor.u32 1.1754944e-38, %v3484_v40  ;;  %v7722_v54 = vld [vmem:[#allocation139_spill] sm:$0xff] }
 0x6b1   :  { %v3420_v56 = vpop.f32.mrf.mxu0 }
 0x6b2   :  { %v4551_v29 = vmul.f32 -1.442695, %v3504_v26  ;;  %v3476_v13 = vmul.f32 %v4944_v0, %v3475_v62 }
 0x6b3   :  { %v4946_v37 = vpop.eup %4945 }
 0x6b4   :  { %v4948_v8 = vpop.eup %4947  ;;  %4949 = vpow2.f32 %v4551_v29  ;;  %v3477_v15 = vadd.f32 %v4944_v0, %v3476_v13  ;;  %v3489_v2 = vmul.f32 %v4946_v37, %v6637_v44  ;;  %vm3494_vm7 = vweird.f32 %v4946_v37  ;;  %v7723_v13 = vld [vmem:[#allocation127_spill] sm:$0xff] }
 0x6b5   :  { %v3511_v17 = vadd.f32 1.0, %v4948_v8  ;;  %v3409_v5 = vpop.f32.mrf.mxu3  ;;  %v3499_v29 = vand.u32 2147483648, %v6637_v44  ;;  %v1119_v8 = vadd.f32 %v7723_v13, %v264_v27  ;;  %vm3495_vm9 = vmor %vm3493_vm8, %vm3494_vm7 }
 0x6b6   :  { %v3490_v55 = vsub.f32 1.0, %v3489_v2  ;;  %v3481_v11 = vsel %vm3480_vm5, %v4944_v0, %v3477_v15  ;;  %v3497_v0 = vand.u32 2147483647, %v6637_v44  ;;  %v265_v15 = vperm.slane %v6645_v35, 1 }
 0x6b7   :  { %4951 = vrcp.f32 %v3511_v17  ;;  %v3433_v45 = vpop.f32.mrf.mxu1  ;;  %v3446_v61 = vpop.f32.mrf.mxu2  ;;  %v3486_v42 = vsel %vm3483_vm6, %v3485_v30, %v3481_v11  ;;  %v3522_v13 = vand.u32 2147483647, %v3511_v17  ;;  %vm3518_vm12 = vweird.f32 %v3511_v17 }
 0x6b8   :  { %v3434_v33 = vadd.f32 %v3433_v45, %v3420_v56  ;;  %v3491_v10 = vmul.f32 %v4946_v37, %v3490_v55  ;;  %vm3498_vm10 = vcmp.eq.f32.partialorder %v3497_v0, 8.507059e+37 }
 0x6b9   :  { %v3422_v1 = vpop.f32.mrf.mxu0  ;;  %vm3523_vm14 = vcmp.eq.f32.partialorder %v3522_v13, 8.507059e+37 }
 0x6ba   :  { %v4950_v18 = vpop.eup %4949  ;;  %v3543_v63 = vadd.f32 %v3434_v33, %v7722_v54  ;;  %v3492_v26 = vadd.f32 %v4946_v37, %v3491_v10  ;;  %v3500_v33 = vor.u32 1.1754944e-38, %v3499_v29  ;;  %v7724_v1 = vld [vmem:[#allocation128_spill] sm:$0xff] }
 0x6bb   :  { %v3512_v62 = vadd.f32 1.0, %v4950_v18  ;;  %v1132_v44 = vadd.f32 %v7724_v1, %v265_v15  ;;  %v3524_v18 = vand.u32 2147483648, %v3511_v17 }
 0x6bc   :  { %v3545_v2 = vmul.f32 %v3543_v63, %v3486_v42  ;;  %v3496_v45 = vsel %vm3495_vm9, %v4946_v37, %v3492_v26 }
 0x6bd   :  { %v4952_v56 = vpop.eup %4951  ;;  %4953 = vrcp.f32 %v3512_v62  ;;  %v3459_v5 = vpop.f32.mrf.mxu3  ;;  %v3501_v63 = vsel %vm3498_vm10, %v3500_v33, %v3496_v45  ;;  %v3525_v26 = vor.u32 1.1754944e-38, %v3524_v18  ;;  %v3539_v15 = vand.u32 2147483648, %v3512_v62  ;;  %v4809_v18 = vld [vmem:[%s6950_s7 + $0xe4] sm:$0xf0] }
 0x6be   :  { %v3514_v40 = vmul.f32 %v4952_v56, %v3511_v17  ;;  %v3547_v22 = vadd.f32 %v3545_v2, %v1119_v8  ;;  %v3460_v55 = vadd.f32 %v3459_v5, %v3446_v61  ;;  %vm3519_vm11 = vweird.f32 %v4952_v56 }
 0x6bf   :  { %v3435_v11 = vpop.f32.mrf.mxu1  ;;  %v3448_v10 = vpop.f32.mrf.mxu2  ;;  %vm3520_vm13 = vmor %vm3518_vm12, %vm3519_vm11  ;;  %v3537_v45 = vand.u32 2147483647, %v3512_v62  ;;  %vm3533_vm0 = vweird.f32 %v3512_v62  ;;  %v3540_v17 = vor.u32 1.1754944e-38, %v3539_v15  ;;  %v4592_v15 = vld [vmem:[%s6950_s7 + $0x48] sm:$0xf0] }
 0x6c0   :  { %v3515_v30 = vsub.f32 1.0, %v3514_v40  ;;  %4955 = vtanh.f32 %v3547_v22  ;;  %v3544_v27 = vadd.f32 %v3460_v55, %v5888_v16 }
 0x6c1   :  { %vm3538_vm2 = vcmp.eq.f32.partialorder %v3537_v45, 8.507059e+37  ;;  %v4807_v45 = vld [vmem:[%s6950_s7 + $0xd4] sm:$0xf0] }
 0x6c2   :  { %v3516_v42 = vmul.f32 %v4952_v56, %v3515_v30  ;;  %v3546_v54 = vmul.f32 %v3544_v27, %v3501_v63  ;;  %v4808_v63 = vld [vmem:[%s6950_s7 + $0xe4] sm:$0xf] }
 0x6c3   :  { %v4954_v35 = vpop.eup %4953 }
 0x6c4   :  { %v3517_v8 = vadd.f32 %v4952_v56, %v3516_v42  ;;  %v3529_v37 = vmul.f32 %v4954_v35, %v3512_v62  ;;  %v3548_v61 = vadd.f32 %v3546_v54, %v1132_v44  ;;  %vm3534_vm15 = vweird.f32 %v4954_v35 }
 0x6c5   :  { %v3461_v29 = vpop.f32.mrf.mxu3  ;;  %vm3535_vm1 = vmor %vm3533_vm0, %vm3534_vm15 }
 0x6c6   :  { %v4956_v2 = vpop.eup %4955  ;;  %v3530_v0 = vsub.f32 1.0, %v3529_v37  ;;  %v3521_v5 = vsel %vm3520_vm13, %v4952_v56, %v3517_v8  ;;  %4957 = vtanh.f32 %v3548_v61  ;;  %v4672_v37 = vld [vmem:[%s6950_s7 + $0xe8] sm:$0xf0]  ;;  %v4789_v29 = vld [vmem:[%s6950_s7 + $0x44] sm:$0xf0] }
 0x6c7   :  { %v3526_v40 = vsel %vm3523_vm14, %v3525_v26, %v3521_v5  ;;  %v3551_v22 = vsub.f32 %v6525_v59, %v4956_v2  ;;  %v4675_v61 = vor.u32 %v4808_v63, %v4672_v37  ;;  %v4590_v26 = vld [vmem:[%s6950_s7 + $0x40] sm:$0xf]  ;;  %v4568_v37 = vld [vmem:[%s6950_s7 + $0x18] sm:$0xf0] }
 0x6c8   :  { %v3531_v55 = vmul.f32 %v4954_v35, %v3530_v0  ;;  %v4591_v5 = vor.u32 %v4789_v29, %v4590_v26 }
 0x6c9   :  { %v3553_v33 = vmul.f32 %v3551_v22, %v3526_v40 }
 0x6ca   :  { %v3532_v11 = vadd.f32 %v4954_v35, %v3531_v55  ;;  %v4662_v55 = vld [vmem:[%s6950_s7 + $0xd0] sm:$0xf] }
 0x6cb   :  { %v6657_v54 = vadd.f32 %v4956_v2, %v3553_v33  ;;  %v4788_v2 = vld [vmem:[%s6950_s7 + $0x44] sm:$0xf]  ;;  %v4806_v33 = vld [vmem:[%s6950_s7 + $0xd4] sm:$0xf] }
 0x6cc   :  { %v4958_v10 = vpop.eup %4957  ;;  %v3536_v30 = vsel %vm3535_vm1, %v4954_v35, %v3532_v11  ;;  %v4670_v35 = vld [vmem:[%s6950_s7 + $0xe0] sm:$0xf]  ;;  %v4595_v22 = vor.u32 %v4788_v2, %v4592_v15 }
 0x6cd   :  { %v3557_v56 = vpack.c.bf16 %v6657_v54, %v6657_v54  ;;  %v3541_v27 = vsel %vm3538_vm2, %v3540_v17, %v3536_v30  ;;  %v3552_v1 = vsub.f32 %v6532_v53, %v4958_v10  ;;  %v4600_v53 = vld [vmem:[%s6950_s7 + $0x58] sm:$0xf0]  ;;  %v4671_v8 = vor.u32 %v4809_v18, %v4670_v35  ;;  %v7728_v35 = vld [vmem:[#allocation133_spill] sm:$0xff]  ;;  %v4638_v2 = vld [vmem:[%s6950_s7 + $0xa0] sm:$0xf] }
 0x6ce   :  { %v7727_v11 = vld [vmem:[#allocation11_spill] sm:$0xff]  ;;  %v4663_v30 = vor.u32 %v4807_v45, %v4662_v55  ;;  %v4800_v55 = vld [vmem:[%s6950_s7 + $0xa4] sm:$0xf]  ;;  %v4640_v45 = vld [vmem:[%s6950_s7 + $0xa8] sm:$0xf0] }
 0x6cf   :  { %v3554_v59 = vmul.f32 %v3552_v1, %v3541_v27  ;;  %3567 = vmatmul.bf16.vlgmr.msrb.gmra.mxu0 %v3557_v56  ;;  %3593 = vmatmul.bf16.vlgmr.msra.gmra.mxu2 %v3557_v56 }
 0x6d0   :  { %3663 = vmatpush.bf16.msrb.mxu0 %v7291_v31  ;;  %3689 = vmatpush.bf16.msra.mxu2 %v5645_v49  ;;  %v4795_v49 = vld [vmem:[%s6950_s7 + $0x74] sm:$0xf0] }
 0x6d1   :  { %v6664_v62 = vadd.f32 %v4958_v10, %v3554_v59 }
 0x6d3   :  { %v3558_v44 = vpack.c.bf16 %v6664_v62, %v6664_v62 }
 0x6d4   :  { %3664 = vmatpush.bf16.msrb.mxu0 %v7292_v50  ;;  %3690 = vmatpush.bf16.msra.mxu2 %v5659_v41  ;;  %v4794_v41 = vld [vmem:[%s6950_s7 + $0x74] sm:$0xf] }
 0x6d5   :  { %3580 = vmatmul.bf16.vlgmr.msrb.gmra.mxu1 %v3558_v44  ;;  %3606 = vmatmul.bf16.vlgmr.msrb.gmra.mxu3 %v3558_v44 }
 0x6d6   :  { %3676 = vmatpush.bf16.msrb.mxu1 %v7303_v48  ;;  %3702 = vmatpush.bf16.msrb.mxu3 %v5725_v7  ;;  %v4606_v7 = vld [vmem:[%s6950_s7 + $0x60] sm:$0xf]  ;;  %v4680_v48 = vld [vmem:[%s6950_s7 + $0xf8] sm:$0xf0] }
 0x6d8   :  { %3665 = vmatpush.bf16.msrb.mxu0 %v7293_v9  ;;  %3691 = vmatpush.bf16.msra.mxu2 %v5676_v14  ;;  %v4608_v9 = vld [vmem:[%s6950_s7 + $0x68] sm:$0xf0] }
 0x6da   :  { %3677 = vmatpush.bf16.msrb.mxu1 %v7304_v58  ;;  %3703 = vmatpush.bf16.msrb.mxu3 %v5734_v46  ;;  %v4793_v46 = vld [vmem:[%s6950_s7 + $0x64] sm:$0xf0] }
 0x6db   :  { %v4607_v50 = vor.u32 %v4793_v46, %v4606_v7  ;;  %v4654_v7 = vld [vmem:[%s6950_s7 + $0xc0] sm:$0xf]  ;;  %v4805_v46 = vld [vmem:[%s6950_s7 + $0xc4] sm:$0xf0] }
 0x6dc   :  { %3666 = vmatpush.bf16.msrb.mxu0 %v7294_v47  ;;  %3692 = vmatpush.bf16.msra.mxu2 %v5686_v20  ;;  %v4616_v20 = vld [vmem:[%s6950_s7 + $0x78] sm:$0xf0] }
 0x6de   :  { %3678 = vmatpush.bf16.msrb.mxu1 %v7305_v60  ;;  %3704 = vmatpush.bf16.msrb.mxu3 %v5746_v34  ;;  %v4792_v34 = vld [vmem:[%s6950_s7 + $0x64] sm:$0xf] }
 0x6df   :  { %3619 = vmatmul.bf16.vlgmr.msra.gmra.mxu0 %v3557_v56  ;;  %3645 = vmatmul.bf16.vlgmr.msrb.gmra.mxu2 %v3557_v56  ;;  %v4611_v47 = vor.u32 %v4792_v34, %v4608_v9  ;;  %v4804_v34 = vld [vmem:[%s6950_s7 + $0xc4] sm:$0xf]  ;;  %v4656_v9 = vld [vmem:[%s6950_s7 + $0xc8] sm:$0xf0] }
 0x6e0   :  { %3667 = vmatpush.bf16.msrb.mxu0 %v7295_v19  ;;  %3693 = vmatpush.bf16.msra.mxu2 %v5700_v32  ;;  %v4619_v32 = vor.u32 %v4794_v41, %v4616_v20  ;;  %v4678_v19 = vld [vmem:[%s6950_s7 + $0xf0] sm:$0xf]  ;;  %v4584_v20 = vld [vmem:[%s6950_s7 + $0x38] sm:$0xf0] }
 0x6e2   :  { %3679 = vmatpush.bf16.msrb.mxu1 %v7306_v38  ;;  %3705 = vmatpush.bf16.msrb.mxu3 %v5757_v21  ;;  %v7725_v21 = vld [vmem:[#allocation73_spill] sm:$0xff] }
 0x6e3   :  { %v266_v31 = vperm.slane %v7725_v21, 2  ;;  %v267_v42 = vperm.slane %v7725_v21, 3  ;;  %v269_v15 = vperm.slane %v7725_v21, 5 }
 0x6e4   :  { %3668 = vmatpush.bf16.msrb.mxu0 %v7296_v36  ;;  %3694 = vmatpush.bf16.msra.mxu2 %v5708_v24  ;;  %v4811_v36 = vld [vmem:[%s6950_s7 + $0xf4] sm:$0xf0] }
 0x6e5   :  { %3632 = vmatmul.bf16.vlgmr.msra.gmra.mxu1 %v3558_v44  ;;  %3658 = vmatmul.bf16.vlgmr.msra.gmra.mxu3 %v3558_v44  ;;  %v1158_v17 = vadd.f32 %v7727_v11, %v267_v42  ;;  %v4643_v11 = vor.u32 %v4800_v55, %v4640_v45  ;;  %v7731_v55 = vld [vmem:[#allocation138_spill] sm:$0xff] }
 0x6e6   :  { %3680 = vmatpush.bf16.msrb.mxu1 %v7307_v6  ;;  %3706 = vmatpush.bf16.msrb.mxu3 %v7308_v4  ;;  %v4598_v6 = vld [vmem:[%s6950_s7 + $0x50] sm:$0xf]  ;;  %v4791_v4 = vld [vmem:[%s6950_s7 + $0x54] sm:$0xf0] }
 0x6e8   :  { %3669 = vmatpush.bf16.msrb.mxu0 %v7297_v3  ;;  %3695 = vmatpush.bf16.msra.mxu2 %v5720_v57  ;;  %v4614_v57 = vld [vmem:[%s6950_s7 + $0x70] sm:$0xf]  ;;  %v4810_v3 = vld [vmem:[%s6950_s7 + $0xf4] sm:$0xf] }
 0x6e9   :  { %v4615_v14 = vor.u32 %v4795_v49, %v4614_v57  ;;  %v4683_v38 = vor.u32 %v4810_v3, %v4680_v48  ;;  %v4787_v57 = vld [vmem:[%s6950_s7 + $0x34] sm:$0xf0]  ;;  %v4786_v49 = vld [vmem:[%s6950_s7 + $0x34] sm:$0xf]  ;;  %v4784_v3 = vld [vmem:[%s6950_s7 + $0x24] sm:$0xf] }
 0x6ea   :  { %3681 = vmatpush.bf16.msrb.mxu1 %v7311_v23  ;;  %3707 = vmatpush.bf16.msrb.mxu3 %v7312_v39  ;;  %v4790_v23 = vld [vmem:[%s6950_s7 + $0x54] sm:$0xf]  ;;  %v7726_v39 = vld [vmem:[#allocation136_spill] sm:$0xff]  ;;  %v268_v48 = vperm.slane %v7725_v21, 4 }
 0x6ec   :  { %3670 = vmatpush.bf16.msrb.mxu0 %v7298_v25  ;;  %3696 = vmatpush.bf16.msra.mxu2 %v7363_v28  ;;  %v4679_v25 = vor.u32 %v4811_v36, %v4678_v19  ;;  %v4599_v28 = vor.u32 %v4791_v4, %v4598_v6  ;;  %v4574_v19 = vld [vmem:[%s6950_s7 + $0x20] sm:$0xf]  ;;  %v4785_v36 = vld [vmem:[%s6950_s7 + $0x24] sm:$0xf0]  ;;  %v1171_v18 = vadd.f32 %v7728_v35, %v268_v48  ;;  %v4624_v48 = vld [vmem:[%s6950_s7 + $0x88] sm:$0xf0] }
 0x6ee   :  { %3682 = vmatpush.bf16.msrb.mxu1 %v7315_v43  ;;  %3708 = vmatpush.bf16.msrb.mxu3 %v7316_v51  ;;  %v1145_v43 = vadd.f32 %v7726_v39, %v266_v31  ;;  %v4803_v39 = vld [vmem:[%s6950_s7 + $0xb4] sm:$0xf0] }
 0x6ef   :  { %3671 = vmatmul.bf16.vlgmr.msrb.gmra.mxu0 %v3557_v56  ;;  %3697 = vmatmul.bf16.vlgmr.msra.gmra.mxu2 %v3557_v56  ;;  %v4664_v56 = vld [vmem:[%s6950_s7 + $0xd8] sm:$0xf0] }
 0x6f0   :  { %4009 = vmatpush.bf16.msra.mxu0 %v4615_v14  ;;  %4035 = vmatpush.bf16.msrb.mxu2 %v4619_v32  ;;  %v4667_v59 = vor.u32 %v4806_v33, %v4664_v56  ;;  %v4587_v32 = vor.u32 %v4786_v49, %v4584_v20  ;;  %v7729_v49 = vld [vmem:[#allocation134_spill] sm:$0xff] }
 0x6f2   :  { %3683 = vmatpush.bf16.msrb.mxu1 %v7654_v12  ;;  %3709 = vmatpush.bf16.msrb.mxu3 %v7655_v52  ;;  %v4603_v52 = vor.u32 %v4790_v23, %v4600_v53  ;;  %v4646_v23 = vld [vmem:[%s6950_s7 + $0xb0] sm:$0xf] }
 0x6f4   :  { %4010 = vmatpush.bf16.msra.mxu0 %v4607_v50  ;;  %4036 = vmatpush.bf16.msrb.mxu2 %v4611_v47  ;;  %v4655_v50 = vor.u32 %v4805_v46, %v4654_v7  ;;  %v4659_v47 = vor.u32 %v4804_v34, %v4656_v9  ;;  %v4632_v7 = vld [vmem:[%s6950_s7 + $0x98] sm:$0xf0]  ;;  %v4622_v9 = vld [vmem:[%s6950_s7 + $0x80] sm:$0xf] }
 0x6f5   :  { %3684 = vmatmul.bf16.vlgmr.msrb.gmra.mxu1 %v3558_v44  ;;  %3710 = vmatmul.bf16.vlgmr.msrb.gmra.mxu3 %v3558_v44  ;;  %v4582_v44 = vld [vmem:[%s6950_s7 + $0x30] sm:$0xf] }
 0x6f6   :  { %4022 = vmatpush.bf16.msra.mxu1 %v4679_v25  ;;  %4048 = vmatpush.bf16.msra.mxu3 %v4683_v38  ;;  %v4583_v14 = vor.u32 %v4787_v57, %v4582_v44  ;;  %v4630_v57 = vld [vmem:[%s6950_s7 + $0x90] sm:$0xf] }
 0x6f8   :  { %4011 = vmatpush.bf16.msra.mxu0 %v4599_v28  ;;  %4037 = vmatpush.bf16.msrb.mxu2 %v4603_v52  ;;  %v4648_v28 = vld [vmem:[%s6950_s7 + $0xb8] sm:$0xf0]  ;;  %v4566_v52 = vld [vmem:[%s6950_s7 + $0x10] sm:$0xf] }
 0x6fa   :  { %4023 = vmatpush.bf16.msra.mxu1 %v4671_v8  ;;  %4049 = vmatpush.bf16.msra.mxu3 %v4675_v61  ;;  %v4782_v8 = vld [vmem:[%s6950_s7 + $0x14] sm:$0xf] }
 0x6fb   :  { %v4571_v29 = vor.u32 %v4782_v8, %v4568_v37 }
 0x6fc   :  { %4012 = vmatpush.bf16.msra.mxu0 %v4591_v5  ;;  %4038 = vmatpush.bf16.msrb.mxu2 %v4595_v22 }
 0x6fe   :  { %4024 = vmatpush.bf16.msra.mxu1 %v4663_v30  ;;  %4050 = vmatpush.bf16.msra.mxu3 %v4667_v59 }
 0x700   :  { %4013 = vmatpush.bf16.msra.mxu0 %v4583_v14  ;;  %4039 = vmatpush.bf16.msrb.mxu2 %v4587_v32  ;;  %v4798_v32 = vld [vmem:[%s6950_s7 + $0x94] sm:$0xf] }
 0x702   :  { %4025 = vmatpush.bf16.msra.mxu1 %v4655_v50  ;;  %4051 = vmatpush.bf16.msra.mxu3 %v4659_v47  ;;  %v4797_v47 = vld [vmem:[%s6950_s7 + $0x84] sm:$0xf0] }
 0x74c   :  { %v3568_v24 = vpop.f32.mrf.mxu0 }
 0x752   :  { %v3581_v58 = vpop.f32.mrf.mxu1  ;;  %v3594_v60 = vpop.f32.mrf.mxu2 }
 0x753   :  { %v3582_v51 = vadd.f32 %v3581_v58, %v3568_v24  ;;  %v4575_v58 = vor.u32 %v4785_v36, %v4574_v19 }
 0x754   :  { %v3570_v12 = vpop.f32.mrf.mxu0 }
 0x755   :  { %v3715_v13 = vadd.f32 %v3582_v51, %v1145_v43  ;;  %4014 = vmatpush.bf16.msra.mxu0 %v4575_v58  ;;  %v4647_v43 = vor.u32 %v4803_v39, %v4646_v23  ;;  %v4802_v51 = vld [vmem:[%s6950_s7 + $0xb4] sm:$0xf] }
 0x756   :  { %v4651_v42 = vor.u32 %v4802_v51, %v4648_v28 }
 0x757   :  { %v4552_v0 = vmul.f32 -1.442695, %v3715_v13  ;;  %4026 = vmatpush.bf16.msra.mxu1 %v4647_v43  ;;  %v4783_v13 = vld [vmem:[%s6950_s7 + $0x14] sm:$0xf0] }
 0x758   :  { %v3607_v40 = vpop.f32.mrf.mxu3  ;;  %v4567_v26 = vor.u32 %v4783_v13, %v4566_v52  ;;  %4052 = vmatpush.bf16.msra.mxu3 %v4651_v42  ;;  %v270_v13 = vperm.slane %v7725_v21, 6 }
 0x759   :  { %4959 = vpow2.f32 %v4552_v0  ;;  %v3608_v10 = vadd.f32 %v3607_v40, %v3594_v60  ;;  %v4576_v60 = vld [vmem:[%s6950_s7 + $0x28] sm:$0xf0]  ;;  %v4801_v0 = vld [vmem:[%s6950_s7 + $0xa4] sm:$0xf0] }
 0x75a   :  { %v3583_v27 = vpop.f32.mrf.mxu1  ;;  %v3596_v1 = vpop.f32.mrf.mxu2  ;;  %v4579_v4 = vor.u32 %v4784_v3, %v4576_v60  ;;  %v4639_v22 = vor.u32 %v4801_v0, %v4638_v2  ;;  %4015 = vmatpush.bf16.msra.mxu0 %v4567_v26  ;;  %v4635_v3 = vor.u32 %v4798_v32, %v4632_v7  ;;  %v4623_v60 = vor.u32 %v4797_v47, %v4622_v9  ;;  %v7730_v0 = vld [vmem:[#allocation139_spill] sm:$0xff] }
 0x75b   :  { %v3716_v41 = vadd.f32 %v3608_v10, %v1158_v17  ;;  %v4558_v17 = vld [vmem:[%s6950_s7] sm:$0xf]  ;;  %v4781_v10 = vld [vmem:[%s6950_s7 + $0x4] sm:$0xf0]  ;;  %v4780_v27 = vld [vmem:[%s6950_s7 + $0x4] sm:$0xf]  ;;  %v1197_v45 = vadd.f32 %v7731_v55, %v270_v13 }
 0x75c   :  { %v3620_v24 = vpop.f32.mrf.mxu0  ;;  %4040 = vmatpush.bf16.msrb.mxu2 %v4579_v4  ;;  %4027 = vmatpush.bf16.msra.mxu1 %v4639_v22  ;;  %v4559_v56 = vor.u32 %v4781_v10, %v4558_v17  ;;  %v4560_v1 = vld [vmem:[%s6950_s7 + $0x8] sm:$0xf0] }
 0x75d   :  { %v4553_v31 = vmul.f32 -1.442695, %v3716_v41  ;;  %v1184_v41 = vadd.f32 %v7729_v49, %v269_v15  ;;  %4053 = vmatpush.bf16.msra.mxu3 %v4643_v11 }
 0x75e   :  { %4016 = vmatpush.bf16.msra.mxu0 %v4559_v56 }
 0x75f   :  { %v4960_v25 = vpop.eup %4959  ;;  %4961 = vpow2.f32 %v4553_v31  ;;  %v4563_v31 = vor.u32 %v4780_v27, %v4560_v1 }
 0x760   :  { %v6823_v38 = vadd.f32 1.0, %v4960_v25  ;;  %v3609_v6 = vpop.f32.mrf.mxu3  ;;  %4041 = vmatpush.bf16.msrb.mxu2 %v4571_v29  ;;  %v4796_v25 = vld [vmem:[%s6950_s7 + $0x84] sm:$0xf] }
 0x761   :  { %4054 = vmatpush.bf16.msra.mxu3 %v4635_v3  ;;  %v4627_v23 = vor.u32 %v4796_v25, %v4624_v48 }
 0x762   :  { %4963 = vrcp.f32 %v6823_v38  ;;  %v3633_v53 = vpop.f32.mrf.mxu1  ;;  %v3646_v12 = vpop.f32.mrf.mxu2  ;;  %v3736_v52 = vand.u32 2147483648, %v6823_v38  ;;  %vm3730_vm4 = vweird.f32 %v6823_v38  ;;  %v3734_v35 = vand.u32 2147483647, %v6823_v38 }
 0x763   :  { %v3634_v63 = vadd.f32 %v3633_v53, %v3620_v24  ;;  %v4799_v24 = vld [vmem:[%s6950_s7 + $0x94] sm:$0xf0] }
 0x764   :  { %v3622_v61 = vpop.f32.mrf.mxu0  ;;  %v4631_v50 = vor.u32 %v4799_v24, %v4630_v57  ;;  %4042 = vmatpush.bf16.msrb.mxu2 %v4563_v31  ;;  %v3737_v26 = vor.u32 1.1754944e-38, %v3736_v52  ;;  %vm3735_vm6 = vcmp.eq.f32.partialorder %v3734_v35, 8.507059e+37 }
 0x765   :  { %v4962_v5 = vpop.eup %4961  ;;  %v3755_v40 = vadd.f32 %v3634_v63, %v1171_v18  ;;  %4055 = vmatpush.bf16.msra.mxu3 %v4627_v23 }
 0x766   :  { %v6864_v33 = vadd.f32 1.0, %v4962_v5  ;;  %4028 = vmatpush.bf16.msra.mxu1 %v4631_v50 }
 0x767   :  { %v4554_v30 = vmul.f32 -1.442695, %v3755_v40 }
 0x768   :  { %v6878_v59 = vpop.eup %4963  ;;  %4965 = vrcp.f32 %v6864_v33  ;;  %v3659_v44 = vpop.f32.mrf.mxu3  ;;  %v3751_v22 = vand.u32 2147483648, %v6864_v33  ;;  %vm3745_vm8 = vweird.f32 %v6864_v33  ;;  %v3749_v17 = vand.u32 2147483647, %v6864_v33 }
 0x769   :  { %4967 = vpow2.f32 %v4554_v30  ;;  %v3660_v14 = vadd.f32 %v3659_v44, %v3646_v12  ;;  %v3726_v20 = vmul.f32 %v6878_v59, %v6823_v38  ;;  %vm3731_vm3 = vweird.f32 %v6878_v59 }
 0x76a   :  { %v3635_v46 = vpop.f32.mrf.mxu1  ;;  %v3648_v34 = vpop.f32.mrf.mxu2  ;;  %4029 = vmatpush.bf16.msra.mxu1 %v4623_v60  ;;  %vm3732_vm5 = vmor %vm3730_vm4, %vm3731_vm3  ;;  %v271_v30 = vperm.slane %v7725_v21, 7  ;;  %v3752_v57 = vor.u32 1.1754944e-38, %v3751_v22  ;;  %vm3750_vm10 = vcmp.eq.f32.partialorder %v3749_v17, 8.507059e+37  ;;  %vm4071_vm3 = vcmask 1041408  }
 0x76b   :  { %v3756_v19 = vadd.f32 %v3660_v14, %v1184_v41  ;;  %v3727_v36 = vsub.f32 1.0, %v3726_v20  ;;  %vm4083_vm4 = vcmask 1024  }
 0x76c   :  { %v3672_v58 = vpop.f32.mrf.mxu0 }
 0x76d   :  { %v4555_v6 = vmul.f32 -1.442695, %v3756_v19  ;;  %v3728_v4 = vmul.f32 %v6878_v59, %v3727_v36 }
 0x76e   :  { %v4966_v39 = vpop.eup %4965 }
 0x76f   :  { %v4968_v43 = vpop.eup %4967  ;;  %4969 = vpow2.f32 %v4555_v6  ;;  %v3729_v51 = vadd.f32 %v6878_v59, %v3728_v4  ;;  %v3741_v28 = vmul.f32 %v4966_v39, %v6864_v33  ;;  %vm3746_vm7 = vweird.f32 %v4966_v39  ;;  %v7732_v33 = vld [vmem:[#allocation12_spill] sm:$0xff] }
 0x770   :  { %v6912_v53 = vadd.f32 1.0, %v4968_v43  ;;  %v3661_v12 = vpop.f32.mrf.mxu3  ;;  %vm3747_vm9 = vmor %vm3745_vm8, %vm3746_vm7  ;;  %v1210_v24 = vadd.f32 %v7732_v33, %v271_v30 }
 0x771   :  { %v3742_v18 = vsub.f32 1.0, %v3741_v28  ;;  %v3733_v37 = vsel %vm3732_vm5, %v6878_v59, %v3729_v51 }
 0x772   :  { %4971 = vrcp.f32 %v6912_v53  ;;  %v3685_v63 = vpop.f32.mrf.mxu1  ;;  %v3698_v42 = vpop.f32.mrf.mxu2  ;;  %v3738_v40 = vsel %vm3735_vm6, %v3737_v26, %v3733_v37  ;;  %v3776_v21 = vand.u32 2147483648, %v6912_v53  ;;  %v3774_v46 = vand.u32 2147483647, %v6912_v53 }
 0x773   :  { %v3686_v8 = vadd.f32 %v3685_v63, %v3672_v58  ;;  %v3743_v61 = vmul.f32 %v4966_v39, %v3742_v18  ;;  %vm3770_vm12 = vweird.f32 %v6912_v53 }
 0x774   :  { %v3674_v29 = vpop.f32.mrf.mxu0  ;;  %v3777_v19 = vor.u32 1.1754944e-38, %v3776_v21  ;;  %vm3775_vm14 = vcmp.eq.f32.partialorder %v3774_v46, 8.507059e+37 }
 0x775   :  { %v4970_v2 = vpop.eup %4969  ;;  %v3795_v5 = vadd.f32 %v3686_v8, %v7730_v0  ;;  %v3744_v38 = vadd.f32 %v4966_v39, %v3743_v61  ;;  %v4063_v0 = vld [vmem:[%s6952_s9] sm:$0x3] }
 0x776   :  { %v3764_v15 = vadd.f32 1.0, %v4970_v2  ;;  %v4066_v55 = vperm.slane %v4063_v0, 1 }
 0x777   :  { %v3797_v11 = vmul.f32 %v3795_v5, %v3738_v40  ;;  %v3748_v44 = vsel %vm3747_vm9, %v4966_v39, %v3744_v38 }
 0x778   :  { %v4972_v10 = vpop.eup %4971  ;;  %4973 = vrcp.f32 %v3764_v15  ;;  %v3711_v56 = vpop.f32.mrf.mxu3  ;;  %v3753_v32 = vsel %vm3750_vm10, %v3752_v57, %v3748_v44  ;;  %v3791_v48 = vand.u32 2147483648, %v3764_v15  ;;  %v3789_v4 = vand.u32 2147483647, %v3764_v15  ;;  %v4818_v44 = vld [vmem:[#allocation2] ss:$0 sm:$0xff] }
 0x779   :  { %v3766_v27 = vmul.f32 %v4972_v10, %v6912_v53  ;;  %v3799_v1 = vadd.f32 %v3797_v11, %v1197_v45  ;;  %v3712_v59 = vadd.f32 %v3711_v56, %v3698_v42  ;;  %vm3771_vm11 = vweird.f32 %v4972_v10  ;;  %v3843_v42 = vld [vmem:[%s6951_s8] sm:$0x3] }
 0x77a   :  { %v3687_v49 = vpop.f32.mrf.mxu1  ;;  %v3700_v41 = vpop.f32.mrf.mxu2  ;;  %vm3772_vm13 = vmor %vm3770_vm12, %vm3771_vm11  ;;  %vm3785_vm0 = vweird.f32 %v3764_v15  ;;  %v3792_v43 = vor.u32 1.1754944e-38, %v3791_v48  ;;  %vm3790_vm2 = vcmp.eq.f32.partialorder %v3789_v4, 8.507059e+37  ;;  %v3845_v8 = vperm.slane %v3843_v42, 0 }
 0x77b   :  { %v3767_v14 = vsub.f32 1.0, %v3766_v27  ;;  %4975 = vtanh.f32 %v3799_v1  ;;  %v3796_v20 = vadd.f32 %v3712_v59, %v5888_v16 }
 0x77d   :  { %v3768_v7 = vmul.f32 %v4972_v10, %v3767_v14  ;;  %v3798_v34 = vmul.f32 %v3796_v20, %v3753_v32 }
 0x77e   :  { %v4974_v31 = vpop.eup %4973 }
 0x77f   :  { %v3781_v50 = vmul.f32 %v4974_v31, %v3764_v15  ;;  %v3800_v9 = vadd.f32 %v3798_v34, %v1210_v24  ;;  %v3769_v47 = vadd.f32 %v4972_v10, %v3768_v7  ;;  %vm3786_vm15 = vweird.f32 %v4974_v31 }
 0x780   :  { %v3713_v36 = vpop.f32.mrf.mxu3  ;;  %vm3787_vm1 = vmor %vm3785_vm0, %vm3786_vm15  ;;  %v4065_v15 = vperm.slane %v4063_v0, 0 }
 0x781   :  { %v4976_v16 = vpop.eup %4975  ;;  %v3782_v3 = vsub.f32 1.0, %v3781_v50  ;;  %4977 = vtanh.f32 %v3800_v9  ;;  %v3773_v25 = vsel %vm3772_vm13, %v4972_v10, %v3769_v47 }
 0x782   :  { %v3803_v58 = vsub.f32 %v6657_v54, %v4976_v16  ;;  %v3778_v60 = vsel %vm3775_vm14, %v3777_v19, %v3773_v25 }
 0x783   :  { %v3783_v6 = vmul.f32 %v4974_v31, %v3782_v3 }
 0x784   :  { %v3805_v23 = vmul.f32 %v3803_v58, %v3778_v60 }
 0x785   :  { %v3784_v39 = vadd.f32 %v4974_v31, %v3783_v6 }
 0x786   :  { %v3807_v51 = vadd.f32 %v4976_v16, %v3805_v23 }
 0x787   :  { %v4978_v28 = vpop.eup %4977  ;;  %v3788_v53 = vsel %vm3787_vm1, %v4974_v31, %v3784_v39 }
 0x788   :  { %v3804_v12 = vsub.f32 %v6664_v62, %v4978_v28  ;;  %v3809_v52 = vpack.c.bf16 %v3807_v51, %v3807_v51  ;;  %v3793_v35 = vsel %vm3790_vm2, %v3792_v43, %v3788_v53  ;;  %v3846_v62 = vperm.slane %v3843_v42, 1 }
 0x78a   :  { %4017 = vmatmul.bf16.vlgmr.msra.gmra.mxu0 %v3809_v52  ;;  %4043 = vmatmul.bf16.vlgmr.msrb.gmra.mxu2 %v3809_v52  ;;  %v3806_v54 = vmul.f32 %v3804_v12, %v3793_v35 }
 0x78c   :  { %v3808_v18 = vadd.f32 %v4978_v28, %v3806_v54 }
 0x78e   :  { %v3810_v63 = vpack.c.bf16 %v3808_v18, %v3808_v18 }
 0x790   :  { %4030 = vmatmul.bf16.vlgmr.msra.gmra.mxu1 %v3810_v63  ;;  %4056 = vmatmul.bf16.vlgmr.msra.gmra.mxu3 %v3810_v63 }
 0x807   :  { %v4018_v13 = vpop.f32.mrf.mxu0 }
 0x808   :  { %v4019_v37 = vadd.f32 %v4018_v13, %v3845_v8 }
 0x80d   :  { %v4031_v61 = vpop.f32.mrf.mxu1  ;;  %v4044_v26 = vpop.f32.mrf.mxu2 }
 0x80e   :  { %v4032_v29 = vadd.f32 %v4031_v61, %v4019_v37  ;;  %v4045_v38 = vadd.f32 %v4044_v26, %v3846_v62 }
 0x80f   :  { %v4020_v2 = vpop.f32.mrf.mxu0 }
 0x810   :  { %v4061_v5 = vmax.f32 %v4032_v29, 0.0 }
 0x812   :  { %v4069_v10 = vmul.f32 %v4065_v15, %v4061_v5 }
 0x813   :  { %v4057_v40 = vpop.f32.mrf.mxu3 }
 0x814   :  { %v4058_v22 = vadd.f32 %v4057_v40, %v4045_v38  ;;  %v4072_v56 = vsel %vm4071_vm3, %v4069_v10, 0.0 }
 0x815   :  { %v4033_v45 = vpop.f32.mrf.mxu1  ;;  %v4046_v11 = vpop.f32.mrf.mxu2 }
 0x816   :  { %v4062_v17 = vmax.f32 %v4058_v22, 0.0 }
 0x818   :  { %v4070_v30 = vmul.f32 %v4066_v55, %v4062_v17 }
 0x81a   :  { %v4073_v27 = vsel %vm4071_vm3, %v4070_v30, 0.0 }
 0x81b   :  { %v4059_v1 = vpop.f32.mrf.mxu3  ;;  %v4074_v59 = vadd.f32 %v4073_v27, %v4072_v56 }
 0x81d   :  { %4075 = vadd.xlane.f32.xlu0 %v4074_v59 }
 0x890   :  { %v4076_v57 = vpop.xlane.xlu0 %4075 }
 0x891   :  { %v4081_v49 = vadd.f32 %v4818_v44, %v4076_v57 }
 0x893   :  { %v4082_v41 = vmax.f32 %v4081_v49, 0.0 }
 0x895   :  { %4084 = vst.msk [vmem:[%s6954_s11] sm:$0x3] %vm4083_vm4, %v4082_v41 }
 0x896   :  { %4089 = vsyncpa [#allocation4], 1 }
 0x897   :  { %4090 = vsyncpa [#allocation6], 1 }

</bundles_post_ra>
